<compile_context>
chip_gen: v6e
topology: v6e:2x2x1
jax: 0.10.0
libtpu: 0.0.40
codegen_flags: <defaults>
</compile_context>

<pallas_src>
import functools

import jax
import jax.numpy as jnp
from jax.experimental import pallas as pl
from jax.experimental.pallas import tpu as pltpu

EPS = 1e-5
BASE = 8  # aligned start of the y image inside the flat ypad scratch


def residual_kernel(*refs, TH, W, Cinp, Cmidp, Coutp, has_skip, has_halo,
                    fuse_taps, base):
    """One (batch, row-tile) grid step: TH*W output pixels, channels padded to 128."""
    it = iter(refs)
    x_ref = next(it)
    xt_ref = next(it) if has_halo else None
    xb_ref = next(it) if has_halo else None
    vec_ref = next(it)
    w1_ref = next(it)
    w3_ref = next(it)
    w2_ref = next(it)
    wsk_ref = next(it) if has_skip else None
    o_ref = next(it)
    ypad_ref = next(it)

    TP = TH * W            # output pixels in this tile
    PE = (TH + 2) * W      # tile pixels + top/bottom halo rows
    PEXT = base + PE + 8   # scratch rows

    # packed per-channel vectors (f32); s2/s3 are folded into w1/w3, conv biases into b2/b3
    s1 = vec_ref[0:1, :Cinp]
    b1 = vec_ref[1:2, :Cinp]
    b2 = vec_ref[2:3, :Cmidp]   # BN2 bias + s2*conv1_bias
    b3 = vec_ref[3:4, :Cmidp]   # BN3 bias + s3*conv2_bias
    bo = vec_ref[4:5, :Coutp]   # conv3 bias (+ skip-conv bias)

    # Tiny defensive zero slivers.  The only reads outside the written y region are at
    # offsets base-1 (tap ky=0,kx=0, col==0) and base+PE (tap ky=2,kx=2, col==W-1) and
    # both are masked out by left_ok/right_ok below; keep the slivers zero anyway.
    ypad_ref[pl.ds(0, base), :] = jnp.zeros((base, Cmidp), jnp.bfloat16)
    ypad_ref[pl.ds(base + PE, PEXT - base - PE), :] = (
        jnp.zeros((PEXT - base - PE, Cmidp), jnp.bfloat16))

    w1 = w1_ref[...]            # (Cinp, Cmidp) bf16, BN2 scale already folded in

    def bn1_conv1(xraw):
        a = jnp.maximum(xraw.astype(jnp.float32) * s1 + b1, 0.0).astype(jnp.bfloat16)
        h = jnp.dot(a, w1, preferred_element_type=jnp.float32)
        return jnp.maximum(h + b2, 0.0)                      # (rows, Cmidp) f32

    # ---- main tile: BN1+ReLU+conv1+(BN2+ReLU) -> stage bf16 into the flat scratch -----
    x_main = x_ref[...]                                       # (TP, Cinp)
    ypad_ref[pl.ds(base + W, TP), :] = bn1_conv1(x_main).astype(jnp.bfloat16)

    # ---- halo rows (zero-padding semantics at the image top/bottom) --------------------
    if has_halo:
        rt = pl.program_id(1)
        nrt = pl.num_programs(1)
        top_valid = (rt > 0).astype(jnp.float32)
        bot_valid = (rt < nrt - 1).astype(jnp.float32)
        yt = bn1_conv1(xt_ref[...]) * top_valid
        yb = bn1_conv1(xb_ref[...]) * bot_valid
        ypad_ref[pl.ds(base, W), :] = yt.astype(jnp.bfloat16)
        ypad_ref[pl.ds(base + W + TP, W), :] = yb.astype(jnp.bfloat16)
    else:
        zrow = jnp.zeros((W, Cmidp), jnp.bfloat16)
        ypad_ref[pl.ds(base, W), :] = zrow
        ypad_ref[pl.ds(base + W + TP, W), :] = zrow

    # ---- 3x3 conv taps: static-offset reads from the flat scratch ----------------------
    col = jax.lax.broadcasted_iota(jnp.int32, (TP, 1), 0) % W
    left_ok = col > 0            # for dx = -1 taps
    right_ok = col < (W - 1)     # for dx = +1 taps
    zero_t = jnp.zeros((TP, Cmidp), jnp.bfloat16)

    def tap(ky, kx):
        t = ypad_ref[pl.ds(ky * W + kx + base - 1, TP), :]
        if kx == 0:
            t = jnp.where(left_ok, t, zero_t)
        elif kx == 2:
            t = jnp.where(right_ok, t, zero_t)
        return t

    if fuse_taps:
        # single fused im2col matmul, K = 9*Cmid (best on v6e's 256-deep MXU)
        tmat = jnp.concatenate([tap(ky, kx) for ky in range(3) for kx in range(3)],
                               axis=1)
        acc = jnp.dot(tmat, w3_ref[...], preferred_element_type=jnp.float32)
    else:
        # 9 accumulating per-tap matmuls: no concat store/reload traffic (v5e / v7x)
        acc = jnp.zeros((TP, Cmidp), jnp.float32)
        for ky in range(3):
            for kx in range(3):
                k = ky * 3 + kx
                acc = acc + jnp.dot(tap(ky, kx),
                                    w3_ref[pl.ds(k * Cmidp, Cmidp), :],
                                    preferred_element_type=jnp.float32)

    # ---- (BN3 scale folded) + bias + ReLU + 1x1 conv -----------------------------------
    z = jnp.maximum(acc + b3, 0.0).astype(jnp.bfloat16)
    out = jnp.dot(z, w2_ref[...], preferred_element_type=jnp.float32)

    # ---- skip path ----------------------------------------------------------------------
    if has_skip:
        res = jnp.dot(x_main.astype(jnp.bfloat16), wsk_ref[...],
                      preferred_element_type=jnp.float32)
    else:
        res = x_main.astype(jnp.float32)   # ins == outs: identity skip, no matmul / DMA

    o_ref[...] = (out + res + bo).astype(o_ref.dtype)


def _round_up(v, m):
    return ((v + m - 1) // m) * m


def _pad2d(a, shape):
    return jnp.zeros(shape, a.dtype).at[:a.shape[0], :a.shape[1]].set(a)


def _device_knobs():
    try:
        kind = jax.devices()[0].device_kind.lower()
    except Exception:
        kind = ""
    if "v7" in kind or "7x" in kind:
        # 64 MiB VMEM/TC: leave headroom for compiler scratch; MRB-friendly per-tap matmuls
        return dict(vmem_cap=48 * 1024 * 1024, fuse_taps=False, two_tc=True)
    if "v6" in kind or "6e" in kind:
        # 128 MiB VMEM: big tiles + fused K=9*Cmid im2col matmul
        return dict(vmem_cap=100 * 1024 * 1024, fuse_taps=True, two_tc=False)
    # v5e / v5p / unknown: conservative budget, per-tap matmuls (single vst slot)
    return dict(vmem_cap=64 * 1024 * 1024, fuse_taps=False, two_tc=False)


def residual_pallas(x_nchw, p):
    N, Cin, H, W = x_nchw.shape
    Cmid = p['w1'].shape[1]
    Cout = p['w2'].shape[1]
    has_skip = p.get('wsk', None) is not None

    assert W % 8 == 0, "width must be a multiple of 8 (sublane tiling)"
    # TODO(synk): widths that are not multiples of 8 would need width padding.

    Cinp = _round_up(Cin, 128)
    Cmidp = _round_up(Cmid, 128)
    Coutp = _round_up(Cout, 128)
    Cvec = max(Cinp, Cmidp, Coutp)

    knobs = _device_knobs()
    vmem_cap = knobs['vmem_cap']
    fuse_taps = knobs['fuse_taps']
    two_tc = knobs['two_tc']

    # input streamed in bf16 when its (sublane) tile is bf16-native; f32 fallback otherwise
    in_bf16 = (W % 16 == 0)
    xdt = jnp.bfloat16 if in_bf16 else jnp.float32

    # ---- per-step VMEM working-set estimate (double-buffered where relevant) -----------
    def step_vmem_bytes(TH_):
        TP_ = TH_ * W
        PE_ = (TH_ + 2) * W
        PEXT_ = BASE + PE_ + 8
        halo = (H // TH_) > 1
        xb = 2 if in_bf16 else 4
        b = 2 * xb * TP_ * Cinp                                   # input tile
        if halo:
            b += 2 * 2 * xb * W * Cinp                            # two 1-row halos
        b += 2 * 4 * TP_ * Coutp                                  # f32 output tile
        b += 4 * 8 * Cvec                                         # packed vectors
        b += 2 * 2 * (Cinp * Cmidp + 9 * Cmidp * Cmidp + Cmidp * Coutp)  # bf16 weights
        if has_skip:
            b += 2 * 2 * Cinp * Coutp
        b += 2 * PEXT_ * Cmidp                                    # ypad scratch (bf16)
        b += 4 * TP_ * Cmidp * 3 + 4 * TP_ * Coutp                # live f32 intermediates
        if fuse_taps:
            b += 2 * TP_ * 9 * Cmidp                              # im2col tmat (bf16)
        return b

    def fits(TH_):
        return (step_vmem_bytes(TH_) * 14) // 10 <= vmem_cap

    # ---- spatial row-tile size: whole image if it fits, else largest fitting divisor ---
    cands = []
    for t in (H, 64, 32, 16, 8):
        if t <= H and H % t == 0 and t not in cands:
            cands.append(t)
    if not cands:
        cands = [H]

    TH = None
    if two_tc and N % 2 == 1:
        # keep N*nrt even so the 2 TensorCores split the ("parallel","parallel") grid evenly
        for t in cands:
            if ((H // t) % 2 == 0) and fits(t):
                TH = t
                break
    if TH is None:
        for t in cands:
            if fits(t):
                TH = t
                break
    if TH is None:
        TH = cands[-1]

    nrt = H // TH
    has_halo = nrt > 1
    TP = TH * W
    PE = (TH + 2) * W
    PEXT = BASE + PE + 8

    vmem_limit = int(min(vmem_cap, max((step_vmem_bytes(TH) * 14) // 10,
                                       32 * 1024 * 1024)))

    # ---- fold scales/biases into weights, pack per-channel vectors ----------------------
    vec = jnp.zeros((8, Cvec), jnp.float32)
    vec = vec.at[0, :Cin].set(p['s1'][0])
    vec = vec.at[1, :Cin].set(p['b1'][0])
    vec = vec.at[2, :Cmid].set(p['b2'][0] + p['s2'][0] * p['wb1'][0])  # conv1 bias fold
    vec = vec.at[3, :Cmid].set(p['b3'][0] + p['s3'][0] * p['wb3'][0])  # conv2 bias fold
    bout = p['wb2'][0] + (p['bsk'][0] if has_skip else 0.0)            # skip bias fold
    vec = vec.at[4, :Cout].set(bout)

    w1f = p['w1'] * p['s2'][0][None, :]                 # fold BN2 scale into conv1 cols
    w1p = _pad2d(w1f, (Cinp, Cmidp)).astype(jnp.bfloat16)
    w3f = p['w3'] * p['s3'][0][None, None, :]           # fold BN3 scale into conv2 cols
    w3p = jnp.zeros((9, Cmidp, Cmidp), jnp.float32).at[:, :Cmid, :Cmid].set(w3f)
    w3p = w3p.reshape(9 * Cmidp, Cmidp).astype(jnp.bfloat16)
    w2p = _pad2d(p['w2'], (Cmidp, Coutp)).astype(jnp.bfloat16)
    wskp = _pad2d(p['wsk'], (Cinp, Coutp)).astype(jnp.bfloat16) if has_skip else None

    # ---- input: NCHW -> flat channels-last, channel padded ------------------------------
    x = jnp.transpose(x_nchw, (0, 2, 3, 1)).astype(xdt)
    xp = jnp.zeros((N, H, W, Cinp), xdt).at[..., :Cin].set(x)
    xf = xp.reshape(N, H * W, Cinp)

    in_specs = [pl.BlockSpec((None, TP, Cinp), lambda n, rt: (n, rt, 0))]     # tile rows
    inputs = [xf]
    if has_halo:
        in_specs += [
            pl.BlockSpec((None, W, Cinp),
                         lambda n, rt: (n, jnp.maximum(rt * TH - 1, 0), 0)),        # top halo
            pl.BlockSpec((None, W, Cinp),
                         lambda n, rt: (n, jnp.minimum((rt + 1) * TH, H - 1), 0)),  # bottom halo
        ]
        inputs += [xf, xf]
    in_specs += [
        pl.BlockSpec((8, Cvec), lambda n, rt: (0, 0)),                        # packed vectors
        pl.BlockSpec((Cinp, Cmidp), lambda n, rt: (0, 0)),                    # conv1 1x1
        pl.BlockSpec((9 * Cmidp, Cmidp), lambda n, rt: (0, 0)),               # conv2 3x3
        pl.BlockSpec((Cmidp, Coutp), lambda n, rt: (0, 0)),                   # conv3 1x1
    ]
    inputs += [vec, w1p, w3p, w2p]
    if has_skip:
        in_specs.append(pl.BlockSpec((Cinp, Coutp), lambda n, rt: (0, 0)))    # skip 1x1
        inputs.append(wskp)

    kernel = functools.partial(residual_kernel, TH=TH, W=W, Cinp=Cinp,
                               Cmidp=Cmidp, Coutp=Coutp, has_skip=has_skip,
                               has_halo=has_halo, fuse_taps=fuse_taps, base=BASE)

    outp = pl.pallas_call(
        kernel,
        out_shape=jax.ShapeDtypeStruct((N, H * W, Coutp), jnp.float32),
        grid=(N, nrt),
        in_specs=in_specs,
        out_specs=pl.BlockSpec((None, TP, Coutp), lambda n, rt: (n, rt, 0)),
        scratch_shapes=[pltpu.VMEM((PEXT, Cmidp), jnp.bfloat16)],
        compiler_params=pltpu.CompilerParams(
            dimension_semantics=("parallel", "parallel"),
            vmem_limit_bytes=vmem_limit),
    )(*inputs)

    out = outp.reshape(N, H, W, Coutp)[..., :Cout]
    return jnp.transpose(out, (0, 3, 1, 2)).astype(x_nchw.dtype)


def ref_forward(x_nchw, p):
    """Pure-JAX f32 reference (NHWC, explicit zero padding, unfolded biases)."""
    x = jnp.transpose(x_nchw, (0, 2, 3, 1)).astype(jnp.float32)
    N, H, W, Cin = x.shape
    y = jnp.maximum(x * p['s1'][0] + p['b1'][0], 0.0)
    y = jnp.einsum('nhwc,cd->nhwd', y, p['w1']) + p['wb1'][0]
    y = jnp.maximum(y * p['s2'][0] + p['b2'][0], 0.0)
    yp = jnp.pad(y, ((0, 0), (1, 1), (1, 1), (0, 0)))
    acc = jnp.zeros(y.shape[:3] + (p['w3'].shape[2],), jnp.float32) + p['wb3'][0]
    for ky in range(3):
        for kx in range(3):
            acc = acc + jnp.einsum('nhwc,cd->nhwd',
                                   yp[:, ky:ky + H, kx:kx + W, :],
                                   p['w3'][ky * 3 + kx])
    z = jnp.maximum(acc * p['s3'][0] + p['b3'][0], 0.0)
    z = jnp.einsum('nhwc,cd->nhwd', z, p['w2']) + p['wb2'][0]
    if p.get('wsk', None) is not None:
        res = jnp.einsum('nhwc,cd->nhwd', x, p['wsk']) + p['bsk'][0]
    else:
        res = x
    return jnp.transpose(z + res, (0, 3, 1, 2)).astype(x_nchw.dtype)


def make_params(key, ins, outs):
    mid = outs // 2  # PyTorch code writes outs / 2; integer division intended.
    ks = jax.random.split(key, 12)

    def bn_fold(k, c):
        k1, k2, k3, k4 = jax.random.split(k, 4)
        gamma = 1.0 + 0.1 * jax.random.normal(k1, (c,), jnp.float32)
        beta = 0.1 * jax.random.normal(k2, (c,), jnp.float32)
        mean = 0.1 * jax.random.normal(k3, (c,), jnp.float32)
        var = jax.random.uniform(k4, (c,), jnp.float32, minval=0.5, maxval=1.5)
        scale = gamma / jnp.sqrt(var + EPS)
        bias = beta - mean * scale
        return scale.reshape(1, c), bias.reshape(1, c)

    s1, b1 = bn_fold(ks[0], ins)
    s2, b2 = bn_fold(ks[1], mid)
    s3, b3 = bn_fold(ks[2], mid)

    w1 = 0.1 * jax.random.normal(ks[3], (ins, mid), jnp.float32)
    wb1 = 0.1 * jax.random.normal(ks[4], (1, mid), jnp.float32)
    w3 = 0.1 * jax.random.normal(ks[5], (9, mid, mid), jnp.float32)
    wb3 = 0.1 * jax.random.normal(ks[6], (1, mid), jnp.float32)
    w2 = 0.1 * jax.random.normal(ks[7], (mid, outs), jnp.float32)
    wb2 = 0.1 * jax.random.normal(ks[8], (1, outs), jnp.float32)

    if ins != outs:
        wsk = 0.1 * jax.random.normal(ks[9], (ins, outs), jnp.float32)
        bsk = 0.1 * jax.random.normal(ks[10], (1, outs), jnp.float32)
    else:
        wsk = None   # identity skip: no conv (matches the PyTorch module)
        bsk = None

    return dict(s1=s1, b1=b1, w1=w1, wb1=wb1,
                s2=s2, b2=b2, w3=w3, wb3=wb3,
                s3=s3, b3=b3, w2=w2, wb2=wb2,
                wsk=wsk, bsk=bsk)


if __name__ == "__main__":
    key = jax.random.PRNGKey(0)
    k1, k2, k3, k4 = jax.random.split(key, 4)

    # Case 1: ins != outs -> 1x1 skip conv path
    N, ins, outs, H, W = 2, 4, 8, 16, 16
    x = jax.random.normal(k1, (N, ins, H, W), jnp.float32)
    params = make_params(k2, ins, outs)
    out = jax.block_until_ready(residual_pallas(x, params))
    ref = ref_forward(x, params)
    assert out.shape == (N, outs, H, W), out.shape
    assert jnp.allclose(out, ref, atol=1e-2, rtol=1e-2), \
        float(jnp.max(jnp.abs(out - ref)))

    # Case 2: ins == outs -> identity skip (kernel skips the skip matmul entirely)
    x2 = jax.random.normal(k3, (N, outs, H, W), jnp.float32)
    params2 = make_params(k4, outs, outs)
    out2 = jax.block_until_ready(residual_pallas(x2, params2))
    ref2 = ref_forward(x2, params2)
    assert out2.shape == (N, outs, H, W), out2.shape
    assert jnp.allclose(out2, ref2, atol=1e-2, rtol=1e-2), \
        float(jnp.max(jnp.abs(out2 - ref2)))

    # Case 3: multi-row-tile path (H large enough to need halos on small-VMEM chips)
    x3 = jax.random.normal(k1, (1, ins, 64, 16), jnp.float32)
    out3 = jax.block_until_ready(residual_pallas(x3, params))
    ref3 = ref_forward(x3, params)
    assert jnp.allclose(out3, ref3, atol=1e-2, rtol=1e-2), \
        float(jnp.max(jnp.abs(out3 - ref3)))

    print("KERNEL_OK")
</pallas_src>

<mosaic_0001>
module attributes {stable_mosaic.version = 11 : i64} {
  func.func @residual_kernel(%arg0: i32, %arg1: i32, %arg2: memref<1x256x128xbf16, #tpu.memory_space<vmem>>, %arg3: memref<8x128xf32, #tpu.memory_space<vmem>>, %arg4: memref<128x128xbf16, #tpu.memory_space<vmem>>, %arg5: memref<1152x128xbf16, #tpu.memory_space<vmem>>, %arg6: memref<128x128xbf16, #tpu.memory_space<vmem>>, %arg7: memref<128x128xbf16, #tpu.memory_space<vmem>>, %arg8: memref<1x256x128xf32, #tpu.memory_space<vmem>>, %arg9: memref<304x128xbf16, #tpu.memory_space<vmem>>) attributes {dimension_semantics = [#tpu.dimension_semantics<parallel>, #tpu.dimension_semantics<parallel>], iteration_bounds = array<i64: 2, 1>, scalar_prefetch = 0 : i64, scratch_operands = 1 : i64, tpu.core_type = #tpu.core_type<tc>, window_params = [{transform_indices = @transform_0, window_bounds = array<i64: 1, 256, 128>}, {pipeline_mode = #tpu.pipeline_mode<synchronous>, transform_indices = @transform_1, window_bounds = array<i64: 8, 128>}, {pipeline_mode = #tpu.pipeline_mode<synchronous>, transform_indices = @transform_2, window_bounds = array<i64: 128, 128>}, {pipeline_mode = #tpu.pipeline_mode<synchronous>, transform_indices = @transform_3, window_bounds = array<i64: 1152, 128>}, {pipeline_mode = #tpu.pipeline_mode<synchronous>, transform_indices = @transform_4, window_bounds = array<i64: 128, 128>}, {pipeline_mode = #tpu.pipeline_mode<synchronous>, transform_indices = @transform_5, window_bounds = array<i64: 128, 128>}, {transform_indices = @transform_6, window_bounds = array<i64: 1, 256, 128>}]} {
    %c0 = arith.constant 0 : index
    %c0_0 = arith.constant 0 : index
    %0 = vector.load %arg3[%c0, %c0_0] : memref<8x128xf32, #tpu.memory_space<vmem>>, vector<1x128xf32>
    %c1 = arith.constant 1 : index
    %c0_1 = arith.constant 0 : index
    %1 = vector.load %arg3[%c1, %c0_1] : memref<8x128xf32, #tpu.memory_space<vmem>>, vector<1x128xf32>
    %c2 = arith.constant 2 : index
    %c0_2 = arith.constant 0 : index
    %2 = vector.load %arg3[%c2, %c0_2] : memref<8x128xf32, #tpu.memory_space<vmem>>, vector<1x128xf32>
    %c3 = arith.constant 3 : index
    %c0_3 = arith.constant 0 : index
    %3 = vector.load %arg3[%c3, %c0_3] : memref<8x128xf32, #tpu.memory_space<vmem>>, vector<1x128xf32>
    %c4 = arith.constant 4 : index
    %c0_4 = arith.constant 0 : index
    %4 = vector.load %arg3[%c4, %c0_4] : memref<8x128xf32, #tpu.memory_space<vmem>>, vector<1x128xf32>
    %cst = arith.constant 0.000000e+00 : bf16
    %5 = vector.broadcast %cst : bf16 to vector<8x128xbf16>
    %c0_5 = arith.constant 0 : index
    %c0_6 = arith.constant 0 : index
    %6 = vector.load %arg9[%c0_5, %c0_6] : memref<304x128xbf16, #tpu.memory_space<vmem>>, vector<8x128xbf16>
    tpu.vector_store %arg9[%c0_5, %c0_6], %5 {strides = array<i32>} : memref<304x128xbf16, #tpu.memory_space<vmem>>, vector<8x128xbf16>,
    %cst_7 = arith.constant 0.000000e+00 : bf16
    %7 = vector.broadcast %cst_7 : bf16 to vector<8x128xbf16>
    %c296 = arith.constant 296 : index
    %c0_8 = arith.constant 0 : index
    %8 = vector.load %arg9[%c296, %c0_8] : memref<304x128xbf16, #tpu.memory_space<vmem>>, vector<8x128xbf16>
    tpu.vector_store %arg9[%c296, %c0_8], %7 {strides = array<i32>} : memref<304x128xbf16, #tpu.memory_space<vmem>>, vector<8x128xbf16>,
    %c0_9 = arith.constant 0 : index
    %c0_10 = arith.constant 0 : index
    %9 = vector.load %arg4[%c0_9, %c0_10] : memref<128x128xbf16, #tpu.memory_space<vmem>>, vector<128x128xbf16>
    %c0_11 = arith.constant 0 : index
    %c0_12 = arith.constant 0 : index
    %c0_13 = arith.constant 0 : index
    %10 = vector.load %arg2[%c0_11, %c0_12, %c0_13] : memref<1x256x128xbf16, #tpu.memory_space<vmem>>, vector<1x256x128xbf16>
    %11 = vector.shape_cast %10 : vector<1x256x128xbf16> to vector<256x128xbf16>
    %12 = arith.extf %11 : vector<256x128xbf16> to vector<256x128xf32>
    %13 = vector.broadcast %0 : vector<1x128xf32> to vector<256x128xf32>
    %14 = arith.mulf %12, %13 : vector<256x128xf32>
    %15 = vector.broadcast %1 : vector<1x128xf32> to vector<256x128xf32>
    %16 = arith.addf %14, %15 : vector<256x128xf32>
    %cst_14 = arith.constant 0.000000e+00 : f32
    %17 = vector.broadcast %cst_14 : f32 to vector<256x128xf32>
    %18 = arith.maximumf %16, %17 : vector<256x128xf32>
    %19 = arith.truncf %18 : vector<256x128xf32> to vector<256x128xbf16>
    %cst_15 = arith.constant dense<0.000000e+00> : vector<256x128xf32>
    %20 = tpu.matmul %19, %9, %cst_15 {dimension_numbers = #tpu.dot_dimension_numbers<[1], [0], [0], [1], [0, 0, 1, 1], [], []>} : vector<256x128xbf16>, vector<128x128xbf16>, vector<256x128xf32> -> vector<256x128xf32>
    %21 = vector.broadcast %2 : vector<1x128xf32> to vector<256x128xf32>
    %22 = arith.addf %20, %21 : vector<256x128xf32>
    %cst_16 = arith.constant 0.000000e+00 : f32
    %23 = vector.broadcast %cst_16 : f32 to vector<256x128xf32>
    %24 = arith.maximumf %22, %23 : vector<256x128xf32>
    %25 = arith.truncf %24 : vector<256x128xf32> to vector<256x128xbf16>
    %c24 = arith.constant 24 : index
    %c0_17 = arith.constant 0 : index
    %26 = vector.load %arg9[%c24, %c0_17] : memref<304x128xbf16, #tpu.memory_space<vmem>>, vector<256x128xbf16>
    tpu.vector_store %arg9[%c24, %c0_17], %25 {strides = array<i32>} : memref<304x128xbf16, #tpu.memory_space<vmem>>, vector<256x128xbf16>,
    %cst_18 = arith.constant 0.000000e+00 : bf16
    %27 = vector.broadcast %cst_18 : bf16 to vector<16x128xbf16>
    %c8 = arith.constant 8 : index
    %c0_19 = arith.constant 0 : index
    %28 = vector.load %arg9[%c8, %c0_19] : memref<304x128xbf16, #tpu.memory_space<vmem>>, vector<16x128xbf16>
    tpu.vector_store %arg9[%c8, %c0_19], %27 {strides = array<i32>} : memref<304x128xbf16, #tpu.memory_space<vmem>>, vector<16x128xbf16>,
    %c280 = arith.constant 280 : index
    %c0_20 = arith.constant 0 : index
    %29 = vector.load %arg9[%c280, %c0_20] : memref<304x128xbf16, #tpu.memory_space<vmem>>, vector<16x128xbf16>
    tpu.vector_store %arg9[%c280, %c0_20], %27 {strides = array<i32>} : memref<304x128xbf16, #tpu.memory_space<vmem>>, vector<16x128xbf16>,
    %30 = tpu.iota {dimensions = array<i32: 0>} : vector<256x1xi32>
    %c16_i32 = arith.constant 16 : i32
    %c0_i32 = arith.constant 0 : i32
    %31 = arith.cmpi eq, %c16_i32, %c0_i32 : i32
    %c1_i32 = arith.constant 1 : i32
    %32 = arith.select %31, %c1_i32, %c16_i32 : i32
    %33 = vector.broadcast %32 : i32 to vector<256x1xi32>
    %34 = arith.remsi %30, %33 : vector<256x1xi32>
    %c0_i32_21 = arith.constant 0 : i32
    %35 = vector.broadcast %c0_i32_21 : i32 to vector<256x1xi32>
    %36 = arith.cmpi ne, %34, %35 : vector<256x1xi32>
    %c0_i32_22 = arith.constant 0 : i32
    %37 = vector.broadcast %c0_i32_22 : i32 to vector<256x1xi32>
    %38 = arith.cmpi slt, %34, %37 : vector<256x1xi32>
    %c0_i32_23 = arith.constant 0 : i32
    %39 = arith.cmpi slt, %32, %c0_i32_23 : i32
    %40 = vector.broadcast %39 : i1 to vector<256x1xi1>
    %41 = vector.broadcast %40 : vector<256x1xi1> to vector<256x1xi1>
    %42 = arith.xori %38, %41 : vector<256x1xi1>
    %43 = arith.andi %42, %36 : vector<256x1xi1>
    %44 = vector.broadcast %32 : i32 to vector<256x1xi32>
    %45 = arith.addi %34, %44 : vector<256x1xi32>
    %46 = arith.select %43, %45, %34 : vector<256x1xi1>, vector<256x1xi32>
    %c0_i32_24 = arith.constant 0 : i32
    %47 = vector.broadcast %c0_i32_24 : i32 to vector<256x1xi32>
    %48 = arith.cmpi sgt, %46, %47 : vector<256x1xi32>
    %c15_i32 = arith.constant 15 : i32
    %49 = vector.broadcast %c15_i32 : i32 to vector<256x1xi32>
    %50 = arith.cmpi slt, %46, %49 : vector<256x1xi32>
    %cst_25 = arith.constant 0.000000e+00 : bf16
    %51 = vector.broadcast %cst_25 : bf16 to vector<256x128xbf16>
    %cst_26 = arith.constant 0.000000e+00 : f32
    %52 = vector.broadcast %cst_26 : f32 to vector<256x128xf32>
    %c7 = arith.constant 7 : index
    %c0_27 = arith.constant 0 : index
    %53 = vector.load %arg9[%c7, %c0_27] : memref<304x128xbf16, #tpu.memory_space<vmem>>, vector<256x128xbf16>
    %54 = vector.shape_cast %48 : vector<256x1xi1> to vector<256x1xi1>
    %55 = vector.broadcast %54 : vector<256x1xi1> to vector<256x128xi1>
    %56 = arith.select %55, %53, %51 : vector<256x128xi1>, vector<256x128xbf16>
    %c0_28 = arith.constant 0 : index
    %c0_29 = arith.constant 0 : index
    %57 = vector.load %arg5[%c0_28, %c0_29] : memref<1152x128xbf16, #tpu.memory_space<vmem>>, vector<128x128xbf16>
    %cst_30 = arith.constant dense<0.000000e+00> : vector<256x128xf32>
    %58 = tpu.matmul %56, %57, %cst_30 {dimension_numbers = #tpu.dot_dimension_numbers<[1], [0], [0], [1], [0, 0, 1, 1], [], []>} : vector<256x128xbf16>, vector<128x128xbf16>, vector<256x128xf32> -> vector<256x128xf32>
    %59 = arith.addf %52, %58 : vector<256x128xf32>
    %c8_31 = arith.constant 8 : index
    %c0_32 = arith.constant 0 : index
    %60 = vector.load %arg9[%c8_31, %c0_32] : memref<304x128xbf16, #tpu.memory_space<vmem>>, vector<256x128xbf16>
    %c128 = arith.constant 128 : index
    %c0_33 = arith.constant 0 : index
    %61 = vector.load %arg5[%c128, %c0_33] : memref<1152x128xbf16, #tpu.memory_space<vmem>>, vector<128x128xbf16>
    %cst_34 = arith.constant dense<0.000000e+00> : vector<256x128xf32>
    %62 = tpu.matmul %60, %61, %cst_34 {dimension_numbers = #tpu.dot_dimension_numbers<[1], [0], [0], [1], [0, 0, 1, 1], [], []>} : vector<256x128xbf16>, vector<128x128xbf16>, vector<256x128xf32> -> vector<256x128xf32>
    %63 = arith.addf %59, %62 : vector<256x128xf32>
    %c9 = arith.constant 9 : index
    %c0_35 = arith.constant 0 : index
    %64 = vector.load %arg9[%c9, %c0_35] : memref<304x128xbf16, #tpu.memory_space<vmem>>, vector<256x128xbf16>
    %65 = vector.shape_cast %50 : vector<256x1xi1> to vector<256x1xi1>
    %66 = vector.broadcast %65 : vector<256x1xi1> to vector<256x128xi1>
    %67 = arith.select %66, %64, %51 : vector<256x128xi1>, vector<256x128xbf16>
    %c256 = arith.constant 256 : index
    %c0_36 = arith.constant 0 : index
    %68 = vector.load %arg5[%c256, %c0_36] : memref<1152x128xbf16, #tpu.memory_space<vmem>>, vector<128x128xbf16>
    %cst_37 = arith.constant dense<0.000000e+00> : vector<256x128xf32>
    %69 = tpu.matmul %67, %68, %cst_37 {dimension_numbers = #tpu.dot_dimension_numbers<[1], [0], [0], [1], [0, 0, 1, 1], [], []>} : vector<256x128xbf16>, vector<128x128xbf16>, vector<256x128xf32> -> vector<256x128xf32>
    %70 = arith.addf %63, %69 : vector<256x128xf32>
    %c23 = arith.constant 23 : index
    %c0_38 = arith.constant 0 : index
    %71 = vector.load %arg9[%c23, %c0_38] : memref<304x128xbf16, #tpu.memory_space<vmem>>, vector<256x128xbf16>
    %72 = vector.shape_cast %48 : vector<256x1xi1> to vector<256x1xi1>
    %73 = vector.broadcast %72 : vector<256x1xi1> to vector<256x128xi1>
    %74 = arith.select %73, %71, %51 : vector<256x128xi1>, vector<256x128xbf16>
    %c384 = arith.constant 384 : index
    %c0_39 = arith.constant 0 : index
    %75 = vector.load %arg5[%c384, %c0_39] : memref<1152x128xbf16, #tpu.memory_space<vmem>>, vector<128x128xbf16>
    %cst_40 = arith.constant dense<0.000000e+00> : vector<256x128xf32>
    %76 = tpu.matmul %74, %75, %cst_40 {dimension_numbers = #tpu.dot_dimension_numbers<[1], [0], [0], [1], [0, 0, 1, 1], [], []>} : vector<256x128xbf16>, vector<128x128xbf16>, vector<256x128xf32> -> vector<256x128xf32>
    %77 = arith.addf %70, %76 : vector<256x128xf32>
    %c24_41 = arith.constant 24 : index
    %c0_42 = arith.constant 0 : index
    %78 = vector.load %arg9[%c24_41, %c0_42] : memref<304x128xbf16, #tpu.memory_space<vmem>>, vector<256x128xbf16>
    %c512 = arith.constant 512 : index
    %c0_43 = arith.constant 0 : index
    %79 = vector.load %arg5[%c512, %c0_43] : memref<1152x128xbf16, #tpu.memory_space<vmem>>, vector<128x128xbf16>
    %cst_44 = arith.constant dense<0.000000e+00> : vector<256x128xf32>
    %80 = tpu.matmul %78, %79, %cst_44 {dimension_numbers = #tpu.dot_dimension_numbers<[1], [0], [0], [1], [0, 0, 1, 1], [], []>} : vector<256x128xbf16>, vector<128x128xbf16>, vector<256x128xf32> -> vector<256x128xf32>
    %81 = arith.addf %77, %80 : vector<256x128xf32>
    %c25 = arith.constant 25 : index
    %c0_45 = arith.constant 0 : index
    %82 = vector.load %arg9[%c25, %c0_45] : memref<304x128xbf16, #tpu.memory_space<vmem>>, vector<256x128xbf16>
    %83 = vector.shape_cast %50 : vector<256x1xi1> to vector<256x1xi1>
    %84 = vector.broadcast %83 : vector<256x1xi1> to vector<256x128xi1>
    %85 = arith.select %84, %82, %51 : vector<256x128xi1>, vector<256x128xbf16>
    %c640 = arith.constant 640 : index
    %c0_46 = arith.constant 0 : index
    %86 = vector.load %arg5[%c640, %c0_46] : memref<1152x128xbf16, #tpu.memory_space<vmem>>, vector<128x128xbf16>
    %cst_47 = arith.constant dense<0.000000e+00> : vector<256x128xf32>
    %87 = tpu.matmul %85, %86, %cst_47 {dimension_numbers = #tpu.dot_dimension_numbers<[1], [0], [0], [1], [0, 0, 1, 1], [], []>} : vector<256x128xbf16>, vector<128x128xbf16>, vector<256x128xf32> -> vector<256x128xf32>
    %88 = arith.addf %81, %87 : vector<256x128xf32>
    %c39 = arith.constant 39 : index
    %c0_48 = arith.constant 0 : index
    %89 = vector.load %arg9[%c39, %c0_48] : memref<304x128xbf16, #tpu.memory_space<vmem>>, vector<256x128xbf16>
    %90 = vector.shape_cast %48 : vector<256x1xi1> to vector<256x1xi1>
    %91 = vector.broadcast %90 : vector<256x1xi1> to vector<256x128xi1>
    %92 = arith.select %91, %89, %51 : vector<256x128xi1>, vector<256x128xbf16>
    %c768 = arith.constant 768 : index
    %c0_49 = arith.constant 0 : index
    %93 = vector.load %arg5[%c768, %c0_49] : memref<1152x128xbf16, #tpu.memory_space<vmem>>, vector<128x128xbf16>
    %cst_50 = arith.constant dense<0.000000e+00> : vector<256x128xf32>
    %94 = tpu.matmul %92, %93, %cst_50 {dimension_numbers = #tpu.dot_dimension_numbers<[1], [0], [0], [1], [0, 0, 1, 1], [], []>} : vector<256x128xbf16>, vector<128x128xbf16>, vector<256x128xf32> -> vector<256x128xf32>
    %95 = arith.addf %88, %94 : vector<256x128xf32>
    %c40 = arith.constant 40 : index
    %c0_51 = arith.constant 0 : index
    %96 = vector.load %arg9[%c40, %c0_51] : memref<304x128xbf16, #tpu.memory_space<vmem>>, vector<256x128xbf16>
    %c896 = arith.constant 896 : index
    %c0_52 = arith.constant 0 : index
    %97 = vector.load %arg5[%c896, %c0_52] : memref<1152x128xbf16, #tpu.memory_space<vmem>>, vector<128x128xbf16>
    %cst_53 = arith.constant dense<0.000000e+00> : vector<256x128xf32>
    %98 = tpu.matmul %96, %97, %cst_53 {dimension_numbers = #tpu.dot_dimension_numbers<[1], [0], [0], [1], [0, 0, 1, 1], [], []>} : vector<256x128xbf16>, vector<128x128xbf16>, vector<256x128xf32> -> vector<256x128xf32>
    %99 = arith.addf %95, %98 : vector<256x128xf32>
    %c41 = arith.constant 41 : index
    %c0_54 = arith.constant 0 : index
    %100 = vector.load %arg9[%c41, %c0_54] : memref<304x128xbf16, #tpu.memory_space<vmem>>, vector<256x128xbf16>
    %101 = vector.shape_cast %50 : vector<256x1xi1> to vector<256x1xi1>
    %102 = vector.broadcast %101 : vector<256x1xi1> to vector<256x128xi1>
    %103 = arith.select %102, %100, %51 : vector<256x128xi1>, vector<256x128xbf16>
    %c1024 = arith.constant 1024 : index
    %c0_55 = arith.constant 0 : index
    %104 = vector.load %arg5[%c1024, %c0_55] : memref<1152x128xbf16, #tpu.memory_space<vmem>>, vector<128x128xbf16>
    %cst_56 = arith.constant dense<0.000000e+00> : vector<256x128xf32>
    %105 = tpu.matmul %103, %104, %cst_56 {dimension_numbers = #tpu.dot_dimension_numbers<[1], [0], [0], [1], [0, 0, 1, 1], [], []>} : vector<256x128xbf16>, vector<128x128xbf16>, vector<256x128xf32> -> vector<256x128xf32>
    %106 = arith.addf %99, %105 : vector<256x128xf32>
    %107 = vector.broadcast %3 : vector<1x128xf32> to vector<256x128xf32>
    %108 = arith.addf %106, %107 : vector<256x128xf32>
    %cst_57 = arith.constant 0.000000e+00 : f32
    %109 = vector.broadcast %cst_57 : f32 to vector<256x128xf32>
    %110 = arith.maximumf %108, %109 : vector<256x128xf32>
    %111 = arith.truncf %110 : vector<256x128xf32> to vector<256x128xbf16>
    %c0_58 = arith.constant 0 : index
    %c0_59 = arith.constant 0 : index
    %112 = vector.load %arg6[%c0_58, %c0_59] : memref<128x128xbf16, #tpu.memory_space<vmem>>, vector<128x128xbf16>
    %cst_60 = arith.constant dense<0.000000e+00> : vector<256x128xf32>
    %113 = tpu.matmul %111, %112, %cst_60 {dimension_numbers = #tpu.dot_dimension_numbers<[1], [0], [0], [1], [0, 0, 1, 1], [], []>} : vector<256x128xbf16>, vector<128x128xbf16>, vector<256x128xf32> -> vector<256x128xf32>
    %c0_61 = arith.constant 0 : index
    %c0_62 = arith.constant 0 : index
    %114 = vector.load %arg7[%c0_61, %c0_62] : memref<128x128xbf16, #tpu.memory_space<vmem>>, vector<128x128xbf16>
    %cst_63 = arith.constant dense<0.000000e+00> : vector<256x128xf32>
    %115 = tpu.matmul %11, %114, %cst_63 {dimension_numbers = #tpu.dot_dimension_numbers<[1], [0], [0], [1], [0, 0, 1, 1], [], []>} : vector<256x128xbf16>, vector<128x128xbf16>, vector<256x128xf32> -> vector<256x128xf32>
    %116 = arith.addf %113, %115 : vector<256x128xf32>
    %117 = vector.broadcast %4 : vector<1x128xf32> to vector<256x128xf32>
    %118 = arith.addf %116, %117 : vector<256x128xf32>
    %c0_64 = arith.constant 0 : index
    %c0_65 = arith.constant 0 : index
    %c0_66 = arith.constant 0 : index
    %119 = vector.load %arg8[%c0_64, %c0_65, %c0_66] : memref<1x256x128xf32, #tpu.memory_space<vmem>>, vector<1x256x128xf32>
    %120 = vector.shape_cast %119 : vector<1x256x128xf32> to vector<256x128xf32>
    %121 = vector.shape_cast %118 : vector<256x128xf32> to vector<1x256x128xf32>
    tpu.vector_store %arg8[%c0_64, %c0_65, %c0_66], %121 {strides = array<i32>} : memref<1x256x128xf32, #tpu.memory_space<vmem>>, vector<1x256x128xf32>,
    return
  }
  func.func @transform_0(%arg0: i32, %arg1: i32) -> (i32, i32, i32) {
    %c0_i32 = arith.constant 0 : i32
    %c0_i32_0 = arith.constant 0 : i32
    return %arg0, %arg1, %c0_i32 : i32, i32, i32
  }
  func.func @transform_1(%arg0: i32, %arg1: i32) -> (i32, i32) {
    %c0_i32 = arith.constant 0 : i32
    %c0_i32_0 = arith.constant 0 : i32
    %c0_i32_1 = arith.constant 0 : i32
    return %c0_i32, %c0_i32_0 : i32, i32
  }
  func.func @transform_2(%arg0: i32, %arg1: i32) -> (i32, i32) {
    %c0_i32 = arith.constant 0 : i32
    %c0_i32_0 = arith.constant 0 : i32
    %c0_i32_1 = arith.constant 0 : i32
    return %c0_i32, %c0_i32_0 : i32, i32
  }
  func.func @transform_3(%arg0: i32, %arg1: i32) -> (i32, i32) {
    %c0_i32 = arith.constant 0 : i32
    %c0_i32_0 = arith.constant 0 : i32
    %c0_i32_1 = arith.constant 0 : i32
    return %c0_i32, %c0_i32_0 : i32, i32
  }
  func.func @transform_4(%arg0: i32, %arg1: i32) -> (i32, i32) {
    %c0_i32 = arith.constant 0 : i32
    %c0_i32_0 = arith.constant 0 : i32
    %c0_i32_1 = arith.constant 0 : i32
    return %c0_i32, %c0_i32_0 : i32, i32
  }
  func.func @transform_5(%arg0: i32, %arg1: i32) -> (i32, i32) {
    %c0_i32 = arith.constant 0 : i32
    %c0_i32_0 = arith.constant 0 : i32
    %c0_i32_1 = arith.constant 0 : i32
    return %c0_i32, %c0_i32_0 : i32, i32
  }
  func.func @transform_6(%arg0: i32, %arg1: i32) -> (i32, i32, i32) {
    %c0_i32 = arith.constant 0 : i32
    %c0_i32_0 = arith.constant 0 : i32
    return %arg0, %arg1, %c0_i32 : i32, i32, i32
  }
}

</mosaic_0001>

<bundles_post_ra>
// kernel: tpu_custom_call.1
= control target key start
LH: loop header
LB: loop body
LE: loop exit
PB: predicated region body
PF: predicated region fallthrough
CT: control target
= control target key end

     0   :  { %s13174_s0 = inlined_call_operand.hbm [shape: bf16[2,256,128], index: 0, kind: input, shape index: {}]   ;;  %s13175_s1 = inlined_call_operand.hbm [shape: f32[8,128], index: 1, kind: input, shape index: {}]   ;;  %s13176_s2 = inlined_call_operand.hbm [shape: bf16[128,128], index: 2, kind: input, shape index: {}]   ;;  %s13177_s3 = inlined_call_operand.hbm [shape: bf16[1152,128], index: 3, kind: input, shape index: {}]   ;;  %s13178_s4 = inlined_call_operand.hbm [shape: bf16[128,128], index: 4, kind: input, shape index: {}]   ;;  %s13179_s5 = inlined_call_operand.hbm [shape: bf16[128,128], index: 5, kind: input, shape index: {}]   ;;  %s13180_s6 = inlined_call_operand.hbm [shape: f32[2,256,128], index: 6, kind: output, shape index: {}]  }
   0x1   :  { %13429 = sst [smem:[#allocation107_spill]] %s13175_s1 }
   0x2   :  { %13430 = sst [smem:[#allocation108_spill]] %s13176_s2 }
   0x3   :  { %13431 = sst [smem:[#allocation109_spill]] %s13177_s3 }
   0x4   :  { %11 = vsyncpa [#allocation4], 0 }
   0x5   :  { %13 = vsyncpa [#allocation4 + $0x1], 0 }
   0x6   :  { %14 = vsyncpa [#allocation7], 0 }
   0x7   :  { %15 = vsyncpa [#allocation10], 0 }
   0x8   :  { %16 = vsyncpa [#allocation13], 0 }
   0x9   :  { %17 = vsyncpa [#allocation5], 0 }
   0xa   :  { %19 = vsyncpa [#allocation5 + $0x1], 0  ;;  %s9593_s21 = smov 0   ;;  %s9595_s22 = smov 0  }
   0xb   :  { %s9597_s23 = smov 0   ;;  %s9599_s24 = smov 0  }
   0xc   :  { %s9601_s25 = smov 0   ;;  %s9603_s26 = smov 0  }
   0xd LB: > { %s7625_s27 = sadd.s32 4294967295, %s9543_s26   ;;  %p7627_p0 = scmp.ge.s32.totalorder %s9543_s26, 1  ;;  %s9543_s26 = sphi %s9603_s26, %s25_s26   ;;  %s9539_s25 = sphi %s9601_s25, %s14276_s25   ;;  %s9535_s24 = sphi %s9599_s24, %s14275_s24   ;;  %s9531_s23 = sphi %s9597_s23, %s14274_s23   ;;  %s9527_s22 = sphi %s9595_s22, %s14273_s22   ;;  %s9523_s21 = sphi %s9593_s21, %s14272_s21  }
   0xe   : > { %p9627_p1 = scmp.eq.s32.totalorder %s7625_s27, 0  ;;  %p203_p2 = scmp.lt.s32.totalorder %s9543_s26, 3 }
   0xf   : > { %s9545_s30 = smov [#allocation6]   ;;  %s9546_s9 = smov [#allocation9]  }
  0x10   : > { %s13432_s28 = scalar_select %p9627_p1, 1, 0 }
  0x11   : > { %p9632_p3 = pnand %p7627_p0, %p203_p2  ;;  %s216_s7 = sshll.u32 %s9545_s30, 4  ;;  %s217_s7 = int_to_ptr.vmem [resolvable:$true] %s216_s7 }
  0x12   : > { %s239_s10 = sshll.u32 %s9546_s9, 4  ;;  %s9547_s11 = smov [#allocation8]   ;;  %s240_s10 = int_to_ptr.vmem [resolvable:$true] %s239_s10 }
  0x13   : > { %s13433_s29 = scalar_select %p9632_p3, 1, 0 }
  0x14   : > { %p8961_p5 = pneg %p9632_p3  ;;  %s226_s12 = sshll.u32 %s9547_s11, 4  ;;  %s227_s12 = int_to_ptr.vmem [resolvable:$true] %s226_s12 }
  0x15   : > { %s9304_s14 = scalar_lea.vmem %s217_s7, 128  ;;  %p9312_p11 = scmp.lt.s32.totalorder %s217_s7, %s217_s7 }
  0x16   : > { %p9641_p6 = pnand %p8961_p5, %p9627_p1  ;;  %p9305_p8 = scmp.ne.s32.totalorder %s217_s7, %s9304_s14 }
  0x17   : > { %p9313_p12 = scmp.lt.s32.totalorder %s9304_s14, %s9304_s14 }
  0x18   : > { %p9647_p7 = pneg %p9641_p6 }
  0x19   : > { %p9314_p13 = por %p9313_p12, %p9312_p11 }
  0x1a   : > { %p9307_p9 = pnand %p9305_p8, %p9647_p7 }
  0x1c   : > { %p9308_p10 = pneg %p9307_p9 }
  0x1e   : > { %p9315_p0 = pnand %p9314_p13, %p9308_p10 }
  0x20   : > { %9318 = shalt.err (!%p9315_p0)
}
  0x21   : > { %s13436_s1 = sld [smem:[#allocation107_spill]]  ;;  %s9330_s17 = scalar_lea.vmem %s240_s10, 9216 }
  0x22   : > { %p9331_p2 = scmp.ne.s32.totalorder %s240_s10, %s9330_s17  ;;  %p9338_p3 = scmp.lt.s32.totalorder %s240_s10, %s240_s10 }
  0x23   : > { %p9339_p8 = scmp.lt.s32.totalorder %s9330_s17, %s9330_s17 }
  0x24   : > { %p9333_p5 = pnand %p9331_p2, %p9647_p7 }
  0x25   : > { %p9340_p9 = por %p9339_p8, %p9338_p3 }
  0x26   : > { %p9334_p4 = pneg %p9333_p5 }
  0x27   : > { %8964 = dma.hbm_to_vmem [thread:$0]  (!%p9641_p6), %s13436_s1, 128, %s217_s7, [#allocation7]  }
  0x28   : > { %p9341_p1 = pnand %p9340_p9, %p9334_p4 }
  0x2a   : > { %9344 = shalt.err (!%p9341_p1)
}
  0x2b   : > { %s13184_s18 = smov 64   ;;  %s13185_s19 = smov 4  }
  0x2c   : > { %s13437_s3 = sld [smem:[#allocation109_spill]]  ;;  %s9356_s7 = scalar_lea.vmem %s227_s12, 1024 }
  0x2d   : > { %p9357_p10 = scmp.ne.s32.totalorder %s227_s12, %s9356_s7  ;;  %p9364_p4 = scmp.lt.s32.totalorder %s227_s12, %s227_s12 }
  0x2e   : > { %p9365_p1 = scmp.lt.s32.totalorder %s9356_s7, %s9356_s7 }
  0x2f   : > { %p9359_p11 = pnand %p9357_p10, %p9647_p7 }
  0x30   : > { %p9366_p12 = por %p9365_p1, %p9364_p4 }
  0x31   : > { %p9360_p3 = pneg %p9359_p11 }
  0x32   : > { %8970 = dma.hbm_to_vmem [thread:$0]  (!%p9641_p6), %s13437_s3, 9216, %s240_s10, [#allocation10], %s13184_s18, %s13184_s18, %s13185_s19  }
  0x33   : > { %p9367_p13 = pnand %p9366_p12, %p9360_p3 }
  0x35   : > { %9370 = shalt.err (!%p9367_p13)
}
  0x36   : > { %s13438_s2 = sld [smem:[#allocation108_spill]]  ;;  %s9550_s10 = smov [#allocation11]  }
  0x37   : > { %s252_s14 = sshll.u32 %s9550_s10, 4  ;;  %s9551_s15 = smov [#allocation12]   ;;  %s253_s14 = int_to_ptr.vmem [resolvable:$true] %s252_s14 }
  0x38   : > { %s265_s16 = sshll.u32 %s9551_s15, 4  ;;  %s9382_s17 = scalar_lea.vmem %s253_s14, 1024  ;;  %s266_s16 = int_to_ptr.vmem [resolvable:$true] %s265_s16 }
  0x39   : > { %p9383_p0 = scmp.ne.s32.totalorder %s253_s14, %s9382_s17  ;;  %p9390_p8 = scmp.lt.s32.totalorder %s253_s14, %s253_s14 }
  0x3a   : > { %p9391_p9 = scmp.lt.s32.totalorder %s9382_s17, %s9382_s17 }
  0x3b   : > { %p9385_p2 = pnand %p9383_p0, %p9647_p7 }
  0x3c   : > { %8967 = dma.hbm_to_vmem [thread:$0]  (!%p9641_p6), %s13438_s2, 1024, %s227_s12, [#allocation7], %s13184_s18, %s13184_s18, %s13185_s19  }
  0x3d   : > { %p9386_p5 = pneg %p9385_p2  ;;  %p9392_p10 = por %p9391_p9, %p9390_p8 }
  0x3f   : > { %p9393_p11 = pnand %p9392_p10, %p9386_p5 }
  0x41   : > { %9396 = shalt.err (!%p9393_p11)
}
  0x42   : > { %8973 = dma.hbm_to_vmem [thread:$0]  (!%p9641_p6), %s13178_s4, 1024, %s253_s14, [#allocation10], %s13184_s18, %s13184_s18, %s13185_s19  }
  0x43   : > { %s9408_s30 = scalar_lea.vmem %s266_s16, 1024  ;;  %p9416_p12 = scmp.lt.s32.totalorder %s266_s16, %s266_s16 }
  0x44   : > { %p9409_p3 = scmp.ne.s32.totalorder %s266_s16, %s9408_s30  ;;  %p9417_p13 = scmp.lt.s32.totalorder %s9408_s30, %s9408_s30 }
  0x46   : > { %p9411_p4 = pnand %p9409_p3, %p9647_p7  ;;  %p9418_p0 = por %p9417_p13, %p9416_p12 }
  0x48   : > { %p9412_p1 = pneg %p9411_p4 }
  0x4a   : > { %p9419_p2 = pnand %p9418_p0, %p9412_p1 }
  0x4c   : > { %9422 = shalt.err (!%p9419_p2)
}
  0x4d   : > { %8976 = dma.hbm_to_vmem [thread:$0]  (!%p9641_p6), %s13179_s5, 1024, %s266_s16, [#allocation13], %s13184_s18, %s13184_s18, %s13185_s19  }
  0x4e   : > { %s7626_s8 = sadd.s32 4294967294, %s9543_s26   ;;  %s37_s13 = sadd.s32 1, %s9539_s25 }
  0x4f   : > { %s46_s11 = sadd.s32 1, %s9531_s23  ;;  %p39_p7 = scmp.ge.s32.totalorder %s37_s13, 2 }
  0x50   : > { %p53_p5 = scmp.ne.s32.totalorder %s9531_s23, %s9527_s22  ;;  %p54_p8 = scmp.eq.s32.totalorder %s9543_s26, 0 }
  0x51   : > { %p59_p9 = scmp.ne.s32.totalorder %s9527_s22, %s9523_s21  ;;  %s14278_s13 = smov (%p39_p7, %s37_s13), 0 }
  0x52   : > { %p9708_p10 = por %p54_p8, %p53_p5  ;;  %p13440_p11 = scmp.ne.s32.totalorder %s13432_s28, 0 }
  0x53   : > { %s41_s15 = ssub.s32 %s9539_s25, %s14278_s13  ;;  %p190_p3 = scmp.eq.s32.totalorder %s7625_s27, 1 }
  0x54   : > { %p9714_p6 = por %p13440_p11, %p59_p9  ;;  %p44_p4 = scmp.eq.s32.totalorder %s41_s15, 0 }
  0x55   : > { %p196_p1 = scmp.eq.s32.totalorder %s7626_s8, 1  ;;  %p9722_p12 = por %p190_p3, %p53_p5 }
  0x56   : > { %p8990_p13 = scmp.lt.s32.totalorder %s9543_s26, 2  ;;  %s279_s20 = sand.u32 1, %s9531_s23  }
  0x57   : > { %s9728_s17 = scalar_select %p44_p4, %s9531_s23, %s46_s11  }
  0x58   : > { %p9730_p0 = por %p196_p1, %p59_p9  ;;  %s7634_s30 = sshll.u32 %s279_s20, 7 }
  0x59   : > { %s7949_s7 = sshll.u32 %s9539_s25, 11  ;;  %s283_s15 = scalar_lea.vmem [#allocation3], %s7634_s30 }
  0x5a   : > { %s291_s27 = scalar_lea.hbm %s13174_s0, %s7949_s7  ;;  %s292_s8 = sshll.u32 %s283_s15, 4  ;;  %s293_s8 = int_to_ptr.vmem [resolvable:$true] %s292_s8 }
  0x5b   : > { %p9741_p2 = pnand %p8990_p13, %p9708_p10  ;;  %s280_s11 = scalar_lea.sflag [#allocation4], %s279_s20 }
  0x5c   : > { %s9436_s1 = scalar_lea.vmem %s293_s8, 2048  ;;  %s9552_s2 = smov [#allocation3]  }
  0x5d   : > { %p9425_p7 = pneg %p9741_p2  ;;  %p9437_p5 = scmp.ne.s32.totalorder %s293_s8, %s9436_s1 }
  0x5e   : > { %s9441_s3 = sshll.u32 %s9552_s2, 4  ;;  %s9442_s3 = int_to_ptr.vmem [resolvable:$false] %s9441_s3 }
  0x5f   : > { %p9439_p8 = pnand %p9437_p5, %p9425_p7  ;;  %s9443_s18 = scalar_lea.vmem %s9442_s3, 4096 }
  0x60   : > { %p9444_p11 = scmp.lt.s32.totalorder %s293_s8, %s9442_s3  ;;  %p9445_p3 = scmp.lt.s32.totalorder %s9443_s18, %s9436_s1 }
  0x61   : > { %p9440_p9 = pneg %p9439_p8 }
  0x62   : > { %p9446_p4 = por %p9445_p3, %p9444_p11 }
  0x64   : > { %p9447_p1 = pnand %p9446_p4, %p9440_p9 }
  0x66   : > { %9450 = shalt.err (!%p9447_p1)
}
  0x67   : > { %s13445_s10 = smov 4   ;;  %s13446_s30 = smov 64  }
  0x68   : > { %8980 = dma.hbm_to_vmem [thread:$0]  (!%p9741_p2), %s291_s27, 2048, %s293_s8, %s280_s11, %s13446_s30, %s13446_s30, %s13445_s10  }
  0x69   : > { %p13447_p10 = scmp.ne.s32.totalorder %s13433_s29, 0 }
  0x6b   : > { %304 = sbr.rel (%p13447_p10) target bundleno = 1194 (0x4aa), region = 44 }
  0x70   : > { %s9755_s20 = sand.u32 1, %s9527_s22  }
  0x71   : > { %s7638_s2 = sshll.u32 %s9755_s20, 7  ;;  %s307_s1 = scalar_lea.sflag [#allocation4], %s9755_s20 }
  0x72   : > { %s9759_s3 = scalar_lea.vmem [#allocation3], %s7638_s2 }
  0x73   : > { %9502 = dma.done.wait (%p9714_p6), %s307_s1, 2048  }
  0x74   : > { %9504 = vsyncadd (%p9714_p6), %s307_s1, 4294965248  ;;  %p13448_p13 = scmp.ne.s32.totalorder %s13432_s28, 0 }
  0x76   : > { %9506 = dma.done.wait (%p13448_p13), [#allocation7], 1152  }
  0x77   : > { %9508 = vsyncadd (%p13448_p13), [#allocation7], 4294966144 }
  0x78   : > { %9510 = dma.done.wait (%p13448_p13), [#allocation10], 10240  }
  0x79   : > { %9512 = vsyncadd (%p13448_p13), [#allocation10], 4294957056 }
  0x7a   : > { %9514 = dma.done.wait (%p13448_p13), [#allocation13], 1024  }
  0x7b   : > { %9516 = vsyncadd (%p13448_p13), [#allocation13], 4294966272  ;;  %v9056_v0 = vld [vmem:[#allocation8 + $0x38] sm:$0xff]   ;;  %v9057_v1 = vld [vmem:[#allocation8 + $0x30] sm:$0xff]   ;;  %vm9554_vm0 = vmmov 1   ;;  %s7644_s28 = sshll.u32 %s9755_s20, 8 }
  0x7c   : > { %8361 = vmatprep.subr.bf16.mxu0 %v9056_v0  ;;  %v9058_v2 = vld [vmem:[#allocation8 + $0x28] sm:$0xff]   ;;  %v9059_v3 = vld [vmem:[#allocation8 + $0x20] sm:$0xff]   ;;  %v9777_v4 = vld [vmem:[#allocation6] ss:$0 sm:$0xff]  ;;  %vm1622_vm7 = vsmask.f32 3328 }
  0x7d   : > { %8362 = vmatpush3.bf16.msra.mxu0 %v9056_v0  ;;  %v387_v5 = vld [vmem:[%s9759_s3] sm:$0xff]   ;;  %v389_v8 = vld [vmem:[%s9759_s3 + $0x8] sm:$0xff]   ;;  %v391_v9 = vld [vmem:[%s9759_s3 + $0x10] sm:$0xff]   ;;  %vm1623_vm8 = vsmask.f32 7440  ;;  %s13047_s29 = scalar_lea.vmem [#allocation14], %s7644_s28 }
  0x7e   : > { %8363 = vmatprep.subr.bf16.mxu0 %v9057_v1  ;;  %v419_v6 = vunpack.c.l.bf16 %v387_v5  ;;  %v420_v7 = vunpack.c.h.bf16 %v387_v5  ;;  %v393_v10 = vld [vmem:[%s9759_s3 + $0x18] sm:$0xff]   ;;  %v9783_v11 = vld [vmem:[#allocation6 + $0x1] ss:$0 sm:$0xff]  ;;  %v421_v12 = vunpack.c.l.bf16 %v389_v8  ;;  %v422_v13 = vunpack.c.h.bf16 %v389_v8  ;;  %v397_v28 = vld [vmem:[%s9759_s3 + $0x28] sm:$0xff]   ;;  %s7982_s19 = sshll.u32 %s9535_s24, 12  ;;  %s7490_s14 = sshll.u32 %s13047_s29, 4  ;;  %s13123_s14 = int_to_ptr.vmem [resolvable:$true] %s7490_s14 }
  0x7f   : > { %v423_v14 = vunpack.c.l.bf16 %v391_v9  ;;  %v424_v17 = vunpack.c.h.bf16 %v391_v9  ;;  %v425_v18 = vunpack.c.l.bf16 %v393_v10  ;;  %v9060_v19 = vld [vmem:[#allocation8 + $0x18] sm:$0xff]   ;;  %v426_v23 = vunpack.c.h.bf16 %v393_v10  ;;  %v9061_v29 = vld [vmem:[#allocation8 + $0x10] sm:$0xff]   ;;  %v399_v40 = vld [vmem:[%s9759_s3 + $0x30] sm:$0xff]   ;;  %s13121_s27 = scalar_lea.hbm %s13180_s6, %s7982_s19  ;;  %s7475_s24 = scalar_lea.sflag [#allocation5], %s9755_s20 }
  0x80   : > { %v455_v15 = vmul.f32 %v9777_v4, %v419_v6  ;;  %v456_v16 = vmul.f32 %v9777_v4, %v420_v7  ;;  %v457_v20 = vmul.f32 %v9777_v4, %v421_v12  ;;  %v458_v21 = vmul.f32 %v9777_v4, %v422_v13  ;;  %v395_v27 = vld [vmem:[%s9759_s3 + $0x20] sm:$0xff]   ;;  %v9066_v41 = vld [vmem:[#allocation9 + $0x70] sm:$0xff]   ;;  %v9062_v47 = vld [vmem:[#allocation8 + $0x8] sm:$0xff]   ;;  %s9451_s15 = scalar_lea.vmem %s13123_s14, 4096  ;;  %s9555_s8 = smov [#allocation14]  }
  0x81   : > { %8364 = vmatpush3.bf16.msra.mxu0 %v9057_v1  ;;  %v459_v22 = vmul.f32 %v9777_v4, %v423_v14  ;;  %v460_v26 = vmul.f32 %v9777_v4, %v424_v17  ;;  %v9065_v33 = vld [vmem:[#allocation9 + $0x78] sm:$0xff]   ;;  %v461_v38 = vmul.f32 %v9777_v4, %v425_v18  ;;  %v462_v39 = vmul.f32 %v9777_v4, %v426_v23  ;;  %v401_v46 = vld [vmem:[%s9759_s3 + $0x38] sm:$0xff]   ;;  %v9067_v51 = vld [vmem:[#allocation9 + $0x68] sm:$0xff]   ;;  %p9452_p6 = scmp.ne.s32.totalorder %s13123_s14, %s9451_s15  ;;  %s9455_s11 = sshll.u32 %s9555_s8, 4  ;;  %s9456_s11 = int_to_ptr.vmem [resolvable:$false] %s9455_s11 }
  0x82   : > { %8365 = vmatprep.subr.bf16.mxu0 %v9058_v2  ;;  %v491_v24 = vadd.f32 %v9783_v11, %v455_v15  ;;  %v492_v25 = vadd.f32 %v9783_v11, %v456_v16  ;;  %v493_v30 = vadd.f32 %v9783_v11, %v457_v20  ;;  %v494_v31 = vadd.f32 %v9783_v11, %v458_v21  ;;  %v403_v59 = vld [vmem:[%s9759_s3 + $0x40] sm:$0xff]   ;;  %v405_v12 = vld [vmem:[%s9759_s3 + $0x48] sm:$0xff]   ;;  %v407_v17 = vld [vmem:[%s9759_s3 + $0x50] sm:$0xff]   ;;  %s9457_s18 = scalar_lea.vmem %s9456_s11, 8192  ;;  %p9458_p5 = scmp.lt.s32.totalorder %s13123_s14, %s9456_s11 }
  0x83   : > { %v495_v32 = vadd.f32 %v9783_v11, %v459_v22  ;;  %v496_v36 = vadd.f32 %v9783_v11, %v460_v26  ;;  %8409 = vmatprep.subr.bf16.mxu1 %v9065_v33  ;;  %v427_v45 = vunpack.c.l.bf16 %v395_v27  ;;  %v428_v49 = vunpack.c.h.bf16 %v395_v27  ;;  %v409_v26 = vld [vmem:[%s9759_s3 + $0x58] sm:$0xff]   ;;  %vm1559_vm1 = vmpackc.low %vm9554_vm0, %vm9554_vm0  ;;  %p9453_p2 = pnand %p9452_p6, %p9722_p12  ;;  %p9459_p8 = scmp.lt.s32.totalorder %s9457_s18, %s9451_s15 }
  0x84   : > { %v523_v34 = vmax.f32 %v491_v24, 0.0  ;;  %v524_v35 = vmax.f32 %v492_v25, 0.0  ;;  %v525_v37 = vmax.f32 %v493_v30, 0.0  ;;  %v526_v43 = vmax.f32 %v494_v31, 0.0  ;;  %8410 = vmatpush3.bf16.msra.mxu1 %v9065_v33  ;;  %v411_v31 = vld [vmem:[%s9759_s3 + $0x60] sm:$0xff]   ;;  %vm9953_vm10 = vmor %vm1622_vm7, %vm1623_vm8 }
  0x85   : > { %8366 = vmatpush3.bf16.msra.mxu0 %v9058_v2  ;;  %v527_v44 = vmax.f32 %v495_v32, 0.0  ;;  %v528_v48 = vmax.f32 %v496_v36, 0.0  ;;  %v429_v50 = vunpack.c.l.bf16 %v397_v28  ;;  %8411 = vmatprep.subr.bf16.mxu1 %v9066_v41  ;;  %v463_v52 = vmul.f32 %v9777_v4, %v427_v45  ;;  %v9068_v32 = vld [vmem:[#allocation9 + $0x38] sm:$0xff]   ;;  %v413_v45 = vld [vmem:[%s9759_s3 + $0x68] sm:$0xff]   ;;  %p9454_p7 = pneg %p9453_p2  ;;  %p9460_p9 = por %p9459_p8, %p9458_p5 }
  0x86   : > { %8367 = vmatprep.subr.bf16.mxu0 %v9059_v3  ;;  %v555_v42 = vpack.c.bf16 %v524_v35, %v523_v34  ;;  %v430_v53 = vunpack.c.h.bf16 %v397_v28  ;;  %v431_v54 = vunpack.c.l.bf16 %v399_v40  ;;  %v9805_v55 = vadd.f32 %v9783_v11, %v461_v38 }
  0x87   : > { %v464_v56 = vmul.f32 %v9777_v4, %v428_v49  ;;  %v465_v57 = vmul.f32 %v9777_v4, %v429_v50  ;;  %v432_v58 = vunpack.c.h.bf16 %v399_v40  ;;  %v9811_v60 = vadd.f32 %v9783_v11, %v462_v39  ;;  %p9461_p11 = pnand %p9460_p9, %p9454_p7 }
  0x88   : > { %8377 = vmatprep.mubr.bf16.mxu0 %v555_v42  ;;  %v466_v61 = vmul.f32 %v9777_v4, %v430_v53  ;;  %v433_v62 = vunpack.c.l.bf16 %v401_v46  ;;  %8412 = vmatpush3.bf16.msra.mxu1 %v9066_v41  ;;  %v9815_v63 = vadd.f32 %v9783_v11, %v463_v52  ;;  %v467_v1 = vmul.f32 %v9777_v4, %v431_v54  ;;  %v415_v54 = vld [vmem:[%s9759_s3 + $0x70] sm:$0xff]  }
  0x89   : > { %8368 = vmatpush3.bf16.msra.mxu0 %v9059_v3  ;;  %v9818_v0 = vadd.f32 %v9783_v11, %v464_v56  ;;  %v434_v2 = vunpack.c.h.bf16 %v401_v46  ;;  %8413 = vmatprep.subr.bf16.mxu1 %v9067_v51  ;;  %v9063_v3 = vld [vmem:[#allocation8] sm:$0xff]   ;;  %v9822_v5 = vadd.f32 %v9783_v11, %v465_v57  ;;  %v468_v6 = vmul.f32 %v9777_v4, %v432_v58 }
  0x8a   : > { %8369 = vmatprep.subr.bf16.mxu0 %v9060_v19  ;;  %v556_v7 = vpack.c.bf16 %v526_v43, %v525_v37  ;;  %v529_v8 = vmax.f32 %v9805_v55, 0.0  ;;  %v9827_v9 = vadd.f32 %v9783_v11, %v466_v61  ;;  %v469_v10 = vmul.f32 %v9777_v4, %v433_v62 }
  0x8b   : > { %v557_v13 = vpack.c.bf16 %v528_v48, %v527_v44  ;;  %v530_v14 = vmax.f32 %v9811_v60, 0.0  ;;  %v470_v15 = vmul.f32 %v9777_v4, %v434_v2  ;;  %v435_v16 = vunpack.c.l.bf16 %v403_v59 }
  0x8c   : > { %8414 = vmatpush3.bf16.msra.mxu1 %v9067_v51  ;;  %v531_v18 = vmax.f32 %v9815_v63, 0.0  ;;  %v9837_v20 = vadd.f32 %v9783_v11, %v467_v1  ;;  %v436_v21 = vunpack.c.h.bf16 %v403_v59  ;;  %v533_v22 = vmax.f32 %v9822_v5, 0.0  ;;  %v417_v63 = vld [vmem:[%s9759_s3 + $0x78] sm:$0xff]  }
  0x8d   : > { %8370 = vmatpush3.bf16.msra.mxu0 %v9060_v19  ;;  %v532_v19 = vmax.f32 %v9818_v0, 0.0  ;;  %v9841_v23 = vadd.f32 %v9783_v11, %v468_v6  ;;  %v471_v24 = vmul.f32 %v9777_v4, %v435_v16  ;;  %v437_v25 = vunpack.c.l.bf16 %v405_v12 }
  0x8e   : > { %8371 = vmatprep.subr.bf16.mxu0 %v9061_v29  ;;  %v534_v27 = vmax.f32 %v9827_v9, 0.0  ;;  %v9847_v28 = vadd.f32 %v9783_v11, %v469_v10  ;;  %v438_v30 = vunpack.c.h.bf16 %v405_v12  ;;  %v9852_v33 = vadd.f32 %v9783_v11, %v470_v15 }
  0x8f   : > { %v473_v34 = vmul.f32 %v9777_v4, %v437_v25  ;;  %v439_v35 = vunpack.c.l.bf16 %v407_v17  ;;  %v440_v36 = vunpack.c.h.bf16 %v407_v17  ;;  %v9856_v37 = vadd.f32 %v9783_v11, %v471_v24 }
  0x90   : > { %v474_v39 = vmul.f32 %v9777_v4, %v438_v30  ;;  %v441_v40 = vunpack.c.l.bf16 %v409_v26  ;;  %v535_v41 = vmax.f32 %v9837_v20, 0.0  ;;  %v536_v46 = vmax.f32 %v9841_v23, 0.0 }
  0x91   : > { %8372 = vmatpush3.bf16.msra.mxu0 %v9061_v29  ;;  %v472_v29 = vmul.f32 %v9777_v4, %v436_v21  ;;  %v9864_v42 = vadd.f32 %v9783_v11, %v473_v34  ;;  %v475_v43 = vmul.f32 %v9777_v4, %v439_v35  ;;  %v476_v44 = vmul.f32 %v9777_v4, %v440_v36 }
  0x92   : > { %8373 = vmatprep.subr.bf16.mxu0 %v9062_v47  ;;  %v9872_v48 = vadd.f32 %v9783_v11, %v474_v39  ;;  %v442_v49 = vunpack.c.h.bf16 %v409_v26  ;;  %v538_v50 = vmax.f32 %v9852_v33, 0.0  ;;  %v477_v52 = vmul.f32 %v9777_v4, %v441_v40 }
  0x93   : > { %v9859_v38 = vadd.f32 %v9783_v11, %v472_v29  ;;  %v9876_v51 = vadd.f32 %v9783_v11, %v475_v43  ;;  %v443_v53 = vunpack.c.l.bf16 %v411_v31  ;;  %v558_v55 = vpack.c.bf16 %v530_v14, %v529_v8 }
  0x94   : > { %v539_v56 = vmax.f32 %v9856_v37, 0.0  ;;  %v478_v58 = vmul.f32 %v9777_v4, %v442_v49  ;;  %v541_v59 = vmax.f32 %v9864_v42, 0.0  ;;  %v512_v60 = vadd.f32 %v9783_v11, %v476_v44 }
  0x95   : > { %8374 = vmatpush3.bf16.msra.mxu0 %v9062_v47  ;;  %v537_v47 = vmax.f32 %v9847_v28, 0.0  ;;  %v540_v57 = vmax.f32 %v9859_v38, 0.0  ;;  %v444_v61 = vunpack.c.h.bf16 %v411_v31  ;;  %v479_v62 = vmul.f32 %v9777_v4, %v443_v53  ;;  %v9071_v28 = vld [vmem:[#allocation9 + $0x58] sm:$0xff]  }
  0x96   : > { %8375 = vmatprep.subr.bf16.mxu0 %v9063_v3  ;;  %v559_v0 = vpack.c.bf16 %v532_v19, %v531_v18  ;;  %v542_v1 = vmax.f32 %v9872_v48, 0.0  ;;  %v543_v2 = vmax.f32 %v9876_v51, 0.0  ;;  %v513_v6 = vadd.f32 %v9783_v11, %v477_v52 }
  0x97   : > { %v480_v8 = vmul.f32 %v9777_v4, %v444_v61  ;;  %v446_v10 = vunpack.c.h.bf16 %v413_v45  ;;  %v515_v12 = vadd.f32 %v9783_v11, %v479_v62  ;;  %v447_v14 = vunpack.c.l.bf16 %v415_v54 }
  0x98   : > { %v448_v15 = vunpack.c.h.bf16 %v415_v54  ;;  %v544_v16 = vmax.f32 %v512_v60, 0.0  ;;  %v449_v19 = vunpack.c.l.bf16 %v417_v63  ;;  %v545_v24 = vmax.f32 %v513_v6, 0.0  ;;  %v9074_v54 = vld [vmem:[#allocation9 + $0x20] sm:$0xff]   ;;  %v9930_v6 = vld [vmem:[#allocation9 + $0xb8] sm:$0xff]  }
  0x99   : > { %8376 = vmatpush3.bf16.msra.mxu0 %v9063_v3  ;;  %v445_v3 = vunpack.c.l.bf16 %v413_v45  ;;  %v516_v17 = vadd.f32 %v9783_v11, %v480_v8  ;;  %v482_v18 = vmul.f32 %v9777_v4, %v446_v10  ;;  %v483_v21 = vmul.f32 %v9777_v4, %v447_v14  ;;  %v9086_v8 = vld [vmem:[#allocation9] sm:$0xff]  }
  0x9a   : > { %8457 = vmatprep.subr.bf16.mxu0 %v9068_v32  ;;  %v484_v23 = vmul.f32 %v9777_v4, %v448_v15  ;;  %v450_v26 = vunpack.c.h.bf16 %v417_v63  ;;  %v485_v29 = vmul.f32 %v9777_v4, %v449_v19  ;;  %v547_v31 = vmax.f32 %v515_v12, 0.0 }
  0x9b   : > { %v548_v34 = vmax.f32 %v516_v17, 0.0  ;;  %v518_v35 = vadd.f32 %v9783_v11, %v482_v18  ;;  %v560_v44 = vpack.c.bf16 %v534_v27, %v533_v22  ;;  %v561_v48 = vpack.c.bf16 %v536_v46, %v535_v41  ;;  %v9069_v27 = vld [vmem:[#allocation9 + $0x60] sm:$0xff]   ;;  %v9070_v41 = vld [vmem:[#allocation9 + $0x30] sm:$0xff]   ;;  %v9072_v46 = vld [vmem:[#allocation9 + $0x28] sm:$0xff]  }
  0x9c   : > { %8378 = vmatmul.mubr.bf16.vlgmr.msra.gmra.mxu0 %v556_v7  ;;  %v514_v7 = vadd.f32 %v9783_v11, %v478_v58  ;;  %v520_v33 = vadd.f32 %v9783_v11, %v484_v23  ;;  %v486_v36 = vmul.f32 %v9777_v4, %v450_v26  ;;  %v521_v37 = vadd.f32 %v9783_v11, %v485_v29  ;;  %v9078_v58 = vld [vmem:[#allocation9 + $0x10] sm:$0xff]  }
  0x9d   : > { %8381 = vmatprep.mubr.bf16.mxu0 %v557_v13  ;;  %8458 = vmatpush3.bf16.msra.mxu0 %v9068_v32  ;;  %v481_v13 = vmul.f32 %v9777_v4, %v445_v3  ;;  %v519_v32 = vadd.f32 %v9783_v11, %v483_v21  ;;  %v550_v49 = vmax.f32 %v518_v35, 0.0  ;;  %v562_v52 = vpack.c.bf16 %v538_v50, %v537_v47  ;;  %v9073_v50 = vld [vmem:[#allocation9 + $0x50] sm:$0xff]  }
  0x9e   : > { %v546_v30 = vmax.f32 %v514_v7, 0.0  ;;  %v552_v39 = vmax.f32 %v520_v33, 0.0  ;;  %v522_v42 = vadd.f32 %v9783_v11, %v486_v36  ;;  %v553_v43 = vmax.f32 %v521_v37, 0.0  ;;  %8415 = vmatprep.subr.bf16.mxu1 %v9069_v27  ;;  %8459 = vmatprep.subr.bf16.mxu0 %v9070_v41 }
  0x9f   : > { %v517_v25 = vadd.f32 %v9783_v11, %v481_v13  ;;  %v551_v38 = vmax.f32 %v519_v32, 0.0  ;;  %v563_v53 = vpack.c.bf16 %v540_v57, %v539_v56  ;;  %v564_v11 = vpack.c.bf16 %v542_v1, %v541_v59  ;;  %8416 = vmatpush3.bf16.msra.mxu1 %v9069_v27  ;;  %v9076_v56 = vld [vmem:[#allocation9 + $0x18] sm:$0xff]   ;;  %v9077_v57 = vld [vmem:[#allocation9 + $0x40] sm:$0xff]  }
  0xa0   : > { %v554_v51 = vmax.f32 %v522_v42, 0.0  ;;  %v565_v5 = vpack.c.bf16 %v544_v16, %v543_v2  ;;  %v566_v9 = vpack.c.bf16 %v546_v30, %v545_v24  ;;  %v567_v22 = vpack.c.bf16 %v548_v34, %v547_v31  ;;  %8417 = vmatprep.subr.bf16.mxu1 %v9071_v28  ;;  %v9084_v2 = vld [vmem:[#allocation9 + $0x8] sm:$0xff]  }
  0xa1   : > { %v549_v40 = vmax.f32 %v517_v25, 0.0  ;;  %v569_v45 = vpack.c.bf16 %v552_v39, %v551_v38  ;;  %8460 = vmatpush3.bf16.msra.mxu0 %v9070_v41  ;;  %v13186_v47 = vmov 0   ;;  %v980_v59 = vlaneseq }
  0xa2   : > { %v570_v4 = vpack.c.bf16 %v554_v51, %v553_v43  ;;  %369 = vst [vmem:[#allocation2] sm:$0xf] %v13186_v47  ;;  %976 = vst [vmem:[#allocation2 + $0x4] sm:$0xf] %v13186_v47  ;;  %8461 = vmatprep.subr.bf16.mxu0 %v9072_v46  ;;  %v1591_v1 = vsel %vm1559_vm1, 65537, %v13186_v47  ;;  %v13456_v51 = vmov 0 }
  0xa3   : > { %v568_v20 = vpack.c.bf16 %v550_v49, %v549_v40  ;;  %977 = vst [vmem:[#allocation2 + $0x8] sm:$0xf] %v13186_v47  ;;  %370 = vst [vmem:[#allocation2 + $0x94] sm:$0xf] %v13186_v47  ;;  %8418 = vmatpush3.bf16.msra.mxu1 %v9071_v28  ;;  %v9926_v63 = vshrl.u32 %v980_v59, 7  ;;  %v1639_v3 = vshrl.u32 %v1591_v1, 16 }
  0xa4   : > { %8382 = vmatmul.mubr.bf16.gmra.mxu0 %v558_v55  ;;  %978 = vst [vmem:[#allocation2 + $0x8c] sm:$0xf] %v13186_v47  ;;  %979 = vst [vmem:[#allocation2 + $0x90] sm:$0xf] %v13186_v47  ;;  %8419 = vmatprep.subr.bf16.mxu1 %v9073_v50  ;;  %v9075_v55 = vld [vmem:[#allocation9 + $0x48] sm:$0xff]   ;;  %v1635_v10 = vshll.u32 %v1591_v1, 16 }
  0xa5   : > { %8385 = vmatprep.mubr.bf16.mxu0 %v559_v0  ;;  %8462 = vmatpush3.bf16.msra.mxu0 %v9072_v46  ;;  %v1017_v0 = vand.u32 15, %v9926_v63  ;;  %v9932_v7 = vrot.slane %v1639_v3, 7  ;;  %v983_v12 = vadd.s32 16, %v9926_v63  ;;  %v985_v18 = vadd.s32 32, %v9926_v63 }
  0xa6   : > { %8463 = vmatprep.subr.bf16.mxu0 %v9074_v54  ;;  %v987_v24 = vadd.s32 48, %v9926_v63  ;;  %v989_v33 = vadd.s32 64, %v9926_v63  ;;  %v9958_v34 = vrot.slane %v1635_v10, 5  ;;  %v1641_v35 = vrot.slane %v1639_v3, 4 }
  0xa7   : > { %8420 = vmatpush3.bf16.msra.mxu1 %v9073_v50  ;;  %vm1397_vm2 = vcmp.gt.s32.totalorder %v1017_v0, 0  ;;  %v9938_v14 = vor.u32 %v9932_v7, %v1635_v10  ;;  %v1031_v17 = vand.u32 15, %v983_v12  ;;  %v1045_v23 = vand.u32 15, %v985_v18 }
  0xa8   : > { %8421 = vmatprep.subr.bf16.mxu1 %v9075_v55  ;;  %vm1558_vm3 = vmpackc.low %vm1397_vm2, %vm1397_vm2  ;;  %v1059_v29 = vand.u32 15, %v987_v24  ;;  %v991_v42 = vadd.s32 80, %v9926_v63  ;;  %v1073_v43 = vand.u32 15, %v989_v33  ;;  %v995_v3 = vadd.s32 112, %v9926_v63 }
  0xa9   : > { %8464 = vmatpush3.bf16.msra.mxu0 %v9074_v54  ;;  %v9920_v60 = vld [vmem:[#allocation2 + $0x4] sm:$0xf]  ;;  %v1590_v13 = vsel %vm1558_vm3, 65537, %v13186_v47  ;;  %13449 = vst [vmem:[#allocation20_spill] sm:$0xff] %v9938_v14  ;;  %vm1399_vm4 = vcmp.gt.s32.totalorder %v1031_v17, 0  ;;  %vm9945_vm6 = vcmp.gt.s32.totalorder %v1045_v23, 0 }
  0xaa   : > { %8465 = vmatprep.subr.bf16.mxu0 %v9076_v56  ;;  %v9922_v61 = vld [vmem:[#allocation2 + $0x8] sm:$0xf]  ;;  %v1626_v15 = vshll.u32 %v1590_v13, 16  ;;  %v1629_v16 = vshrl.u32 %v1590_v13, 16  ;;  %vm1560_vm5 = vmpackc.low %vm1399_vm4, %vm1399_vm4  ;;  %vm9960_vm11 = vcmp.gt.s32.totalorder %v1059_v29, 0  ;;  %vm9980_vm15 = vcmp.gt.s32.totalorder %v1073_v43, 0 }
  0xab   : > { %8422 = vmatpush3.bf16.msra.mxu1 %v9075_v55  ;;  %v7688_v62 = vcombine.low %v9920_v60, %v9922_v61  ;;  %v1592_v30 = vsel %vm1560_vm5, 65537, %v13186_v47  ;;  %vm1562_vm9 = vmpackc.low %vm9945_vm6, %vm9945_vm6  ;;  %v13466_v13 = vmov 0  ;;  %v3814_v17 = vld [vmem:[#allocation2 + $0x8] sm:$0x8]  ;;  %v1115_v29 = vand.u32 15, %v995_v3 }
  0xac   : > { %8386 = vmatmul.mubr.bf16.gmra.mxu0 %v560_v44  ;;  %8423 = vmatprep.subr.bf16.mxu1 %v9077_v57  ;;  %v9941_v19 = vrot.slane %v1626_v15, 5  ;;  %v1631_v21 = vrot.slane %v1629_v16, 4  ;;  %v1645_v36 = vshll.u32 %v1592_v30, 16  ;;  %v1649_v38 = vshrl.u32 %v1592_v30, 16  ;;  %vm1564_vm12 = vmpackc.low %vm9960_vm11, %vm9960_vm11 }
  0xad   : > { %8389 = vmatprep.mubr.bf16.mxu0 %v561_v48  ;;  %8466 = vmatpush3.bf16.msra.mxu0 %v9076_v56  ;;  %v1594_v40 = vsel %vm1562_vm9, 65537, %v13186_v47  ;;  %v1642_v44 = vor.u32 %v1641_v35, %v9958_v34  ;;  %v1461_v48 = vld [vmem:[#allocation2] sm:$0x8]  ;;  %vm1566_vm0 = vmpackc.low %vm9980_vm15, %vm9980_vm15  ;;  %vm10062_vm9 = vcmp.gt.s32.totalorder %v1115_v29, 0  ;;  %vm2969_vm15 = vsmask.f32 256 }
  0xae   : > { %8467 = vmatprep.subr.bf16.mxu0 %v9078_v58  ;;  %8425 = vmatprep.mubr.bf16.mxu1 %v7688_v62  ;;  %v1632_v25 = vor.u32 %v1631_v21, %v9941_v19  ;;  %v1651_v49 = vrot.slane %v1649_v38, 4  ;;  %vm1944_vm13 = vcmp.ne.s16.totalorder %v9941_v19, 0  ;;  %v984_v62 = vadd.s32 24, %v9926_v63 }
  0xaf   : > { %8424 = vmatpush3.bf16.msra.mxu1 %v9077_v57  ;;  %v1977_v27 = vsel %vm1944_vm13, %v1461_v48, 0  ;;  %v1598_v1 = vsel %vm1566_vm0, 65537, %v13186_v47  ;;  %v10041_v33 = vsel %vm1944_vm13, %v3814_v17, 0  ;;  %vm2970_vm0 = vsmask.f32 4368 }
  0xb0   : > { %8505 = vmatprep.subr.bf16.mxu1 %v9930_v6  ;;  %v1633_v31 = vrot.slane %v1632_v25, 4  ;;  %v1705_v21 = vshll.u32 %v1598_v1, 16  ;;  %v1709_v23 = vshrl.u32 %v1598_v1, 16  ;;  %v1038_v25 = vand.u32 15, %v984_v62  ;;  %13471 = vst [vmem:[#allocation24_spill] sm:$0xff] %v10041_v33 }
  0xb1   : > { %8468 = vmatpush3.bf16.msra.mxu0 %v9078_v58  ;;  %v1005_v18 = vadd.s32 192, %v9926_v63 }
  0xb2   : > { %8469 = vmatprep.subr.bf16.mxu0 %v9084_v2  ;;  %v1638_v39 = vsel %vm9953_vm10, %v1633_v31, %v9958_v34  ;;  %vm10054_vm8 = vcmp.lt.s32.totalorder %v1038_v25, 15  ;;  %v10114_v25 = vrot.slane %v9932_v7, 4 }
  0xb3   : > { %vm9974_vm14 = vcmp.ne.s16.totalorder %v1638_v39, 0  ;;  %vm2908_vm11 = vmpackc.low %vm10054_vm8, %vm10054_vm8 }
  0xb4   : > { %8390 = vmatmul.mubr.bf16.gmra.mxu0 %v562_v52  ;;  %v13457_v51 = vsel %vm9974_vm14, 4294967295, %v13456_v51  ;;  %v1669_v52 = vshrl.u32 %v1594_v40, 16  ;;  %v1978_v41 = vsel %vm9974_vm14, %v9920_v60, 0  ;;  %v2940_v62 = vsel %vm2908_vm11, 65537, %v13186_v47 }
  0xb5   : > { %8393 = vmatprep.mubr.bf16.mxu0 %v563_v53  ;;  %8470 = vmatpush3.bf16.msra.mxu0 %v9084_v2  ;;  %13458 = vst [vmem:[#allocation21_spill] sm:$0xff] %v13457_v51  ;;  %v1596_v53 = vsel %vm1564_vm12, 65537, %v13186_v47  ;;  %v7712_v58 = vcombine.low %v1977_v27, %v1978_v41  ;;  %v1001_v27 = vadd.s32 160, %v9926_v63  ;;  %vm1572_vm12 = vmpackc.low %vm10062_vm9, %vm10062_vm9 }
  0xb6   : > { %8471 = vmatprep.subr.bf16.mxu0 %v9086_v8  ;;  %v1685_v46 = vshll.u32 %v1596_v53, 16  ;;  %v1689_v50 = vshrl.u32 %v1596_v53, 16  ;;  %v1671_v55 = vrot.slane %v1669_v52, 4  ;;  %v1604_v3 = vsel %vm1572_vm12, 65537, %v13186_v47 }
  0xb7   : > { %v2432_v15 = vshrl.u32 %v7712_v58, 16  ;;  %v2435_v16 = vshll.u32 %v7712_v58, 16  ;;  %v1769_v29 = vshrl.u32 %v1604_v3, 16 }
  0xb8   : > { %v10005_v0 = vrot.slane %v1685_v46, 5  ;;  %v1691_v2 = vrot.slane %v1689_v50, 4 }
  0xb9   : > { %8472 = vmatpush3.bf16.msra.mxu0 %v9086_v8  ;;  %v10050_v37 = vrot.slane %v2435_v16, 4 }
  0xba   : > { %v1692_v26 = vor.u32 %v1691_v2, %v10005_v0 }
  0xbc   : > { %8394 = vmatmul.mubr.bf16.gmra.mxu0 %v564_v11  ;;  %v1087_v11 = vand.u32 15, %v991_v42  ;;  %v1711_v42 = vrot.slane %v1709_v23, 4 }
  0xbd   : > { %8397 = vmatprep.mubr.bf16.mxu0 %v565_v5  ;;  %v982_v5 = vadd.s32 8, %v9926_v63 }
  0xbe   : > { %vm9997_vm1 = vcmp.gt.s32.totalorder %v1087_v11, 0 }
  0xbf   : > { %v1024_v57 = vand.u32 15, %v982_v5  ;;  %vm1568_vm2 = vmpackc.low %vm9997_vm1, %vm9997_vm1  ;;  %v999_v5 = vadd.s32 144, %v9926_v63 }
  0xc0   : > { %v1600_v24 = vsel %vm1568_vm2, 65537, %v13186_v47 }
  0xc1   : > { %vm10015_vm3 = vcmp.lt.s32.totalorder %v1024_v57, 15  ;;  %v1725_v38 = vshll.u32 %v1600_v24, 16  ;;  %v1729_v39 = vshrl.u32 %v1600_v24, 16  ;;  %v1007_v24 = vadd.s32 208, %v9926_v63 }
  0xc2   : > { %vm2906_vm6 = vmpackc.low %vm10015_vm3, %vm10015_vm3 }
  0xc4   : > { %8398 = vmatmul.mubr.bf16.gmra.mxu0 %v566_v9  ;;  %v10080_v9 = vrot.slane %v1725_v38, 5 }
  0xc5   : > { %8401 = vmatprep.mubr.bf16.mxu0 %v567_v22  ;;  %v993_v22 = vadd.s32 96, %v9926_v63 }
  0xc7   : > { %v1101_v59 = vand.u32 15, %v993_v22  ;;  %v1731_v22 = vrot.slane %v1729_v39, 4  ;;  %v2999_v39 = vshrl.u32 %v2940_v62, 16 }
  0xc9   : > { %vm10023_vm5 = vcmp.gt.s32.totalorder %v1101_v59, 0  ;;  %v1143_v59 = vand.u32 15, %v999_v5  ;;  %v1732_v2 = vor.u32 %v1731_v22, %v10080_v9  ;;  %v1185_v5 = vand.u32 15, %v1005_v18 }
  0xca   : > { %vm1570_vm7 = vmpackc.low %vm10023_vm5, %vm10023_vm5  ;;  %v1009_v22 = vadd.s32 224, %v9926_v63 }
  0xcb   : > { %v1602_v48 = vsel %vm1570_vm7, 65537, %v13186_v47  ;;  %vm10116_vm2 = vcmp.gt.s32.totalorder %v1143_v59, 0  ;;  %vm10128_vm5 = vmor %vm2969_vm15, %vm2970_vm0  ;;  %v3002_v59 = vshll.u32 %v2940_v62, 16  ;;  %vm10187_vm12 = vcmp.gt.s32.totalorder %v1185_v5, 0 }
  0xcc   : > { %8402 = vmatmul.mubr.bf16.gmra.mxu0 %v568_v20  ;;  %v9985_v20 = vrot.slane %v1642_v44, 4  ;;  %v2938_v44 = vsel %vm2906_vm6, 65537, %v13186_v47  ;;  %v1745_v46 = vshll.u32 %v1602_v48, 16  ;;  %v1749_v50 = vshrl.u32 %v1602_v48, 16  ;;  %vm1576_vm8 = vmpackc.low %vm10116_vm2, %vm10116_vm2 }
  0xcd   : > { %8405 = vmatprep.mubr.bf16.mxu0 %v569_v45  ;;  %v1647_v45 = vrot.slane %v1645_v36, 5  ;;  %v10048_v36 = vrot.slane %v2432_v15, 3  ;;  %v2981_v41 = vshrl.u32 %v2938_v44, 16  ;;  %v2984_v1 = vshll.u32 %v2938_v44, 16 }
  0xce   : > { %13461 = vst [vmem:[#allocation22_spill] sm:$0xff] %v9985_v20  ;;  %v10102_v15 = vrot.slane %v1745_v46, 5  ;;  %v1751_v16 = vrot.slane %v1749_v50, 4  ;;  %v1199_v46 = vand.u32 15, %v1007_v24  ;;  %v1011_v50 = vadd.s32 240, %v9926_v63 }
  0xcf   : > { %v1652_v28 = vor.u32 %v1651_v49, %v1647_v45  ;;  %v1648_v60 = vsel %vm9953_vm10, %v9985_v20, %v1647_v45  ;;  %v10059_v45 = vrot.slane %v1692_v26, 4  ;;  %v2983_v12 = vrot.slane %v2981_v41, 7 }
  0xd0   : > { %vm10019_vm4 = vcmp.ne.s16.totalorder %v1648_v60, 0  ;;  %v10097_v60 = vld [vmem:[#allocation9 + $0xf8] sm:$0xff]   ;;  %v1765_v26 = vshll.u32 %v1604_v3, 16  ;;  %v1752_v49 = vor.u32 %v1751_v16, %v10102_v15  ;;  %v1608_v18 = vsel %vm1576_vm8, 65537, %v13186_v47 }
  0xd1   : > { %v10012_v8 = vrot.slane %v1652_v28, 4  ;;  %v13467_v13 = vsel %vm10019_vm4, 4294967295, %v13466_v13  ;;  %8553 = vmatprep.subr.bf16.mxu0 %v10097_v60  ;;  %v2986_v7 = vor.u32 %v2984_v1, %v2983_v12  ;;  %v2988_v48 = vrot.slane %v2983_v12, 4 }
  0xd2   : > { %13468 = vst [vmem:[#allocation23_spill] sm:$0xff] %v13467_v13  ;;  %vm10198_vm15 = vcmp.gt.s32.totalorder %v1199_v46, 0  ;;  %v1227_v23 = vand.u32 15, %v1011_v50  ;;  %vm13218_vm0 = vcmp.ne.s16.totalorder %v9938_v14, 0  ;;  %v1805_v5 = vshll.u32 %v1608_v18, 16 }
  0xd3   : > { %v2987_v3 = vsel %vm10128_vm5, %v10114_v25, %v2986_v7  ;;  %v10177_v62 = vsel %vm10128_vm5, %v2988_v48, %v9938_v14 }
  0xd4   : > { %8406 = vmatmul.mubr.bf16.gmra.mxu0 %v570_v4  ;;  %v1665_v4 = vshll.u32 %v1594_v40, 16  ;;  %v10052_v40 = vrot.slane %v1705_v21, 5  ;;  %13486 = vst [vmem:[#allocation25_spill] sm:$0xff] %v10177_v62  ;;  %vm10215_vm2 = vcmp.ne.s16.totalorder %v2987_v3, 0  ;;  %v10262_v28 = vrot.slane %v1805_v5, 5 }
  0xd6   : > { %v9992_v54 = vrot.slane %v1665_v4, 5  ;;  %v997_v4 = vadd.s32 128, %v9926_v63  ;;  %v1712_v57 = vor.u32 %v1711_v42, %v10052_v40  ;;  %v10120_v42 = vrot.slane %v1732_v2, 4 }
  0xd8   : > { %v1672_v10 = vor.u32 %v1671_v55, %v9992_v54  ;;  %v1003_v55 = vadd.s32 176, %v9926_v63  ;;  %v1129_v58 = vand.u32 15, %v997_v4  ;;  %v10106_v21 = vrot.slane %v1712_v57, 4 }
  0xd9   : > { %v1771_v57 = vrot.slane %v1769_v29, 4  ;;  %v13492_v4 = vmov 0 }
  0xda   : > { %v10043_v35 = vrot.slane %v1672_v10, 4  ;;  %v1157_v10 = vand.u32 15, %v1001_v27  ;;  %v1171_v17 = vand.u32 15, %v1003_v55  ;;  %vm10108_vm1 = vcmp.gt.s32.totalorder %v1129_v58, 0 }
  0xdb   : > { %vm1574_vm6 = vmpackc.low %vm10108_vm1, %vm10108_vm1  ;;  %v10153_v55 = vrot.slane %v1765_v26, 5  ;;  %v10158_v58 = vrot.slane %v2999_v39, 7  ;;  %v13493_v4 = vsel %vm10215_vm2, 4294967295, %v13492_v4 }
  0xdc   : > { %vm10122_vm3 = vcmp.gt.s32.totalorder %v1157_v10, 0  ;;  %vm10136_vm7 = vcmp.gt.s32.totalorder %v1171_v17, 0  ;;  %v10179_v10 = vrot.slane %v1752_v49, 4  ;;  %v1606_v12 = vsel %vm1574_vm6, 65537, %v13186_v47  ;;  %vm1582_vm1 = vmpackc.low %vm10187_vm12, %vm10187_vm12  ;;  %v2808_v49 = vld [vmem:[#allocation2 + $0x4] sm:$0xf] }
  0xdd   : > { %vm1578_vm9 = vmpackc.low %vm10122_vm3, %vm10122_vm3  ;;  %v1213_v17 = vand.u32 15, %v1009_v22  ;;  %v1772_v29 = vor.u32 %v1771_v57, %v10153_v55  ;;  %v10205_v43 = vor.u32 %v3002_v59, %v10158_v58  ;;  %v1785_v7 = vshll.u32 %v1606_v12, 16  ;;  %13494 = vst [vmem:[#allocation27_spill] sm:$0xff] %v13493_v4  ;;  %v10226_v57 = vld [vmem:[#allocation2 + $0x8] sm:$0xf] }
  0xde   : > { %vm1580_vm11 = vmpackc.low %vm10136_vm7, %vm10136_vm7  ;;  %v1610_v24 = vsel %vm1578_vm9, 65537, %v13186_v47  ;;  %v1789_v48 = vshrl.u32 %v1606_v12, 16  ;;  %v1809_v22 = vshrl.u32 %v1608_v18, 16  ;;  %vm10228_vm7 = vcmp.gt.s32.totalorder %v1227_v23, 0 }
  0xdf   : > { %v1612_v39 = vsel %vm1580_vm11, 65537, %v13186_v47  ;;  %13491 = vst [vmem:[#allocation26_spill] sm:$0xff] %v10205_v43  ;;  %v1825_v46 = vshll.u32 %v1610_v24, 16  ;;  %vm1584_vm3 = vmpackc.low %vm10198_vm15, %vm10198_vm15  ;;  %vm10222_vm6 = vcmp.gt.s32.totalorder %v1213_v17, 0  ;;  %v1829_v59 = vshrl.u32 %v1610_v24, 16 }
  0xe0   : > { %v1845_v12 = vshll.u32 %v1612_v39, 16  ;;  %v1849_v38 = vshrl.u32 %v1612_v39, 16  ;;  %v10236_v26 = vrot.slane %v1772_v29, 4  ;;  %v10244_v24 = vsel %vm13218_vm0, %v2808_v49, 0  ;;  %vm1586_vm8 = vmpackc.low %vm10222_vm6, %vm10222_vm6 }
  0xe1   : > { %v1614_v23 = vsel %vm1582_vm1, 65537, %v13186_v47  ;;  %v1616_v39 = vsel %vm1584_vm3, 65537, %v13186_v47  ;;  %v986_v49 = vadd.s32 40, %v9926_v63  ;;  %v10260_v17 = vrot.slane %v1785_v7, 5  ;;  %vm1588_vm9 = vmpackc.low %vm10228_vm7, %vm10228_vm7 }
  0xe2   : > { %v1791_v18 = vrot.slane %v1789_v48, 4  ;;  %v1811_v16 = vrot.slane %v1809_v22, 4  ;;  %v10267_v2 = vrot.slane %v1825_v46, 5  ;;  %v1831_v50 = vrot.slane %v1829_v59, 4 }
  0xe3   : > { %v10269_v1 = vrot.slane %v1845_v12, 5  ;;  %v1851_v41 = vrot.slane %v1849_v38, 4  ;;  %v1865_v27 = vshll.u32 %v1614_v23, 16  ;;  %v1869_v56 = vshrl.u32 %v1614_v23, 16 }
  0xe4   : > { %v1885_v11 = vshll.u32 %v1616_v39, 16  ;;  %v1618_v7 = vsel %vm1586_vm8, 65537, %v13186_v47  ;;  %v1889_v31 = vshrl.u32 %v1616_v39, 16  ;;  %v1620_v48 = vsel %vm1588_vm9, 65537, %v13186_v47 }
  0xe5   : > { %13499 = vst [vmem:[#allocation28_spill] sm:$0xff] %v10269_v1  ;;  %v1052_v5 = vand.u32 15, %v986_v49  ;;  %v988_v22 = vadd.s32 56, %v9926_v63  ;;  %v1792_v59 = vor.u32 %v1791_v18, %v10260_v17  ;;  %v1812_v38 = vor.u32 %v1811_v16, %v10262_v28 }
  0xe6   : > { %v990_v12 = vadd.s32 72, %v9926_v63  ;;  %v1832_v3 = vor.u32 %v1831_v50, %v10267_v2  ;;  %v1852_v23 = vor.u32 %v1851_v41, %v10269_v1  ;;  %v1905_v39 = vshll.u32 %v1618_v7, 16 }
  0xe7   : > { %v1909_v53 = vshrl.u32 %v1618_v7, 16  ;;  %v10283_v49 = vrot.slane %v1865_v27, 5  ;;  %v1871_v52 = vrot.slane %v1869_v56, 4  ;;  %v1925_v30 = vshll.u32 %v1620_v48, 16 }
  0xe8   : > { %v1929_v29 = vshrl.u32 %v1620_v48, 16  ;;  %v10285_v47 = vrot.slane %v1885_v11, 5  ;;  %v1891_v46 = vrot.slane %v1889_v31, 4  ;;  %vm10287_vm11 = vcmp.lt.s32.totalorder %v1052_v5, 15 }
  0xe9   : > { %13500 = vst [vmem:[#allocation29_spill] sm:$0xff] %v10283_v49  ;;  %v1066_v16 = vand.u32 15, %v988_v22  ;;  %v10295_v50 = vrot.slane %v1792_v59, 4  ;;  %v1080_v27 = vand.u32 15, %v990_v12  ;;  %v992_v56 = vadd.s32 88, %v9926_v63  ;;  %vm2910_vm12 = vmpackc.low %vm10287_vm11, %vm10287_vm11 }
  0xea   : > { %13501 = vst [vmem:[#allocation30_spill] sm:$0xff] %v10285_v47  ;;  %v10302_v11 = vrot.slane %v1905_v39, 5  ;;  %v1911_v7 = vrot.slane %v1909_v53, 4  ;;  %v994_v48 = vadd.s32 104, %v9926_v63  ;;  %v10305_v5 = vrot.slane %v1812_v38, 4 }
  0xeb   : > { %v1872_v22 = vor.u32 %v1871_v52, %v10283_v49  ;;  %v10308_v41 = vrot.slane %v1925_v30, 5  ;;  %v1931_v59 = vrot.slane %v1929_v29, 4  ;;  %v10313_v12 = vrot.slane %v1832_v3, 4 }
  0xec   : > { %13504 = vst [vmem:[#allocation31_spill] sm:$0xff] %v10302_v11  ;;  %v10315_v43 = vrot.slane %v1852_v23, 4  ;;  %v1892_v39 = vor.u32 %v1891_v46, %v10285_v47  ;;  %vm10318_vm15 = vcmp.lt.s32.totalorder %v1066_v16, 15  ;;  %vm10330_vm1 = vcmp.lt.s32.totalorder %v1080_v27, 15 }
  0xed   : > { %13505 = vst [vmem:[#allocation32_spill] sm:$0xff] %v10308_v41  ;;  %13506 = vst [vmem:[#allocation33_spill] sm:$0xff] %v10313_v12  ;;  %v1094_v38 = vand.u32 15, %v992_v56  ;;  %v1912_v46 = vor.u32 %v1911_v7, %v10302_v11  ;;  %v13512_v3 = vmov 0   ;;  %v1108_v18 = vand.u32 15, %v994_v48 }
  0xee   : > { %13507 = vst [vmem:[#allocation34_spill] sm:$0xff] %v10315_v43  ;;  %v2942_v23 = vsel %vm2910_vm12, 65537, %v13512_v3  ;;  %v996_v16 = vadd.s32 120, %v9926_v63  ;;  %v10345_v52 = vrot.slane %v1872_v22, 4  ;;  %v1932_v56 = vor.u32 %v1931_v59, %v10308_v41  ;;  %vm2912_vm3 = vmpackc.low %vm10318_vm15, %vm10318_vm15 }
  0xef   : > { %v10363_v59 = vrot.slane %v1892_v39, 4  ;;  %vm2914_vm6 = vmpackc.low %vm10330_vm1, %vm10330_vm1  ;;  %v3017_v7 = vshrl.u32 %v2942_v23, 16  ;;  %vm10372_vm7 = vcmp.lt.s32.totalorder %v1094_v38, 15  ;;  %v998_v48 = vadd.s32 136, %v9926_v63 }
  0xf0   : > { %13513 = vst [vmem:[#allocation35_spill] sm:$0xff] %v10345_v52  ;;  %v10377_v30 = vrot.slane %v1912_v46, 4  ;;  %v2944_v39 = vsel %vm2912_vm3, 65537, %v13512_v3  ;;  %vm10380_vm8 = vcmp.lt.s32.totalorder %v1108_v18, 15  ;;  %v1122_v22 = vand.u32 15, %v996_v16  ;;  %vm2916_vm9 = vmpackc.low %vm10372_vm7, %vm10372_vm7 }
  0xf1   : > { %13514 = vst [vmem:[#allocation36_spill] sm:$0xff] %v10363_v59  ;;  %v1933_v38 = vrot.slane %v1932_v56, 4  ;;  %v3006_v31 = vrot.slane %v10158_v58, 4  ;;  %v2946_v33 = vsel %vm2914_vm6, 65537, %v13512_v3  ;;  %v13520_v16 = vsel %vm10215_vm2, %v10226_v57, 0  ;;  %vm2918_vm11 = vmpackc.low %vm10380_vm8, %vm10380_vm8 }
  0xf2   : > { %13517 = vst [vmem:[#allocation37_spill] sm:$0xff] %v10377_v30  ;;  %v7737_v56 = vcombine.low %v10244_v24, %v13520_v16  ;;  %v1136_v58 = vand.u32 15, %v998_v48  ;;  %v3019_v53 = vrot.slane %v3017_v7, 7  ;;  %v3020_v52 = vshll.u32 %v2942_v23, 16  ;;  %v10435_v24 = vld [vmem:[#allocation2 + $0x8c] sm:$0xf] }
  0xf3   : > { %v3035_v49 = vshrl.u32 %v2944_v39, 16  ;;  %v1000_v18 = vadd.s32 152, %v9926_v63  ;;  %v3053_v27 = vshrl.u32 %v2946_v33, 16  ;;  %vm10418_vm12 = vcmp.lt.s32.totalorder %v1122_v22, 15  ;;  %13524 = vst [vmem:[#allocation39_spill] sm:$0xff] %v10435_v24 }
  0xf4   : > { %v1938_v7 = vsel %vm9953_vm10, %v1933_v38, %v9958_v34  ;;  %v10428_v48 = vsel %vm10128_vm5, %v3006_v31, %v9938_v14  ;;  %v2948_v29 = vsel %vm2916_vm9, 65537, %v13512_v3  ;;  %v3428_v57 = vshll.u32 %v7737_v56, 16  ;;  %vm2920_vm1 = vmpackc.low %vm10418_vm12, %vm10418_vm12 }
  0xf5   : > { %13523 = vst [vmem:[#allocation38_spill] sm:$0xff] %v10428_v48  ;;  %v1150_v16 = vand.u32 15, %v1000_v18  ;;  %v2950_v46 = vsel %vm2918_vm11, 65537, %v13512_v3  ;;  %vm10438_vm15 = vcmp.lt.s32.totalorder %v1136_v58, 15  ;;  %v10442_v4 = vor.u32 %v3020_v52, %v3019_v53 }
  0xf6   : > { %v3037_v31 = vrot.slane %v3035_v49, 7  ;;  %v3038_v48 = vshll.u32 %v2944_v39, 16  ;;  %v1002_v18 = vadd.s32 168, %v9926_v63  ;;  %vm10448_vm3 = vcmp.ne.s16.totalorder %v1938_v7, 0  ;;  %vm2922_vm6 = vmpackc.low %vm10438_vm15, %vm10438_vm15 }
  0xf7   : > { %13527 = vst [vmem:[#allocation40_spill] sm:$0xff] %v10442_v4  ;;  %v13528_v22 = vmov 0  ;;  %v3055_v41 = vrot.slane %v3053_v27, 7  ;;  %v3056_v30 = vshll.u32 %v2946_v33, 16  ;;  %v3071_v58 = vshrl.u32 %v2948_v29, 16 }
  0xf8   : > { %v13529_v22 = vsel %vm10448_vm3, 4294967295, %v13528_v22  ;;  %v3089_v11 = vshrl.u32 %v2950_v46, 16  ;;  %vm10458_vm7 = vcmp.lt.s32.totalorder %v1150_v16, 15  ;;  %v1164_v39 = vand.u32 15, %v1002_v18 }
  0xf9   : > { %13530 = vst [vmem:[#allocation41_spill] sm:$0xff] %v13529_v22  ;;  %v3426_v23 = vshrl.u32 %v7737_v56, 16  ;;  %v3430_v7 = vrot.slane %v3428_v57, 1  ;;  %v3024_v59 = vrot.slane %v3019_v53, 4  ;;  %v2952_v33 = vsel %vm2920_vm1, 65537, %v13512_v3  ;;  %vm2924_vm9 = vmpackc.low %vm10458_vm7, %vm10458_vm7 }
  0xfa   : > { %v10463_v27 = vor.u32 %v3038_v48, %v3037_v31  ;;  %v3042_v47 = vrot.slane %v3037_v31, 4  ;;  %vm10465_vm8 = vcmp.lt.s32.totalorder %v1164_v39, 15  ;;  %v1004_v38 = vadd.s32 184, %v9926_v63 }
  0xfb   : > { %v10470_v24 = vor.u32 %v3056_v30, %v3055_v41  ;;  %v3073_v16 = vrot.slane %v3071_v58, 7  ;;  %v3074_v22 = vshll.u32 %v2948_v29, 16  ;;  %v2954_v18 = vsel %vm2922_vm6, 65537, %v13512_v3  ;;  %vm2926_vm11 = vmpackc.low %vm10465_vm8, %vm10465_vm8 }
  0xfc   : > { %13533 = vst [vmem:[#allocation42_spill] sm:$0xff] %v10463_v27  ;;  %v10480_v56 = vrot.slane %v3089_v11, 7  ;;  %v3092_v57 = vshll.u32 %v2950_v46, 16  ;;  %v3107_v48 = vshrl.u32 %v2952_v33, 16  ;;  %v10482_v31 = vor.u32 %v3430_v7, %v3426_v23 }
  0xfd   : > { %13536 = vst [vmem:[#allocation43_spill] sm:$0xff] %v10470_v24  ;;  %v10487_v30 = vsel %vm10128_vm5, %v3024_v59, %v9938_v14  ;;  %v3060_v29 = vrot.slane %v3055_v41, 4  ;;  %v1178_v58 = vand.u32 15, %v1004_v38  ;;  %v3125_v46 = vshrl.u32 %v2954_v18, 16  ;;  %v10509_v38 = vld [vmem:[#allocation6 + $0x2] ss:$0 sm:$0xff] }
  0xfe   : > { %13537 = vst [vmem:[#allocation44_spill] sm:$0xff] %v10482_v31  ;;  %13538 = vst [vmem:[#allocation45_spill] sm:$0xff] %v10487_v30  ;;  %v2956_v49 = vsel %vm2924_vm9, 65537, %v13512_v3  ;;  %v1006_v39 = vadd.s32 200, %v9926_v63  ;;  %v10501_v41 = vsel %vm10128_vm5, %v3042_v47, %v9938_v14  ;;  %v10507_v52 = vor.u32 %v3074_v22, %v3073_v16 }
  0xff   : > { %13539 = vst [vmem:[#allocation46_spill] sm:$0xff] %v10501_v41  ;;  %v3078_v7 = vrot.slane %v3073_v16, 4  ;;  %v10512_v11 = vor.u32 %v3092_v57, %v10480_v56  ;;  %v3109_v53 = vrot.slane %v3107_v48, 7  ;;  %v3110_v31 = vshll.u32 %v2952_v33, 16 }
 0x100   : > { %13540 = vst [vmem:[#allocation47_spill] sm:$0xff] %v10507_v52  ;;  %v2958_v27 = vsel %vm2926_vm11, 65537, %v13512_v3  ;;  %v10518_v47 = vsel %vm10128_vm5, %v3060_v29, %v9938_v14  ;;  %v3143_v41 = vshrl.u32 %v2956_v49, 16  ;;  %vm10520_vm12 = vcmp.lt.s32.totalorder %v1178_v58, 15 }
 0x101   : > { %13541 = vst [vmem:[#allocation48_spill] sm:$0xff] %v10512_v11  ;;  %13542 = vst [vmem:[#allocation49_spill] sm:$0xff] %v10518_v47  ;;  %v1192_v16 = vand.u32 15, %v1006_v39  ;;  %v3127_v57 = vrot.slane %v3125_v46, 7  ;;  %v3128_v24 = vshll.u32 %v2954_v18, 16  ;;  %v1008_v33 = vadd.s32 216, %v9926_v63 }
 0x102   : > { %v10534_v58 = vsel %vm10128_vm5, %v3078_v7, %v9938_v14  ;;  %v3161_v39 = vshrl.u32 %v2958_v27, 16  ;;  %v10541_v46 = vor.u32 %v3110_v31, %v3109_v53  ;;  %vm2928_vm15 = vmpackc.low %vm10520_vm12, %vm10520_vm12  ;;  %v13547_v7 = vsel %vm9953_vm10, %v10012_v8, %v9958_v34 }
 0x103   : > { %13545 = vst [vmem:[#allocation50_spill] sm:$0xff] %v10534_v58  ;;  %vm10551_vm1 = vcmp.ne.s16.totalorder %v13547_v7, 0  ;;  %v3145_v29 = vrot.slane %v3143_v41, 7  ;;  %v3146_v18 = vshll.u32 %v2956_v49, 16  ;;  %vm10555_vm6 = vcmp.lt.s32.totalorder %v1192_v16, 15 }
 0x104   : > { %13546 = vst [vmem:[#allocation51_spill] sm:$0xff] %v10541_v46  ;;  %v1206_v31 = vand.u32 15, %v1008_v33  ;;  %v3114_v58 = vrot.slane %v3109_v53, 4  ;;  %v10560_v52 = vor.u32 %v3128_v24, %v3127_v57  ;;  %v3163_v8 = vrot.slane %v3161_v39, 7  ;;  %vm2930_vm7 = vmpackc.low %vm10555_vm6, %vm10555_vm6 }
 0x105   : > { %v3164_v7 = vshll.u32 %v2958_v27, 16  ;;  %v10563_v12 = vsel %vm2928_vm15, 65537, %v13512_v3  ;;  %v1010_v24 = vadd.s32 232, %v9926_v63  ;;  %v3132_v33 = vrot.slane %v3127_v57, 4 }
 0x106   : > { %13553 = vst [vmem:[#allocation53_spill] sm:$0xff] %v10560_v52  ;;  %vm10569_vm8 = vcmp.lt.s32.totalorder %v1206_v31, 15  ;;  %v3179_v39 = vshrl.u32 %v10563_v12, 16  ;;  %v10594_v31 = vsel %vm10128_vm5, %v3114_v58, %v9938_v14  ;;  %vm13232_vm11 = vcmp.ne.s16.totalorder %v10177_v62, 0  ;;  %v10780_v62 = vld [vmem:[#allocation9 + $0xa8] sm:$0xff]  }
 0x107   : > { %13558 = vst [vmem:[#allocation56_spill] sm:$0xff] %v10594_v31  ;;  %v10596_v57 = vor.u32 %v3164_v7, %v3163_v8  ;;  %vm2932_vm9 = vmpackc.low %vm10569_vm8, %vm10569_vm8  ;;  %v3168_v7 = vrot.slane %v3163_v8, 4  ;;  %vm13239_vm8 = vsmask.f32 4352 }
 0x108   : > { %v10634_v8 = vsel %vm2932_vm9, 65537, %v13512_v3 }
 0x109   : > { %13559 = vst [vmem:[#allocation57_spill] sm:$0xff] %v10596_v57  ;;  %v9087_v57 = vld [vmem:[#allocation9 + $0xb0] sm:$0xff]  }
 0x15c   : > { %v8379_v23 = vpop.f32.mrf.mxu0 }
 0x15d   : > { %v666_v48 = vadd.f32 %v8379_v23, %v10509_v38 }
 0x15e   : > { %v657_v30 = vpop.f32.mrf.mxu0 }
 0x15f   : > { %v658_v59 = vadd.f32 %v10509_v38, %v657_v30  ;;  %v3096_v30 = vrot.slane %v10480_v56, 4  ;;  %v786_v43 = vmax.f32 %v666_v48, 0.0 }
 0x160   : > { %v8380_v4 = vpop.f32.mrf.mxu0 }
 0x161   : > { %v784_v47 = vmax.f32 %v658_v59, 0.0  ;;  %v13548_v59 = vmov 0  ;;  %v669_v49 = vadd.f32 %v8380_v4, %v10509_v38  ;;  %v10577_v27 = vsel %vm10128_vm5, %v3096_v30, %v9938_v14 }
 0x162   : > { %v660_v23 = vpop.f32.mrf.mxu0  ;;  %v13549_v59 = vsel %vm10551_vm1, 4294967295, %v13548_v59  ;;  %13556 = vst [vmem:[#allocation54_spill] sm:$0xff] %v10577_v27  ;;  %v10583_v4 = vor.u32 %v3146_v18, %v3145_v29 }
 0x163   : > { %13550 = vst [vmem:[#allocation52_spill] sm:$0xff] %v13549_v59  ;;  %v7950_v22 = vpack.c.bf16 %v784_v47, %v784_v47  ;;  %v661_v11 = vadd.f32 %v10509_v38, %v660_v23  ;;  %v10588_v23 = vsel %vm2930_vm7, 65537, %v13512_v3 }
 0x164   : > { %v8383_v1 = vpop.f32.mrf.mxu0  ;;  %13557 = vst [vmem:[#allocation55_spill] sm:$0xff] %v10583_v4  ;;  %v10680_v4 = vadd.s32 248, %v9926_v63 }
 0x165   : > { %944 = vst [vmem:[#allocation2 + $0xc] sm:$0xf] %v7950_v22  ;;  %v785_v41 = vmax.f32 %v661_v11, 0.0  ;;  %v682_v56 = vadd.f32 %v8383_v1, %v10509_v38  ;;  %v3150_v22 = vrot.slane %v3145_v29, 4  ;;  %v10609_v29 = vsel %vm10128_vm5, %v3132_v33, %v9938_v14 }
 0x166   : > { %v673_v53 = vpop.f32.mrf.mxu0  ;;  %13560 = vst [vmem:[#allocation58_spill] sm:$0xff] %v10609_v29  ;;  %v10626_v33 = vrot.slane %v3179_v39, 7  ;;  %13572 = vst [vmem:[#allocation61_spill] sm:$0xff] %v10680_v4  ;;  %v13604_v39 = vmov 0 }
 0x167   : > { %v7986_v11 = vpack.c.bf16 %v786_v43, %v785_v41  ;;  %v674_v48 = vadd.f32 %v10509_v38, %v673_v53  ;;  %v787_v43 = vmax.f32 %v669_v49, 0.0  ;;  %v1220_v41 = vand.u32 15, %v1010_v24 }
 0x168   : > { %v8384_v30 = vpop.f32.mrf.mxu0  ;;  %v3197_v49 = vshrl.u32 %v10588_v23, 16  ;;  %v13561_v24 = vsel %vm9953_vm10, %v9985_v20, %v9992_v54  ;;  %v13564_v54 = vsel %vm9953_vm10, %v10043_v35, %v9958_v34  ;;  %v10650_v47 = vsel %vm10128_vm5, %v3150_v22, %v9938_v14 }
 0x169   : > { %8058 = vst [vmem:[#allocation2 + $0x10] sm:$0xff] %v7986_v11   ;;  %v788_v18 = vmax.f32 %v674_v48, 0.0  ;;  %vm10622_vm12 = vcmp.ne.s16.totalorder %v13561_v24, 0  ;;  %vm10643_vm15 = vcmp.ne.s16.totalorder %v13564_v54, 0  ;;  %13567 = vst [vmem:[#allocation59_spill] sm:$0xff] %v10650_v47  ;;  %v3182_v24 = vshll.u32 %v10563_v12, 16 }
 0x16a   : > { %v676_v53 = vpop.f32.mrf.mxu0  ;;  %v685_v58 = vadd.f32 %v8384_v30, %v10509_v38  ;;  %vm10661_vm6 = vcmp.lt.s32.totalorder %v1220_v41, 15  ;;  %v13570_v47 = vsel %vm10019_vm4, %v9922_v61, 0  ;;  %v10672_v12 = vsel %vm10128_vm5, %v3168_v7, %v9938_v14 }
 0x16b   : > { %v7991_v11 = vpack.c.bf16 %v788_v18, %v787_v43  ;;  %v677_v48 = vadd.f32 %v10509_v38, %v676_v53  ;;  %v790_v43 = vmax.f32 %v682_v56, 0.0  ;;  %13571 = vst [vmem:[#allocation60_spill] sm:$0xff] %v10672_v12  ;;  %v10674_v30 = vrot.slane %v3197_v49, 7  ;;  %vm2934_vm9 = vmpackc.low %vm10661_vm6, %vm10661_vm6 }
 0x16c   : > { %v8387_v18 = vpop.f32.mrf.mxu0  ;;  %v10636_v53 = vld [vmem:[#allocation2 + $0xc] sm:$0xf]  ;;  %v13573_v7 = vsel %vm9953_vm10, %v9985_v20, %v10005_v0  ;;  %v13574_v49 = vmov 0  ;;  %v791_v63 = vmax.f32 %v685_v58, 0.0 }
 0x16d   : > { %8059 = vst [vmem:[#allocation2 + $0x18] sm:$0xff] %v7991_v11   ;;  %v789_v35 = vmax.f32 %v677_v48, 0.0  ;;  %v1980_v54 = vsel %vm10551_vm1, %v10636_v53, 0  ;;  %v3215_v11 = vshrl.u32 %v10634_v8, 16  ;;  %vm10687_vm7 = vcmp.ne.s16.totalorder %v13573_v7, 0 }
 0x16e   : > { %v689_v22 = vpop.f32.mrf.mxu0  ;;  %v7713_v56 = vcombine.low %v13570_v47, %v1980_v54  ;;  %v13575_v49 = vsel %vm10687_vm7, 4294967295, %v13574_v49  ;;  %v13579_v7 = vsel %vm9953_vm10, %v10059_v45, %v9958_v34 }
 0x16f   : > { %v7996_v48 = vpack.c.bf16 %v790_v43, %v789_v35  ;;  %v690_v41 = vadd.f32 %v10509_v38, %v689_v22  ;;  %13576 = vst [vmem:[#allocation62_spill] sm:$0xff] %v13575_v49  ;;  %v10697_v22 = vld [vmem:[#allocation2 + $0xc] sm:$0xf]  ;;  %vm10706_vm0 = vcmp.ne.s16.totalorder %v13579_v7, 0  ;;  %v13580_v35 = vmov 0 }
 0x170   : > { %v8388_v29 = vpop.f32.mrf.mxu0  ;;  %v2440_v61 = vshrl.u32 %v7713_v56, 16  ;;  %v2443_v47 = vshll.u32 %v7713_v56, 16  ;;  %v698_v56 = vadd.f32 %v8387_v18, %v10509_v38  ;;  %13577 = vst [vmem:[#allocation63_spill] sm:$0xff] %v10697_v22  ;;  %v10699_v0 = vld [vmem:[#allocation2 + $0x10] sm:$0xf]  ;;  %v13581_v35 = vsel %vm10706_vm0, 4294967295, %v13580_v35 }
 0x171   : > { %8060 = vst [vmem:[#allocation2 + $0x20] sm:$0xff] %v7996_v48   ;;  %v792_v54 = vmax.f32 %v690_v41, 0.0  ;;  %13578 = vst [vmem:[#allocation64_spill] sm:$0xff] %v10699_v0  ;;  %v10711_v43 = vor.u32 %v3182_v24, %v10626_v33  ;;  %v2810_v41 = vld [vmem:[#allocation2 + $0xc] sm:$0xf]  ;;  %v10714_v12 = vrot.slane %v3215_v11, 7 }
 0x172   : > { %13582 = vst [vmem:[#allocation65_spill] sm:$0xff] %v13581_v35  ;;  %v692_v58 = vpop.f32.mrf.mxu0  ;;  %v2442_v48 = vrot.slane %v2440_v61, 3  ;;  %v2445_v18 = vrot.slane %v2443_v47, 4  ;;  %v10717_v46 = vld [vmem:[#allocation2 + $0x14] sm:$0xf]  ;;  %v10725_v24 = vsel %vm2934_vm9, 65537, %v13512_v3  ;;  %v701_v47 = vadd.f32 %v8388_v29, %v10509_v38 }
 0x173   : > { %13583 = vst [vmem:[#allocation66_spill] sm:$0xff] %v10711_v43  ;;  %13584 = vst [vmem:[#allocation67_spill] sm:$0xff] %v10714_v12  ;;  %v8001_v52 = vpack.c.bf16 %v792_v54, %v791_v63  ;;  %v693_v31 = vadd.f32 %v10509_v38, %v692_v58  ;;  %v1465_v45 = vld [vmem:[#allocation2 + $0x10] sm:$0xf]  ;;  %v1466_v58 = vld [vmem:[#allocation2 + $0x14] sm:$0xf]  ;;  %v13588_v63 = vsel %vm9953_vm10, %v9985_v20, %v10052_v40 }
 0x174   : > { %13585 = vst [vmem:[#allocation68_spill] sm:$0xff] %v10717_v46  ;;  %13586 = vst [vmem:[#allocation69_spill] sm:$0xff] %v10725_v24  ;;  %v10729_v11 = vld [vmem:[#allocation2 + $0x18] sm:$0xf]  ;;  %v7689_v54 = vcombine.low %v10636_v53, %v1465_v45  ;;  %v8391_v7 = vpop.f32.mrf.mxu0  ;;  %v794_v3 = vmax.f32 %v698_v56, 0.0  ;;  %vm10746_vm6 = vcmp.ne.s16.totalorder %v13588_v63, 0  ;;  %v10771_v16 = vor.u32 %v2445_v18, %v2442_v48 }
 0x175   : > { %13587 = vst [vmem:[#allocation70_spill] sm:$0xff] %v10729_v11  ;;  %8061 = vst [vmem:[#allocation2 + $0x28] sm:$0xff] %v8001_v52   ;;  %v793_v24 = vmax.f32 %v693_v31, 0.0  ;;  %v10739_v61 = vld [vmem:[#allocation2 + $0x18] sm:$0xf]  ;;  %v13589_v53 = vmov 0  ;;  %v13592_v52 = vsel %vm9953_vm10, %v10106_v21, %v9958_v34 }
 0x176   : > { %v13590_v53 = vsel %vm10746_vm6, 4294967295, %v13589_v53  ;;  %vm10755_vm9 = vcmp.ne.s16.totalorder %v13592_v52, 0  ;;  %v13593_v31 = vmov 0  ;;  %v10761_v56 = vsel %vm13232_vm11, %v2810_v41, 0  ;;  %8426 = vmatmul.mubr.bf16.vlgmr.msra.gmra.mxu1 %v7689_v54  ;;  %v705_v21 = vpop.f32.mrf.mxu0  ;;  %v3819_v52 = vld [vmem:[#allocation2 + $0x1c] sm:$0xf] }
 0x177   : > { %13591 = vst [vmem:[#allocation71_spill] sm:$0xff] %v13590_v53  ;;  %v13594_v31 = vsel %vm10755_vm9, 4294967295, %v13593_v31  ;;  %13596 = vst [vmem:[#allocation73_spill] sm:$0xff] %v10761_v56  ;;  %v1981_v29 = vsel %vm10622_vm12, %v1465_v45, 0  ;;  %v8006_v4 = vpack.c.bf16 %v794_v3, %v793_v24  ;;  %v3851_v41 = vsel %vm10622_vm12, %v10729_v11, 0  ;;  %8506 = vmatpush3.bf16.msra.mxu1 %v9930_v6 }
 0x178   : > { %13595 = vst [vmem:[#allocation72_spill] sm:$0xff] %v13594_v31  ;;  %v706_v40 = vadd.f32 %v10509_v38, %v705_v21  ;;  %v1982_v63 = vsel %vm10643_vm15, %v1466_v58, 0  ;;  %v795_v45 = vmax.f32 %v701_v47, 0.0  ;;  %v5295_v54 = vld [vmem:[#allocation2 + $0x10] sm:$0x8]  ;;  %v7690_v3 = vcombine.low %v1466_v58, %v10739_v61  ;;  %v8392_v11 = vpop.f32.mrf.mxu0  ;;  %8507 = vmatprep.subr.bf16.mxu1 %v9087_v57 }
 0x179   : > { %v10782_v27 = vld [vmem:[#allocation2 + $0x14] sm:$0xf]  ;;  %v5299_v48 = vld [vmem:[#allocation2 + $0x20] sm:$0xf]  ;;  %v7714_v18 = vcombine.low %v1981_v29, %v1982_v63  ;;  %v3852_v24 = vsel %vm10643_vm15, %v3819_v52, 0  ;;  %8062 = vst [vmem:[#allocation2 + $0x30] sm:$0xff] %v8006_v4   ;;  %v714_v21 = vadd.f32 %v8391_v7, %v10509_v38  ;;  %v13599_v7 = vsel %vm9953_vm10, %v9985_v20, %v10080_v9 }
 0x17a   : > { %13597 = vst [vmem:[#allocation74_spill] sm:$0xff] %v10782_v27  ;;  %v5332_v6 = vsel %vm10622_vm12, %v5299_v48, 0  ;;  %v796_v56 = vmax.f32 %v706_v40, 0.0  ;;  %v5300_v47 = vld [vmem:[#allocation2 + $0x24] sm:$0xf]  ;;  %8429 = vmatprep.mubr.bf16.mxu1 %v7690_v3  ;;  %v10794_v52 = vcombine.low %v3851_v41, %v3852_v24  ;;  %v708_v1 = vpop.f32.mrf.mxu0  ;;  %vm10805_vm12 = vcmp.ne.s16.totalorder %v13599_v7, 0 }
 0x17b   : > { %v1468_v0 = vld [vmem:[#allocation2 + $0x1c] sm:$0xf]  ;;  %v2449_v29 = vshrl.u32 %v7714_v18, 16  ;;  %v2452_v63 = vshll.u32 %v7714_v18, 16  ;;  %v5333_v4 = vsel %vm10643_vm15, %v5300_v47, 0  ;;  %v13600_v40 = vmov 0  ;;  %8508 = vmatpush3.bf16.msra.mxu1 %v9087_v57 }
 0x17c   : > { %13598 = vst [vmem:[#allocation75_spill] sm:$0xff] %v10794_v52  ;;  %v10798_v48 = vld [vmem:[#allocation2 + $0x20] sm:$0xf]  ;;  %v13601_v40 = vsel %vm10805_vm12, 4294967295, %v13600_v40  ;;  %v13603_v41 = vsel %vm9953_vm10, %v10120_v42, %v9958_v34  ;;  %v10818_v3 = vld [vmem:[#allocation2 + $0x18] sm:$0xf]  ;;  %v8011_v24 = vpack.c.bf16 %v796_v56, %v795_v45  ;;  %v10825_v47 = vcombine.low %v5332_v6, %v5333_v4  ;;  %v8395_v45 = vpop.f32.mrf.mxu0  ;;  %8509 = vmatprep.subr.bf16.mxu1 %v10780_v62 }
 0x17d   : > { %13602 = vst [vmem:[#allocation76_spill] sm:$0xff] %v13601_v40  ;;  %vm10814_vm11 = vcmp.ne.s16.totalorder %v13603_v41, 0  ;;  %13607 = vst [vmem:[#allocation78_spill] sm:$0xff] %v10818_v3  ;;  %v10820_v18 = vld [vmem:[#allocation2 + $0x1c] sm:$0xf]  ;;  %v1983_v9 = vsel %vm10687_vm7, %v10739_v61, 0  ;;  %v13610_v7 = vor.u32 %v10050_v37, %v10048_v36  ;;  %v709_v43 = vadd.f32 %v10509_v38, %v708_v1 }
 0x17e   : > { %v13605_v39 = vsel %vm10814_vm11, 4294967295, %v13604_v39  ;;  %13608 = vst [vmem:[#allocation79_spill] sm:$0xff] %v10820_v18  ;;  %13609 = vst [vmem:[#allocation80_spill] sm:$0xff] %v10825_v47  ;;  %v2451_v41 = vrot.slane %v2449_v29, 3  ;;  %v2454_v58 = vrot.slane %v2452_v63, 4  ;;  %v1984_v56 = vsel %vm10706_vm0, %v1468_v0, 0 }
 0x17f   : > { %13606 = vst [vmem:[#allocation77_spill] sm:$0xff] %v13605_v39  ;;  %v2447_v42 = vsel %vm13239_vm8, %v13610_v7, %v10771_v16  ;;  %v10838_v61 = vsel %vm1944_vm13, %v5295_v54, 0  ;;  %8063 = vst [vmem:[#allocation2 + $0x38] sm:$0xff] %v8011_v24   ;;  %v717_v37 = vadd.f32 %v8392_v11, %v10509_v38  ;;  %v7691_v57 = vcombine.low %v1468_v0, %v10798_v48  ;;  %v1470_v6 = vld [vmem:[#allocation2 + $0x24] sm:$0xf]  ;;  %v721_v7 = vpop.f32.mrf.mxu0 }
 0x180   : > { %8473 = vmatprep.mubr.bf16.mxu0 %v2447_v42  ;;  %13611 = vst [vmem:[#allocation81_spill] sm:$0xff] %v10838_v61  ;;  %v9093_v29 = vld [vmem:[#allocation9 + $0xa0] sm:$0xff]   ;;  %v798_v54 = vmax.f32 %v714_v21, 0.0  ;;  %v797_v1 = vmax.f32 %v709_v43, 0.0  ;;  %v13612_v0 = vsel %vm9953_vm10, %v9985_v20, %v10102_v15  ;;  %v13613_v11 = vmov 0  ;;  %8510 = vmatpush3.bf16.msra.mxu1 %v10780_v62 }
 0x181   : > { %v10851_v4 = vld [vmem:[#allocation2 + $0x20] sm:$0xf]  ;;  %vm10858_vm13 = vcmp.ne.s16.totalorder %v13612_v0, 0  ;;  %v10862_v24 = vld [vmem:[#allocation2 + $0x28] sm:$0xf]  ;;  %8430 = vmatmul.mubr.bf16.gmra.mxu1 %v7691_v57  ;;  %v7715_v42 = vcombine.low %v1983_v9, %v1984_v56  ;;  %v10866_v21 = vor.u32 %v2454_v58, %v2451_v41  ;;  %v722_v43 = vadd.f32 %v10509_v38, %v721_v7  ;;  %v8396_v7 = vpop.f32.mrf.mxu0  ;;  %8511 = vmatprep.subr.bf16.mxu1 %v9093_v29 }
 0x182   : > { %v13614_v11 = vsel %vm10858_vm13, 4294967295, %v13613_v11  ;;  %13616 = vst [vmem:[#allocation83_spill] sm:$0xff] %v10862_v24  ;;  %v10864_v63 = vld [vmem:[#allocation2 + $0x24] sm:$0xf]  ;;  %v10869_v19 = vld [vmem:[#allocation2 + $0x28] sm:$0xf]  ;;  %v13617_v15 = vsel %vm9953_vm10, %v10179_v10, %v9958_v34  ;;  %v8016_v41 = vpack.c.bf16 %v798_v54, %v797_v1 }
 0x183   : > { %13615 = vst [vmem:[#allocation82_spill] sm:$0xff] %v13614_v11  ;;  %vm10876_vm15 = vcmp.ne.s16.totalorder %v13617_v15, 0  ;;  %v13620_v9 = vrot.slane %v10626_v33, 4  ;;  %v1985_v56 = vsel %vm10746_vm6, %v10798_v48, 0  ;;  %v1986_v57 = vsel %vm10755_vm9, %v1470_v6, 0  ;;  %v10894_v15 = vld [vmem:[#allocation9 + $0x98] sm:$0xff]  }
 0x184   : > { %v7692_v10 = vcombine.low %v1470_v6, %v10869_v19  ;;  %v9103_v33 = vld [vmem:[#allocation9 + $0xf0] sm:$0xff]   ;;  %v799_v36 = vmax.f32 %v717_v37, 0.0  ;;  %v10896_v47 = vld [vmem:[#allocation2 + $0x28] sm:$0xf]  ;;  %v2456_v48 = vsel %vm13239_vm8, %v10771_v16, %v10866_v21  ;;  %v800_v54 = vmax.f32 %v722_v43, 0.0  ;;  %8064 = vst [vmem:[#allocation2 + $0x40] sm:$0xff] %v8016_v41   ;;  %8512 = vmatpush3.bf16.msra.mxu1 %v9093_v29 }
 0x185   : > { %v10885_v58 = vsel %vm10128_vm5, %v13620_v9, %v9938_v14  ;;  %13622 = vst [vmem:[#allocation85_spill] sm:$0xff] %v10896_v47  ;;  %v10898_v9 = vld [vmem:[#allocation2 + $0x2c] sm:$0xf]  ;;  %v13624_v6 = vshll.u32 %v10588_v23, 16  ;;  %8474 = vmatmul.mubr.bf16.vlgmr.msra.gmra.mxu0 %v2456_v48  ;;  %v730_v43 = vadd.f32 %v8395_v45, %v10509_v38  ;;  %v724_v23 = vpop.f32.mrf.mxu0  ;;  %v10918_v3 = vld [vmem:[#allocation2 + $0x30] sm:$0xf]  ;;  %v7716_v61 = vcombine.low %v1985_v56, %v1986_v57 }
 0x186   : > { %13621 = vst [vmem:[#allocation84_spill] sm:$0xff] %v10885_v58  ;;  %13623 = vst [vmem:[#allocation86_spill] sm:$0xff] %v10898_v9  ;;  %8433 = vmatprep.mubr.bf16.mxu1 %v7692_v10  ;;  %v8021_v18 = vpack.c.bf16 %v800_v54, %v799_v36  ;;  %v2458_v62 = vshrl.u32 %v7715_v42, 16  ;;  %v2461_v27 = vshll.u32 %v7715_v42, 16  ;;  %v10920_v58 = vld [vmem:[#allocation2 + $0x30] sm:$0xf]  ;;  %v13627_v41 = vsel %vm9953_vm10, %v9985_v20, %v10153_v55 }
 0x187   : > { %v10906_v1 = vor.u32 %v13624_v6, %v10674_v30  ;;  %v1472_v6 = vld [vmem:[#allocation2 + $0x2c] sm:$0xf]  ;;  %13626 = vst [vmem:[#allocation88_spill] sm:$0xff] %v10918_v3  ;;  %vm10927_vm8 = vcmp.ne.s16.totalorder %v13627_v41, 0  ;;  %v13628_v48 = vmov 0  ;;  %v13631_v45 = vsel %vm9953_vm10, %v10236_v26, %v9958_v34  ;;  %8554 = vmatpush3.bf16.msra.mxu0 %v10097_v60  ;;  %v8399_v10 = vpop.f32.mrf.mxu0  ;;  %v9099_v26 = vld [vmem:[#allocation9 + $0x90] sm:$0xff]   ;;  %8513 = vmatprep.subr.bf16.mxu1 %v10894_v15 }
 0x188   : > { %v13629_v48 = vsel %vm10927_vm8, 4294967295, %v13628_v48  ;;  %vm10936_vm2 = vcmp.ne.s16.totalorder %v13631_v45, 0  ;;  %v13632_v36 = vmov 0  ;;  %v725_v56 = vadd.f32 %v10509_v38, %v724_v23  ;;  %8555 = vmatprep.subr.bf16.mxu0 %v9103_v33  ;;  %v9106_v54 = vld [vmem:[#allocation9 + $0xe8] sm:$0xff]   ;;  %8065 = vst [vmem:[#allocation2 + $0x48] sm:$0xff] %v8021_v18   ;;  %8514 = vmatpush3.bf16.msra.mxu1 %v10894_v15 }
 0x189   : > { %13625 = vst [vmem:[#allocation87_spill] sm:$0xff] %v10906_v1  ;;  %13630 = vst [vmem:[#allocation89_spill] sm:$0xff] %v13629_v48  ;;  %v13633_v36 = vsel %vm10936_vm2, 4294967295, %v13632_v36  ;;  %v7693_v57 = vcombine.low %v1472_v6, %v10920_v58  ;;  %v1987_v60 = vsel %vm10805_vm12, %v10869_v19, 0  ;;  %v10952_v41 = vld [vmem:[#allocation2 + $0x2c] sm:$0xf]  ;;  %v733_v18 = vadd.f32 %v8396_v7, %v10509_v38  ;;  %v737_v16 = vpop.f32.mrf.mxu0  ;;  %8515 = vmatprep.subr.bf16.mxu1 %v9099_v26 }
 0x18a   : > { %13634 = vst [vmem:[#allocation90_spill] sm:$0xff] %v13633_v36  ;;  %v2460_v45 = vrot.slane %v2458_v62, 3  ;;  %v2463_v37 = vrot.slane %v2461_v27, 4  ;;  %v1988_v55 = vsel %vm10814_vm11, %v1472_v6, 0  ;;  %v802_v23 = vmax.f32 %v730_v43, 0.0 }
 0x18b   : > { %v801_v42 = vmax.f32 %v725_v56, 0.0  ;;  %8434 = vmatmul.mubr.bf16.gmra.mxu1 %v7693_v57  ;;  %v2467_v19 = vshrl.u32 %v7716_v61, 16  ;;  %v2470_v9 = vshll.u32 %v7716_v61, 16  ;;  %v1474_v62 = vld [vmem:[#allocation2 + $0x34] sm:$0xf]  ;;  %8556 = vmatpush3.bf16.msra.mxu0 %v9103_v33  ;;  %v7717_v56 = vcombine.low %v1987_v60, %v1988_v55  ;;  %v10975_v57 = vpop.f32.mrf.mxu0 }
 0x18c   : > { %v2464_v24 = vor.u32 %v2463_v37, %v2460_v45  ;;  %v10961_v27 = vld [vmem:[#allocation2 + $0x38] sm:$0xf]  ;;  %v10967_v52 = vld [vmem:[#allocation2 + $0x30] sm:$0xf]  ;;  %v10972_v43 = vld [vmem:[#allocation2 + $0x34] sm:$0xf]  ;;  %v738_v61 = vadd.f32 %v10509_v38, %v737_v16  ;;  %v13637_v33 = vsel %vm9953_vm10, %v9985_v20, %v10260_v17  ;;  %v13641_v29 = vsel %vm9953_vm10, %v10295_v50, %v9958_v34  ;;  %8557 = vmatprep.subr.bf16.mxu0 %v9106_v54 }
 0x18d   : > { %13635 = vst [vmem:[#allocation91_spill] sm:$0xff] %v10967_v52  ;;  %13636 = vst [vmem:[#allocation92_spill] sm:$0xff] %v10972_v43  ;;  %v8026_v37 = vpack.c.bf16 %v802_v23, %v801_v42  ;;  %vm10982_vm6 = vcmp.ne.s16.totalorder %v13637_v33, 0  ;;  %v13638_v45 = vmov 0  ;;  %vm10991_vm3 = vcmp.ne.s16.totalorder %v13641_v29, 0  ;;  %v9104_v16 = vld [vmem:[#allocation9 + $0x88] sm:$0xff]   ;;  %8516 = vmatpush3.bf16.msra.mxu1 %v9099_v26 }
 0x18e   : > { %v13639_v45 = vsel %vm10982_vm6, 4294967295, %v13638_v45  ;;  %v13642_v42 = vmov 0  ;;  %v10996_v55 = vld [vmem:[#allocation2 + $0x38] sm:$0xf]  ;;  %vm13646_vm7 = vsmask.f32 4352  ;;  %v7694_v3 = vcombine.low %v1474_v62, %v10961_v27  ;;  %8517 = vmatprep.subr.bf16.mxu1 %v9104_v16 }
 0x18f   : > { %13640 = vst [vmem:[#allocation93_spill] sm:$0xff] %v13639_v45  ;;  %v13643_v42 = vsel %vm10991_vm3, 4294967295, %v13642_v42  ;;  %13645 = vst [vmem:[#allocation95_spill] sm:$0xff] %v10996_v55  ;;  %v2465_v17 = vsel %vm13646_vm7, %v10866_v21, %v2464_v24  ;;  %v1989_v60 = vsel %vm10858_vm13, %v10920_v58, 0  ;;  %v2469_v23 = vrot.slane %v2467_v19, 3  ;;  %v9108_v50 = vld [vmem:[#allocation9 + $0xe0] sm:$0xff]   ;;  %v740_v21 = vpop.f32.mrf.mxu0  ;;  %8558 = vmatpush3.bf16.msra.mxu0 %v9106_v54 }
 0x190   : > { %13644 = vst [vmem:[#allocation94_spill] sm:$0xff] %v13643_v42  ;;  %v2472_v33 = vrot.slane %v2470_v9, 4  ;;  %8477 = vmatprep.mubr.bf16.mxu0 %v2465_v17  ;;  %v803_v29 = vmax.f32 %v733_v18, 0.0  ;;  %8066 = vst [vmem:[#allocation2 + $0x50] sm:$0xff] %v8026_v37   ;;  %v11003_v6 = vld [vmem:[#allocation2 + $0x34] sm:$0xf]  ;;  %v746_v18 = vadd.f32 %v8399_v10, %v10509_v38  ;;  %8437 = vmatprep.mubr.bf16.mxu1 %v7694_v3 }
 0x191   : > { %v804_v15 = vmax.f32 %v738_v61, 0.0  ;;  %v1990_v7 = vsel %vm10876_vm15, %v1474_v62, 0  ;;  %v1476_v37 = vld [vmem:[#allocation2 + $0x3c] sm:$0xf]  ;;  %v2476_v62 = vshrl.u32 %v7717_v56, 16  ;;  %v2479_v1 = vshll.u32 %v7717_v56, 16  ;;  %v11020_v58 = vpop.f32.mrf.mxu0  ;;  %8559 = vmatprep.subr.bf16.mxu0 %v9108_v50  ;;  %8518 = vmatpush3.bf16.msra.mxu1 %v9104_v16 }
 0x192   : > { %v2473_v19 = vor.u32 %v2472_v33, %v2469_v23  ;;  %v11018_v47 = vld [vmem:[#allocation2 + $0x40] sm:$0xf]  ;;  %v9111_v52 = vld [vmem:[#allocation9 + $0xd8] sm:$0xff]   ;;  %v7718_v33 = vcombine.low %v1989_v60, %v1990_v7  ;;  %v741_v3 = vadd.f32 %v10509_v38, %v740_v21  ;;  %v13649_v56 = vsel %vm9953_vm10, %v9985_v20, %v10262_v28  ;;  %v1480_v48 = vld [vmem:[#allocation2 + $0x4c] sm:$0xf] }
 0x193   : > { %v8031_v17 = vpack.c.bf16 %v804_v15, %v803_v29  ;;  %v11022_v9 = vld [vmem:[#allocation2 + $0x38] sm:$0xf]  ;;  %v11027_v54 = vld [vmem:[#allocation2 + $0x3c] sm:$0xf]  ;;  %vm11036_vm12 = vcmp.ne.s16.totalorder %v13649_v56, 0  ;;  %v13650_v26 = vmov 0  ;;  %v13653_v29 = vsel %vm9953_vm10, %v10305_v5, %v9958_v34  ;;  %v753_v56 = vpop.f32.mrf.mxu0  ;;  %8560 = vmatpush3.bf16.msra.mxu0 %v9108_v50 }
 0x194   : > { %13647 = vst [vmem:[#allocation96_spill] sm:$0xff] %v11022_v9  ;;  %13648 = vst [vmem:[#allocation97_spill] sm:$0xff] %v11027_v54  ;;  %v2474_v23 = vsel %vm13646_vm7, %v2464_v24, %v2473_v19  ;;  %v13651_v26 = vsel %vm11036_vm12, 4294967295, %v13650_v26  ;;  %vm11045_vm9 = vcmp.ne.s16.totalorder %v13653_v29, 0  ;;  %v13654_v15 = vmov 0  ;;  %v9109_v24 = vld [vmem:[#allocation9 + $0x80] sm:$0xff]   ;;  %8561 = vmatprep.subr.bf16.mxu0 %v9111_v52 }
 0x195   : > { %13652 = vst [vmem:[#allocation98_spill] sm:$0xff] %v13651_v26  ;;  %v13655_v15 = vsel %vm11045_vm9, 4294967295, %v13654_v15  ;;  %8478 = vmatmul.mubr.bf16.gmra.mxu0 %v2474_v23  ;;  %8067 = vst [vmem:[#allocation2 + $0x58] sm:$0xff] %v8031_v17   ;;  %v1991_v28 = vsel %vm10927_vm8, %v10961_v27, 0  ;;  %v2478_v7 = vrot.slane %v2476_v62, 3  ;;  %v2481_v60 = vrot.slane %v2479_v1, 4  ;;  %v8404_v23 = vpop.f32.mrf.mxu0  ;;  %8519 = vmatprep.subr.bf16.mxu1 %v9109_v24 }
 0x196   : > { %v1992_v21 = vsel %vm10936_vm2, %v1476_v37, 0  ;;  %v11054_v5 = vld [vmem:[#allocation2 + $0x40] sm:$0xf]  ;;  %v806_v29 = vmax.f32 %v746_v18, 0.0  ;;  %v11056_v61 = vld [vmem:[#allocation2 + $0x3c] sm:$0xf]  ;;  %v7695_v55 = vcombine.low %v1476_v37, %v11018_v47  ;;  %v749_v37 = vadd.f32 %v10975_v57, %v10509_v38  ;;  %8520 = vmatpush3.bf16.msra.mxu1 %v9109_v24 }
 0x197   : > { %13656 = vst [vmem:[#allocation99_spill] sm:$0xff] %v11054_v5  ;;  %v805_v10 = vmax.f32 %v741_v3, 0.0  ;;  %v13657_v17 = vrot.slane %v10674_v30, 4  ;;  %v2482_v62 = vor.u32 %v2481_v60, %v2478_v7  ;;  %v1478_v50 = vld [vmem:[#allocation2 + $0x44] sm:$0xf]  ;;  %v9112_v30 = vld [vmem:[#allocation9 + $0xd0] sm:$0xff]   ;;  %v7719_v1 = vcombine.low %v1991_v28, %v1992_v21  ;;  %8562 = vmatpush3.bf16.msra.mxu0 %v9111_v52 }
 0x198   : > { %v11074_v3 = vld [vmem:[#allocation9 + $0x138] sm:$0xff]   ;;  %8438 = vmatmul.mubr.bf16.gmra.mxu1 %v7695_v55  ;;  %v11078_v9 = vld [vmem:[#allocation2 + $0x48] sm:$0xf]  ;;  %v13660_v57 = vsel %vm9953_vm10, %v9985_v20, %v10267_v2  ;;  %v13661_v16 = vmov 0  ;;  %vm13663_vm11 = vsmask.f32 4352  ;;  %v754_v7 = vadd.f32 %v10509_v38, %v753_v56  ;;  %v756_v2 = vpop.f32.mrf.mxu0  ;;  %8563 = vmatprep.subr.bf16.mxu0 %v9112_v30 }
 0x199   : > { %v11064_v27 = vsel %vm10128_vm5, %v13657_v17, %v9938_v14  ;;  %v11076_v17 = vld [vmem:[#allocation2 + $0x40] sm:$0xf]  ;;  %v8036_v43 = vpack.c.bf16 %v806_v29, %v805_v10  ;;  %v2485_v14 = vshrl.u32 %v7718_v33, 16  ;;  %vm11085_vm7 = vcmp.ne.s16.totalorder %v13660_v57, 0  ;;  %v11096_v28 = vld [vmem:[#allocation2 + $0x44] sm:$0xf]  ;;  %8601 = vmatprep.subr.bf16.mxu1 %v11074_v3 }
 0x19a   : > { %13658 = vst [vmem:[#allocation100_spill] sm:$0xff] %v11064_v27  ;;  %13659 = vst [vmem:[#allocation101_spill] sm:$0xff] %v11076_v17  ;;  %v2488_v27 = vshll.u32 %v7718_v33, 16  ;;  %v13662_v16 = vsel %vm11085_vm7, 4294967295, %v13661_v16  ;;  %v2483_v33 = vsel %vm13663_vm11, %v2473_v19, %v2482_v62  ;;  %v13665_v60 = vld [vmem:[#allocation33_spill] sm:$0xff]  ;;  %v13667_v29 = vmov 0 }
 0x19b   : > { %13664 = vst [vmem:[#allocation102_spill] sm:$0xff] %v11096_v28  ;;  %v13666_v21 = vsel %vm9953_vm10, %v13665_v60, %v9958_v34  ;;  %8481 = vmatprep.mubr.bf16.mxu0 %v2483_v33  ;;  %8068 = vst [vmem:[#allocation2 + $0x60] sm:$0xff] %v8036_v43   ;;  %v1993_v19 = vsel %vm10982_vm6, %v11018_v47, 0  ;;  %v11111_v57 = vld [vmem:[#allocation2 + $0x48] sm:$0xf]  ;;  %v2487_v10 = vrot.slane %v2485_v14, 3  ;;  %v11128_v33 = vpop.f32.mrf.mxu0  ;;  %v762_v52 = vadd.f32 %v11020_v58, %v10509_v38 }
 0x19c   : > { %vm11104_vm0 = vcmp.ne.s16.totalorder %v13666_v21, 0  ;;  %13669 = vst [vmem:[#allocation33_spill] sm:$0xff] %v11111_v57  ;;  %v2490_v56 = vrot.slane %v2488_v27, 4  ;;  %v1994_v18 = vsel %vm10991_vm3, %v1478_v50, 0  ;;  %v13670_v60 = vld [vmem:[#allocation28_spill] sm:$0xff]  ;;  %v13672_v55 = vmov 0  ;;  %8564 = vmatpush3.bf16.msra.mxu0 %v9112_v30 }
 0x19d   : > { %v13668_v29 = vsel %vm11104_vm0, 4294967295, %v13667_v29  ;;  %v13671_v21 = vsel %vm9953_vm10, %v9985_v20, %v13670_v60  ;;  %v807_v43 = vmax.f32 %v749_v37, 0.0  ;;  %v808_v14 = vmax.f32 %v754_v7, 0.0  ;;  %v9114_v5 = vld [vmem:[#allocation9 + $0xc8] sm:$0xff]   ;;  %v11135_v47 = vld [vmem:[#allocation2 + $0x50] sm:$0xf] }
 0x19e   : > { %vm11120_vm11 = vcmp.ne.s16.totalorder %v13671_v21, 0  ;;  %v7696_v27 = vcombine.low %v1478_v50, %v11078_v9  ;;  %v2491_v21 = vor.u32 %v2490_v56, %v2487_v10  ;;  %v2494_v54 = vshrl.u32 %v7719_v1, 16  ;;  %v11141_v7 = vld [vmem:[#allocation2 + $0x4c] sm:$0xf]  ;;  %v11143_v60 = vld [vmem:[#allocation2 + $0x50] sm:$0xf]  ;;  %v769_v56 = vpop.f32.mrf.mxu0  ;;  %8565 = vmatprep.subr.bf16.mxu0 %v9114_v5 }
 0x19f   : > { %v13673_v55 = vsel %vm11120_vm11, 4294967295, %v13672_v55  ;;  %v8041_v37 = vpack.c.bf16 %v808_v14, %v807_v43  ;;  %v7720_v50 = vcombine.low %v1993_v19, %v1994_v18  ;;  %13675 = vst [vmem:[#allocation103_spill] sm:$0xff] %v11141_v7  ;;  %13676 = vst [vmem:[#allocation104_spill] sm:$0xff] %v11143_v60  ;;  %v2497_v10 = vshll.u32 %v7719_v1, 16  ;;  %v13677_v58 = vld [vmem:[#allocation34_spill] sm:$0xff]  ;;  %v9115_v30 = vld [vmem:[#allocation9 + $0xc0] sm:$0xff]  }
 0x1a0   : > { %13674 = vst [vmem:[#allocation28_spill] sm:$0xff] %v13673_v55  ;;  %8441 = vmatprep.mubr.bf16.mxu1 %v7696_v27  ;;  %v13678_v17 = vsel %vm9953_vm10, %v13677_v58, %v9958_v34  ;;  %v13679_v28 = vmov 0  ;;  %vm13682_vm2 = vsmask.f32 4352  ;;  %v2496_v43 = vrot.slane %v2494_v54, 3  ;;  %v13683_v54 = vld [vmem:[#allocation29_spill] sm:$0xff]  ;;  %v8408_v45 = vpop.f32.mrf.mxu0  ;;  %8566 = vmatpush3.bf16.msra.mxu0 %v9114_v5 }
 0x1a1   : > { %vm11150_vm8 = vcmp.ne.s16.totalorder %v13678_v17, 0  ;;  %v2492_v24 = vsel %vm13682_vm2, %v2482_v62, %v2491_v21  ;;  %v765_v18 = vadd.f32 %v8404_v23, %v10509_v38  ;;  %v757_v19 = vadd.f32 %v10509_v38, %v756_v2  ;;  %8069 = vst [vmem:[#allocation2 + $0x68] sm:$0xff] %v8041_v37   ;;  %v1482_v37 = vld [vmem:[#allocation2 + $0x54] sm:$0xf]  ;;  %v11178_v57 = vld [vmem:[#allocation2 + $0x58] sm:$0xf]  ;;  %8567 = vmatprep.subr.bf16.mxu0 %v9115_v30 }
 0x1a2   : > { %v13680_v28 = vsel %vm11150_vm8, 4294967295, %v13679_v28  ;;  %8482 = vmatmul.mubr.bf16.gmra.mxu0 %v2492_v24  ;;  %v1995_v1 = vsel %vm11036_vm12, %v11078_v9, 0  ;;  %v2499_v14 = vrot.slane %v2497_v10, 4  ;;  %v1996_v17 = vsel %vm11045_vm9, %v1480_v48, 0  ;;  %v5315_v58 = vld [vmem:[#allocation2 + $0x60] sm:$0xf] }
 0x1a3   : > { %13681 = vst [vmem:[#allocation34_spill] sm:$0xff] %v13680_v28  ;;  %v7697_v27 = vcombine.low %v1480_v48, %v11135_v47  ;;  %v13684_v62 = vsel %vm9953_vm10, %v9985_v20, %v13683_v54  ;;  %v13685_v23 = vmov 0  ;;  %v810_v2 = vmax.f32 %v762_v52, 0.0  ;;  %v13687_v52 = vld [vmem:[#allocation35_spill] sm:$0xff]  ;;  %v11194_v48 = vld [vmem:[#allocation2 + $0x54] sm:$0xf] }
 0x1a4   : > { %vm11168_vm2 = vcmp.ne.s16.totalorder %v13684_v62, 0  ;;  %v809_v24 = vmax.f32 %v757_v19, 0.0  ;;  %v2500_v10 = vor.u32 %v2499_v14, %v2496_v43  ;;  %v2503_v54 = vshrl.u32 %v7720_v50, 16  ;;  %13692 = vst [vmem:[#allocation29_spill] sm:$0xff] %v11194_v48  ;;  %v5316_v36 = vld [vmem:[#allocation2 + $0x64] sm:$0xf]  ;;  %8568 = vmatpush3.bf16.msra.mxu0 %v9115_v30 }
 0x1a5   : > { %v13686_v23 = vsel %vm11168_vm2, 4294967295, %v13685_v23  ;;  %8442 = vmatmul.mubr.bf16.gmra.mxu1 %v7697_v27  ;;  %v2506_v62 = vshll.u32 %v7720_v50, 16  ;;  %v13688_v42 = vsel %vm9953_vm10, %v13687_v52, %v9958_v34  ;;  %v13689_v9 = vmov 0  ;;  %v11210_v5 = vld [vmem:[#allocation9 + $0x178] sm:$0xff]  }
 0x1a6   : > { %vm11185_vm6 = vcmp.ne.s16.totalorder %v13688_v42, 0  ;;  %v13691_v19 = vshll.u32 %v10634_v8, 16  ;;  %v811_v14 = vmax.f32 %v765_v18, 0.0  ;;  %v8046_v27 = vpack.c.bf16 %v810_v2, %v809_v24  ;;  %v13694_v8 = vld [vmem:[#allocation30_spill] sm:$0xff]  ;;  %v11217_v2 = vld [vmem:[#allocation2 + $0x58] sm:$0xf]  ;;  %8649 = vmatprep.subr.bf16.mxu0 %v11210_v5 }
 0x1a7   : > { %v13690_v9 = vsel %vm11185_vm6, 4294967295, %v13689_v9  ;;  %v7721_v50 = vcombine.low %v1995_v1, %v1996_v17  ;;  %v770_v60 = vadd.f32 %v10509_v38, %v769_v56  ;;  %vm13693_vm12 = vsmask.f32 4352 }
 0x1a8   : > { %v11192_v43 = vor.u32 %v13691_v19, %v10714_v12  ;;  %v2501_v26 = vsel %vm13693_vm12, %v2491_v21, %v2500_v10  ;;  %v1997_v42 = vsel %vm11085_vm7, %v11135_v47, 0  ;;  %v2505_v52 = vrot.slane %v2503_v54, 3  ;;  %8070 = vst [vmem:[#allocation2 + $0x70] sm:$0xff] %v8046_v27   ;;  %v13699_v19 = vld [vmem:[#allocation36_spill] sm:$0xff]  ;;  %v11239_v12 = vld [vmem:[#allocation2 + $0x5c] sm:$0xf] }
 0x1a9   : > { %v2508_v7 = vrot.slane %v2506_v62, 4  ;;  %v13695_v18 = vsel %vm9953_vm10, %v9985_v20, %v13694_v8  ;;  %v13696_v1 = vmov 0  ;;  %8485 = vmatprep.mubr.bf16.mxu0 %v2501_v26  ;;  %v5348_v47 = vsel %vm11085_vm7, %v5315_v58, 0  ;;  %v1484_v62 = vld [vmem:[#allocation2 + $0x5c] sm:$0xf] }
 0x1aa   : > { %vm11206_vm3 = vcmp.ne.s16.totalorder %v13695_v18, 0  ;;  %v812_v21 = vmax.f32 %v770_v60, 0.0  ;;  %v1998_v56 = vsel %vm11104_vm0, %v1482_v37, 0  ;;  %v7698_v17 = vcombine.low %v1482_v37, %v11178_v57  ;;  %v772_v60 = vpop.f32.mrf.mxu0  ;;  %v1485_v18 = vld [vmem:[#allocation2 + $0x60] sm:$0xf] }
 0x1ab   : > { %v13697_v1 = vsel %vm11206_vm3, 4294967295, %v13696_v1  ;;  %v2509_v54 = vor.u32 %v2508_v7, %v2505_v52  ;;  %v778_v26 = vadd.f32 %v11128_v33, %v10509_v38  ;;  %v1999_v58 = vsel %vm11120_vm11, %v11178_v57, 0 }
 0x1ac   : > { %13698 = vst [vmem:[#allocation35_spill] sm:$0xff] %v13697_v1  ;;  %v13700_v37 = vsel %vm9953_vm10, %v13699_v19, %v9958_v34  ;;  %v13701_v27 = vmov 0  ;;  %v8051_v8 = vpack.c.bf16 %v812_v21, %v811_v14  ;;  %8445 = vmatprep.mubr.bf16.mxu1 %v7698_v17  ;;  %v5349_v33 = vsel %vm11104_vm0, %v5316_v36, 0 }
 0x1ad   : > { %vm11232_vm12 = vcmp.ne.s16.totalorder %v13700_v37, 0  ;;  %v2512_v7 = vshrl.u32 %v7721_v50, 16  ;;  %v2515_v52 = vshll.u32 %v7721_v50, 16  ;;  %vm13704_vm9 = vsmask.f32 4352 }
 0x1ae   : > { %v13702_v27 = vsel %vm11232_vm12, 4294967295, %v13701_v27  ;;  %v2510_v57 = vsel %vm13704_vm9, %v2500_v10, %v2509_v54  ;;  %v7722_v24 = vcombine.low %v1997_v42, %v1998_v56  ;;  %v11241_v48 = vcombine.low %v5348_v47, %v5349_v33  ;;  %8071 = vst [vmem:[#allocation2 + $0x78] sm:$0xff] %v8051_v8   ;;  %v13706_v10 = vld [vmem:[#allocation31_spill] sm:$0xff]  ;;  %v1486_v8 = vld [vmem:[#allocation2 + $0x64] sm:$0xf] }
 0x1af   : > { %13703 = vst [vmem:[#allocation30_spill] sm:$0xff] %v13702_v27  ;;  %v781_v19 = vadd.f32 %v8408_v45, %v10509_v38  ;;  %8486 = vmatmul.mubr.bf16.gmra.mxu0 %v2510_v57  ;;  %v2514_v14 = vrot.slane %v2512_v7, 3  ;;  %v2517_v21 = vrot.slane %v2515_v52, 4  ;;  %v773_v36 = vadd.f32 %v10509_v38, %v772_v60  ;;  %v13711_v45 = vld [vmem:[#allocation37_spill] sm:$0xff]  ;;  %v11286_v38 = vld [vmem:[#allocation2 + $0x64] sm:$0xf] }
 0x1b0   : > { %13705 = vst [vmem:[#allocation36_spill] sm:$0xff] %v11241_v48  ;;  %v2000_v30 = vsel %vm11150_vm8, %v1484_v62, 0  ;;  %v13707_v50 = vsel %vm9953_vm10, %v9985_v20, %v13706_v10  ;;  %v13708_v42 = vmov 0  ;;  %v13712_v47 = vsel %vm9953_vm10, %v13711_v45, %v9958_v34  ;;  %v1487_v57 = vld [vmem:[#allocation2 + $0x68] sm:$0xf]  ;;  %v13715_v10 = vld [vmem:[#allocation32_spill] sm:$0xff] }
 0x1b1   : > { %vm11253_vm9 = vcmp.ne.s16.totalorder %v13707_v50, 0  ;;  %vm11262_vm13 = vcmp.ne.s16.totalorder %v13712_v47, 0  ;;  %v814_v17 = vmax.f32 %v778_v26, 0.0  ;;  %v815_v60 = vmax.f32 %v781_v19, 0.0 }
 0x1b2   : > { %v13709_v42 = vsel %vm11253_vm9, 4294967295, %v13708_v42  ;;  %v7699_v37 = vcombine.low %v1484_v62, %v1485_v18  ;;  %v2518_v7 = vor.u32 %v2517_v21, %v2514_v14  ;;  %v813_v52 = vmax.f32 %v773_v36, 0.0  ;;  %v11283_v62 = vld [vmem:[#allocation2 + $0x60] sm:$0xf]  ;;  %v5319_v14 = vld [vmem:[#allocation2 + $0x70] sm:$0xf] }
 0x1b3   : > { %13710 = vst [vmem:[#allocation31_spill] sm:$0xff] %v13709_v42  ;;  %v2001_v34 = vsel %vm11168_vm2, %v1485_v18, 0  ;;  %v13716_v50 = vsel %vm9953_vm10, %v9985_v20, %v13715_v10  ;;  %v7981_v19 = vpack.c.bf16 %v815_v60, %v815_v60  ;;  %v7723_v45 = vcombine.low %v1999_v58, %v2000_v30  ;;  %v13721_v58 = vld [vmem:[#allocation24_spill] sm:$0xff] }
 0x1b4   : > { %vm11279_vm7 = vcmp.ne.s16.totalorder %v13716_v50, 0  ;;  %8446 = vmatmul.mubr.bf16.gmra.mxu1 %v7699_v37  ;;  %v2521_v21 = vshrl.u32 %v7722_v24, 16  ;;  %v2524_v36 = vshll.u32 %v7722_v24, 16  ;;  %vm13719_vm0 = vsmask.f32 4352 }
 0x1b5   : > { %v2519_v18 = vsel %vm13719_vm0, %v2509_v54, %v2518_v7  ;;  %v8056_v47 = vpack.c.bf16 %v814_v17, %v813_v52  ;;  %v5352_v32 = vsel %vm11168_vm2, %v5319_v14, 0  ;;  %v2002_v10 = vsel %vm11185_vm6, %v1486_v8, 0  ;;  %v5320_v50 = vld [vmem:[#allocation2 + $0x74] sm:$0xf]  ;;  %975 = vst [vmem:[#allocation2 + $0x88] sm:$0xf] %v7981_v19 }
 0x1b6   : > { %v13720_v60 = vsel %vm9974_vm14, %v10697_v22, 0  ;;  %8489 = vmatprep.mubr.bf16.mxu0 %v2519_v18  ;;  %v2523_v24 = vrot.slane %v2521_v21, 3  ;;  %v2526_v54 = vrot.slane %v2524_v36, 4  ;;  %v7700_v17 = vcombine.low %v1486_v8, %v1487_v57  ;;  %v1488_v37 = vld [vmem:[#allocation2 + $0x6c] sm:$0xf] }
 0x1b7   : > { %v11297_v30 = vcombine.low %v13721_v58, %v13720_v60  ;;  %v1489_v52 = vld [vmem:[#allocation2 + $0x70] sm:$0xf]  ;;  %8072 = vst [vmem:[#allocation2 + $0x80] sm:$0xff] %v8056_v47   ;;  %v2003_v33 = vsel %vm11206_vm3, %v1487_v57, 0  ;;  %v7724_v48 = vcombine.low %v2001_v34, %v2002_v10  ;;  %v5353_v60 = vsel %vm11185_vm6, %v5320_v50, 0 }
 0x1b8   : > { %v11306_v58 = vld [vmem:[#allocation2 + $0x68] sm:$0xf]  ;;  %v2527_v19 = vor.u32 %v2526_v54, %v2523_v24  ;;  %8449 = vmatprep.mubr.bf16.mxu1 %v7700_v17  ;;  %v11308_v21 = vld [vmem:[#allocation2 + $0x6c] sm:$0xf]  ;;  %v11310_v8 = vcombine.low %v5352_v32, %v5353_v60  ;;  %v2530_v36 = vshrl.u32 %v7723_v45, 16  ;;  %v2533_v18 = vshll.u32 %v7723_v45, 16 }
 0x1b9   : > { %13722 = vst [vmem:[#allocation37_spill] sm:$0xff] %v11306_v58  ;;  %v11316_v34 = vld [vmem:[#allocation2 + $0x70] sm:$0xf]  ;;  %v2004_v47 = vsel %vm11232_vm12, %v1488_v37, 0  ;;  %v7701_v10 = vcombine.low %v1488_v37, %v1489_v52  ;;  %v11320_v50 = vld [vmem:[#allocation2 + $0x74] sm:$0xf]  ;;  %vm13750_vm3 = vnez %v13575_v49  ;;  %vm13756_vm12 = vnez %v13590_v53 }
 0x1ba   : > { %13723 = vst [vmem:[#allocation32_spill] sm:$0xff] %v11310_v8  ;;  %13724 = vst [vmem:[#allocation24_spill] sm:$0xff] %v11316_v34  ;;  %v13726_v32 = vld [vmem:[#allocation26_spill] sm:$0xff]  ;;  %v13728_v45 = vmov 0  ;;  %v13731_v17 = vsel %vm10551_vm1, %v10717_v46, 0  ;;  %v13732_v37 = vld [vmem:[#allocation64_spill] sm:$0xff]  ;;  %v7725_v13 = vcombine.low %v2003_v33, %v2004_v47 }
 0x1bb   : > { %13725 = vst [vmem:[#allocation105_spill] sm:$0xff] %v11320_v50  ;;  %v13727_v24 = vsel %vm10128_vm5, %v10114_v25, %v13726_v32  ;;  %v13733_v60 = vsel %vm10019_vm4, %v13732_v37, 0  ;;  %vm13734_vm10 = vsmask.f32 4352  ;;  %v2535_v57 = vrot.slane %v2533_v18, 4  ;;  %v13735_v18 = vld [vmem:[#allocation38_spill] sm:$0xff] }
 0x1bc   : > { %vm11327_vm0 = vcmp.ne.s16.totalorder %v13727_v24, 0  ;;  %v11343_v14 = vcombine.low %v13733_v60, %v13731_v17  ;;  %v2528_v32 = vsel %vm13734_vm10, %v2518_v7, %v2527_v19  ;;  %v2532_v24 = vrot.slane %v2530_v36, 3  ;;  %v1490_v8 = vld [vmem:[#allocation2 + $0x74] sm:$0xf]  ;;  %v1491_v51 = vld [vmem:[#allocation2 + $0x78] sm:$0xf]  ;;  %8450 = vmatmul.mubr.bf16.gmra.mxu1 %v7701_v10 }
 0x1bd   : > { %v13729_v45 = vsel %vm11327_vm0, 4294967295, %v13728_v45  ;;  %8490 = vmatmul.mubr.bf16.gmra.mxu0 %v2528_v32  ;;  %v2539_v59 = vshrl.u32 %v7724_v48, 16  ;;  %v2005_v17 = vsel %vm11253_vm9, %v1489_v52, 0  ;;  %v2542_v7 = vshll.u32 %v7724_v48, 16  ;;  %v1492_v32 = vld [vmem:[#allocation2 + $0x7c] sm:$0xf] }
 0x1be   : > { %13730 = vst [vmem:[#allocation26_spill] sm:$0xff] %v13729_v45  ;;  %v2536_v37 = vor.u32 %v2535_v57, %v2532_v24  ;;  %v2006_v36 = vsel %vm11262_vm13, %v1490_v8, 0  ;;  %v7702_v57 = vcombine.low %v1490_v8, %v1491_v51  ;;  %v13736_v48 = vld [vmem:[#allocation40_spill] sm:$0xff]  ;;  %v13738_v10 = vmov 0  ;;  %v11373_v54 = vld [vmem:[#allocation2 + $0x78] sm:$0xf] }
 0x1bf   : > { %v2541_v47 = vrot.slane %v2539_v59, 3  ;;  %v13737_v52 = vsel %vm10128_vm5, %v10114_v25, %v13736_v48  ;;  %13741 = vst [vmem:[#allocation106_spill] sm:$0xff] %v11373_v54  ;;  %v5323_v60 = vld [vmem:[#allocation2 + $0x80] sm:$0xf]  ;;  %v2544_v46 = vrot.slane %v2542_v7, 4  ;;  %v2007_v59 = vsel %vm11279_vm7, %v1491_v51, 0 }
 0x1c0   : > { %vm11368_vm4 = vcmp.ne.s16.totalorder %v13737_v52, 0  ;;  %v2537_v24 = vsel %vm13734_vm10, %v2527_v19, %v2536_v37  ;;  %v13742_v8 = vld [vmem:[#allocation45_spill] sm:$0xff]  ;;  %v13743_v33 = vld [vmem:[#allocation42_spill] sm:$0xff]  ;;  %v13745_v52 = vmov 0  ;;  %vm13748_vm10 = vnez %v13581_v35  ;;  %8453 = vmatprep.mubr.bf16.mxu1 %v7702_v57  ;;  %v11399_v27 = vld [vmem:[#allocation2 + $0x7c] sm:$0xf] }
 0x1c1   : > { %v13739_v10 = vsel %vm11368_vm4, 4294967295, %v13738_v10  ;;  %v13744_v48 = vsel %vm10128_vm5, %v10114_v25, %v13743_v33  ;;  %v13749_v19 = vsel %vm13748_vm10, %v10864_v63, 0  ;;  %v13751_v7 = vsel %vm13750_vm3, %v10851_v4, 0  ;;  %8493 = vmatprep.mubr.bf16.mxu0 %v2537_v24  ;;  %v1493_v49 = vld [vmem:[#allocation2 + $0x80] sm:$0xf]  ;;  %v13752_v35 = vld [vmem:[#allocation41_spill] sm:$0xff] }
 0x1c2   : > { %13740 = vst [vmem:[#allocation40_spill] sm:$0xff] %v13739_v10  ;;  %vm11383_vm14 = vcmp.ne.s16.totalorder %v13744_v48, 0  ;;  %v11395_v51 = vcombine.low %v13751_v7, %v13749_v19  ;;  %v5356_v22 = vsel %vm11253_vm9, %v5323_v60, 0  ;;  %v7726_v33 = vcombine.low %v2005_v17, %v2006_v36  ;;  %v5324_v48 = vld [vmem:[#allocation2 + $0x84] sm:$0xf]  ;;  %v13757_v17 = vld [vmem:[#allocation85_spill] sm:$0xff] }
 0x1c3   : > { %v13746_v52 = vsel %vm11383_vm14, 4294967295, %v13745_v52  ;;  %v2548_v34 = vshrl.u32 %v7725_v13, 16  ;;  %v2551_v1 = vshll.u32 %v7725_v13, 16  ;;  %v2545_v50 = vor.u32 %v2544_v46, %v2541_v47  ;;  %v2811_v19 = vld [vmem:[#allocation2 + $0x10] sm:$0xf] }
 0x1c4   : > { %13747 = vst [vmem:[#allocation42_spill] sm:$0xff] %v13746_v52  ;;  %v5357_v63 = vsel %vm11262_vm13, %v5324_v48, 0  ;;  %vm13753_vm1 = vnez %v13752_v35  ;;  %vm13754_vm10 = vnez %v13594_v31  ;;  %v13758_v36 = vsel %vm13756_vm12, %v13757_v17, 0  ;;  %v2815_v54 = vld [vmem:[#allocation2 + $0x20] sm:$0xf] }
 0x1c5   : > { %v2008_v4 = vsel %vm13753_vm1, %v1492_v32, 0  ;;  %v13755_v60 = vsel %vm13754_vm10, %v10952_v41, 0  ;;  %v11415_v46 = vcombine.low %v5356_v22, %v5357_v63  ;;  %v2550_v47 = vrot.slane %v2548_v34, 3  ;;  %v13762_v63 = vld [vmem:[#allocation46_spill] sm:$0xff]  ;;  %v2813_v22 = vld [vmem:[#allocation2 + $0x18] sm:$0xf] }
 0x1c6   : > { %v11413_v13 = vcombine.low %v13758_v36, %v13755_v60  ;;  %v2553_v57 = vrot.slane %v2551_v1, 4  ;;  %vm13760_vm2 = vcmp.ne.s16.totalorder %v9985_v20, 0  ;;  %vm13761_vm6 = vsmask.f32 4352  ;;  %v2812_v36 = vld [vmem:[#allocation2 + $0x14] sm:$0xf] }
 0x1c7   : > { %13759 = vst [vmem:[#allocation85_spill] sm:$0xff] %v11415_v46  ;;  %v2009_v24 = vsel %vm13760_vm2, %v1493_v49, 0  ;;  %v2546_v7 = vsel %vm13761_vm6, %v2536_v37, %v2545_v50  ;;  %v7703_v48 = vcombine.low %v1492_v32, %v1493_v49  ;;  %v7727_v31 = vcombine.low %v2007_v59, %v2008_v4  ;;  %v13763_v37 = vld [vmem:[#allocation43_spill] sm:$0xff]  ;;  %v13980_v35 = vld [vmem:[#allocation52_spill] sm:$0xff] }
 0x1c8   : > { %v7728_v58 = vcombine.low %v2009_v24, %v2009_v24  ;;  %8494 = vmatmul.mubr.bf16.gmra.mxu0 %v2546_v7  ;;  %v2554_v34 = vor.u32 %v2553_v57, %v2550_v47  ;;  %v2557_v1 = vshrl.u32 %v7726_v33, 16  ;;  %v13764_v49 = vsel %vm10128_vm5, %v10114_v25, %v13763_v37  ;;  %v13769_v24 = vld [vmem:[#allocation73_spill] sm:$0xff]  ;;  %v2814_v37 = vld [vmem:[#allocation2 + $0x1c] sm:$0xf] }
 0x1c9   : > { %vm11432_vm6 = vcmp.ne.s16.totalorder %v13764_v49, 0  ;;  %v13765_v32 = vmov 0  ;;  %8454 = vmatmul.mubr.bf16.gmra.mxu1 %v7703_v48  ;;  %v2560_v60 = vshll.u32 %v7726_v33, 16  ;;  %v3295_v17 = vsel %vm11327_vm0, %v2811_v19, 0  ;;  %v11913_v55 = vld [vmem:[#allocation2 + $0x7c] sm:$0xf] }
 0x1ca   : > { %v13766_v32 = vsel %vm11432_vm6, 4294967295, %v13765_v32  ;;  %v2575_v59 = vshrl.u32 %v7728_v58, 16  ;;  %v2578_v4 = vshll.u32 %v7728_v58, 16  ;;  %vm13768_vm2 = vsmask.f32 4352  ;;  %v13770_v58 = vld [vmem:[#allocation49_spill] sm:$0xff] }
 0x1cb   : > { %13767 = vst [vmem:[#allocation43_spill] sm:$0xff] %v13766_v32  ;;  %v2555_v47 = vsel %vm13768_vm2, %v2545_v50, %v2554_v34  ;;  %v2559_v57 = vrot.slane %v2557_v1, 3  ;;  %v7738_v7 = vcombine.low %v13769_v24, %v3295_v17  ;;  %v2566_v41 = vshrl.u32 %v7727_v31, 16  ;;  %v13772_v1 = vld [vmem:[#allocation47_spill] sm:$0xff] }
 0x1cc   : > { %8497 = vmatprep.mubr.bf16.mxu0 %v2555_v47  ;;  %v2562_v49 = vrot.slane %v2560_v60, 4  ;;  %v2569_v46 = vshll.u32 %v7727_v31, 16  ;;  %v2577_v53 = vrot.slane %v2575_v59, 3  ;;  %v2580_v48 = vrot.slane %v2578_v4, 4  ;;  %v13796_v32 = vld [vmem:[#allocation75_spill] sm:$0xff] }
 0x1cd   : > { %v3433_v33 = vshll.u32 %v7738_v7, 16  ;;  %v3437_v45 = vshrl.u32 %v7738_v7, 16  ;;  %v2568_v19 = vrot.slane %v2566_v41, 3  ;;  %vm13771_vm12 = vcmp.ne.s16.totalorder %v13735_v18, 0  ;;  %v13778_v18 = vld [vmem:[#allocation50_spill] sm:$0xff] }
 0x1ce   : > { %v3296_v50 = vsel %vm13771_vm12, %v2812_v36, 0  ;;  %v13773_v17 = vsel %vm10128_vm5, %v10114_v25, %v13772_v1  ;;  %v13774_v47 = vmov 0  ;;  %v2563_v31 = vor.u32 %v2562_v49, %v2559_v57 }
 0x1cf   : > { %vm11448_vm2 = vcmp.ne.s16.totalorder %v13773_v17, 0  ;;  %v2571_v59 = vrot.slane %v2569_v46, 4  ;;  %v2581_v4 = vor.u32 %v2580_v48, %v2577_v53  ;;  %v3297_v60 = vsel %vm11368_vm4, %v2813_v22, 0  ;;  %v13780_v53 = vld [vmem:[#allocation48_spill] sm:$0xff] }
 0x1d0   : > { %v13775_v47 = vsel %vm11448_vm2, 4294967295, %v13774_v47  ;;  %v3435_v24 = vrot.slane %v3433_v33, 1  ;;  %v7739_v41 = vcombine.low %v3296_v50, %v3297_v60  ;;  %vm13777_vm3 = vcmp.ne.s16.totalorder %v13742_v8, 0  ;;  %v2816_v33 = vld [vmem:[#allocation2 + $0x24] sm:$0xf] }
 0x1d1   : > { %13776 = vst [vmem:[#allocation73_spill] sm:$0xff] %v13775_v47  ;;  %v3298_v36 = vsel %vm13777_vm3, %v2814_v37, 0  ;;  %v3299_v7 = vsel %vm11383_vm14, %v2815_v54, 0  ;;  %vm13779_vm10 = vsmask.f32 4352  ;;  %v2572_v17 = vor.u32 %v2571_v59, %v2568_v19  ;;  %v13785_v37 = vld [vmem:[#allocation44_spill] sm:$0xff] }
 0x1d2   : > { %v2564_v1 = vsel %vm13779_vm10, %v2554_v34, %v2563_v31  ;;  %v7740_v42 = vcombine.low %v3298_v36, %v3299_v7  ;;  %v3980_v46 = vshrl.u32 %v11297_v30, 16  ;;  %v13781_v22 = vsel %vm10128_vm5, %v10114_v25, %v13780_v53  ;;  %v2817_v19 = vld [vmem:[#allocation2 + $0x28] sm:$0xf]  ;;  %vm13787_vm12 = vmmov %vm13779_vm10  ;;  %v13797_v8 = vld [vmem:[#allocation56_spill] sm:$0xff] }
 0x1d3   : > { %vm11466_vm4 = vcmp.ne.s16.totalorder %v13781_v22, 0  ;;  %v13782_v57 = vmov 0  ;;  %8498 = vmatmul.mubr.bf16.gmra.mxu0 %v2564_v1  ;;  %vm13786_vm3 = vsmask.f32 7424  ;;  %v3439_v49 = vor.u32 %v3437_v45, %v3435_v24  ;;  %v9116_v45 = vld [vmem:[#allocation9 + $0x130] sm:$0xff]  }
 0x1d4   : > { %v13783_v57 = vsel %vm11466_vm4, 4294967295, %v13782_v57  ;;  %v3436_v54 = vsel %vm13786_vm3, %v13785_v37, %v3435_v24  ;;  %v3441_v48 = vshll.u32 %v7739_v41, 16  ;;  %v3445_v34 = vshrl.u32 %v7739_v41, 16  ;;  %v13788_v24 = vld [vmem:[#allocation54_spill] sm:$0xff] }
 0x1d5   : > { %13784 = vst [vmem:[#allocation47_spill] sm:$0xff] %v13783_v57  ;;  %8521 = vmatprep.mubr.bf16.mxu1 %v3436_v54  ;;  %v2573_v50 = vsel %vm13779_vm10, %v2563_v31, %v2572_v17  ;;  %v2582_v59 = vsel %vm13787_vm12, %v2572_v17, %v2581_v4  ;;  %v3449_v60 = vshll.u32 %v7740_v42, 16  ;;  %v3982_v36 = vrot.slane %v3980_v46, 3  ;;  %v2818_v17 = vld [vmem:[#allocation2 + $0x2c] sm:$0xf]  ;;  %vm13795_vm10 = vmmov %vm13786_vm3 }
 0x1d6   : > { %8501 = vmatprep.mubr.bf16.mxu0 %v2573_v50  ;;  %v3443_v7 = vrot.slane %v3441_v48, 1  ;;  %v3983_v53 = vshll.u32 %v11297_v30, 16  ;;  %v3988_v1 = vshrl.u32 %v11343_v14, 16  ;;  %v3991_v22 = vshll.u32 %v11343_v14, 16  ;;  %v13790_v30 = vld [vmem:[#allocation51_spill] sm:$0xff] }
 0x1d7   : > { %v3451_v41 = vrot.slane %v3449_v60, 1  ;;  %vm13789_vm14 = vcmp.ne.s16.totalorder %v13762_v63, 0  ;;  %v3301_v31 = vsel %vm11432_vm6, %v2817_v19, 0  ;;  %v3453_v4 = vshrl.u32 %v7740_v42, 16 }
 0x1d8   : > { %v3300_v37 = vsel %vm13789_vm14, %v2816_v33, 0  ;;  %v13791_v46 = vsel %vm10128_vm5, %v10114_v25, %v13790_v30  ;;  %v13792_v54 = vmov 0  ;;  %v3444_v14 = vsel %vm13795_vm10, %v3439_v49, %v3443_v7  ;;  %v2819_v33 = vld [vmem:[#allocation2 + $0x30] sm:$0xf]  ;;  %v13798_v30 = vld [vmem:[#allocation53_spill] sm:$0xff] }
 0x1d9   : > { %vm11487_vm12 = vcmp.ne.s16.totalorder %v13791_v46, 0  ;;  %v3447_v48 = vor.u32 %v3445_v34, %v3443_v7  ;;  %v3985_v50 = vrot.slane %v3983_v53, 4  ;;  %v3990_v60 = vrot.slane %v3988_v1, 3  ;;  %8522 = vmatmul.mubr.bf16.vlgmr.msra.gmra.mxu1 %v3444_v14  ;;  %v2820_v1 = vld [vmem:[#allocation2 + $0x34] sm:$0xf]  ;;  %v9117_v14 = vld [vmem:[#allocation9 + $0x128] sm:$0xff]  }
 0x1da   : > { %v13793_v54 = vsel %vm11487_vm12, 4294967295, %v13792_v54  ;;  %v3993_v63 = vrot.slane %v3991_v22, 4  ;;  %v7741_v19 = vcombine.low %v3300_v37, %v3301_v31  ;;  %v3455_v42 = vor.u32 %v3453_v4, %v3451_v41  ;;  %8602 = vmatpush3.bf16.msra.mxu1 %v11074_v3 }
 0x1db   : > { %13794 = vst [vmem:[#allocation48_spill] sm:$0xff] %v13793_v54  ;;  %v3997_v52 = vshrl.u32 %v13796_v32, 16  ;;  %v13799_v46 = vsel %vm10128_vm5, %v10114_v25, %v13798_v30  ;;  %v13800_v10 = vmov 0  ;;  %v3452_v49 = vsel %vm13795_vm10, %v3447_v48, %v3451_v41  ;;  %8603 = vmatprep.subr.bf16.mxu1 %v9116_v45  ;;  %v2821_v30 = vld [vmem:[#allocation2 + $0x38] sm:$0xf]  ;;  %8502 = vmatmul.mubr.bf16.gmra.mxu0 %v2582_v59 }
 0x1dc   : > { %vm11499_vm3 = vcmp.ne.s16.totalorder %v13799_v46, 0  ;;  %v3986_v34 = vor.u32 %v3985_v50, %v3982_v36  ;;  %v4000_v7 = vshll.u32 %v13796_v32, 16  ;;  %vm13803_vm6 = vcmp.ne.s16.totalorder %v13770_v58, 0  ;;  %8525 = vmatprep.mubr.bf16.mxu1 %v3452_v49 }
 0x1dd   : > { %v13801_v10 = vsel %vm11499_vm3, 4294967295, %v13800_v10  ;;  %v3302_v53 = vsel %vm13803_vm6, %v2818_v17, 0  ;;  %v3994_v22 = vor.u32 %v3993_v63, %v3990_v60  ;;  %v3457_v37 = vshll.u32 %v7741_v19, 16  ;;  %v13807_v60 = vld [vmem:[#allocation55_spill] sm:$0xff] }
 0x1de   : > { %13802 = vst [vmem:[#allocation44_spill] sm:$0xff] %v13801_v10  ;;  %v3999_v31 = vrot.slane %v3997_v52, 3  ;;  %v3303_v4 = vsel %vm11448_vm2, %v2819_v33, 0  ;;  %v4002_v3 = vrot.slane %v4000_v7, 4  ;;  %v3461_v36 = vshrl.u32 %v7741_v19, 16  ;;  %v13806_v52 = vld [vmem:[#allocation58_spill] sm:$0xff]  ;;  %8604 = vmatpush3.bf16.msra.mxu1 %v9116_v45 }
 0x1df   : > { %v7742_v41 = vcombine.low %v3302_v53, %v3303_v4  ;;  %v4006_v32 = vshrl.u32 %v11395_v51, 16  ;;  %vm13804_vm10 = vsmask.f32 4352  ;;  %v3459_v17 = vrot.slane %v3457_v37, 1  ;;  %8605 = vmatprep.subr.bf16.mxu1 %v9117_v14  ;;  %v2823_v4 = vld [vmem:[#allocation2 + $0x40] sm:$0xf] }
 0x1e0   : > { %v3995_v48 = vsel %vm13804_vm10, %v3986_v34, %v3994_v22  ;;  %v4009_v50 = vshll.u32 %v11395_v51, 16  ;;  %vm13805_vm6 = vcmp.ne.s16.totalorder %v13778_v18, 0  ;;  %v13808_v59 = vsel %vm10128_vm5, %v10114_v25, %v13807_v60  ;;  %v2822_v34 = vld [vmem:[#allocation2 + $0x3c] sm:$0xf]  ;;  %v9118_v60 = vld [vmem:[#allocation9 + $0x120] sm:$0xff]   ;;  %v13859_v10 = vld [vmem:[#allocation94_spill] sm:$0xff] }
 0x1e1   : > { %v3304_v63 = vsel %vm13805_vm6, %v2820_v1, 0  ;;  %vm11521_vm2 = vcmp.ne.s16.totalorder %v13808_v59, 0  ;;  %v13809_v33 = vmov 0  ;;  %8569 = vmatprep.mubr.bf16.mxu0 %v3995_v48  ;;  %v4003_v19 = vor.u32 %v4002_v3, %v3999_v31  ;;  %v2824_v31 = vld [vmem:[#allocation2 + $0x44] sm:$0xf] }
 0x1e2   : > { %v13810_v33 = vsel %vm11521_vm2, 4294967295, %v13809_v33  ;;  %v3465_v46 = vshll.u32 %v7742_v41, 16  ;;  %v4008_v49 = vrot.slane %v4006_v32, 3  ;;  %v3305_v51 = vsel %vm11466_vm4, %v2821_v30, 0  ;;  %8606 = vmatpush3.bf16.msra.mxu1 %v9117_v14  ;;  %v9119_v14 = vld [vmem:[#allocation9 + $0x118] sm:$0xff]  }
 0x1e3   : > { %13811 = vst [vmem:[#allocation51_spill] sm:$0xff] %v13810_v33  ;;  %vm13812_vm10 = vsmask.f32 7424  ;;  %v3463_v53 = vor.u32 %v3461_v36, %v3459_v17  ;;  %v4011_v1 = vrot.slane %v4009_v50, 4  ;;  %v7743_v37 = vcombine.low %v3304_v63, %v3305_v51  ;;  %v2825_v36 = vld [vmem:[#allocation2 + $0x48] sm:$0xf]  ;;  %8607 = vmatprep.subr.bf16.mxu1 %v9118_v60 }
 0x1e4   : > { %v3460_v7 = vsel %vm13812_vm10, %v3455_v42, %v3459_v17  ;;  %vm13813_vm6 = vsmask.f32 4352  ;;  %v3467_v18 = vrot.slane %v3465_v46, 1  ;;  %v3469_v48 = vshrl.u32 %v7742_v41, 16  ;;  %v13815_v17 = vld [vmem:[#allocation59_spill] sm:$0xff]  ;;  %v13817_v46 = vld [vmem:[#allocation57_spill] sm:$0xff] }
 0x1e5   : > { %v4004_v59 = vsel %vm13813_vm6, %v3994_v22, %v4003_v19  ;;  %v4015_v45 = vshrl.u32 %v11413_v13, 16  ;;  %8526 = vmatmul.mubr.bf16.gmra.mxu1 %v3460_v7  ;;  %v4012_v3 = vor.u32 %v4011_v1, %v4008_v49  ;;  %v3473_v32 = vshll.u32 %v7743_v37, 16  ;;  %v9122_v51 = vld [vmem:[#allocation9 + $0x170] sm:$0xff]  }
 0x1e6   : > { %v4018_v30 = vshll.u32 %v11413_v13, 16  ;;  %vm13814_vm10 = vcmp.ne.s16.totalorder %v13788_v24, 0  ;;  %vm13816_vm4 = vsmask.f32 7424  ;;  %v3471_v63 = vor.u32 %v3469_v48, %v3467_v18  ;;  %8570 = vmatmul.mubr.bf16.vlgmr.msra.gmra.mxu0 %v4004_v59  ;;  %v13826_v48 = vld [vmem:[#allocation91_spill] sm:$0xff]  ;;  %v13829_v59 = vld [vmem:[#allocation66_spill] sm:$0xff]  ;;  %8608 = vmatpush3.bf16.msra.mxu1 %v9118_v60 }
 0x1e7   : > { %v3306_v42 = vsel %vm13814_vm10, %v2822_v34, 0  ;;  %v3468_v50 = vsel %vm13816_vm4, %v3463_v53, %v3467_v18  ;;  %v4017_v22 = vrot.slane %v4015_v45, 3  ;;  %v3307_v41 = vsel %vm11487_vm12, %v2823_v4, 0  ;;  %8650 = vmatpush3.bf16.msra.mxu0 %v11210_v5  ;;  %8609 = vmatprep.subr.bf16.mxu1 %v9119_v14  ;;  %v13863_v24 = vld [vmem:[#allocation93_spill] sm:$0xff] }
 0x1e8   : > { %v13818_v49 = vsel %vm10128_vm5, %v10114_v25, %v13817_v46  ;;  %v13819_v13 = vmov 0  ;;  %8529 = vmatprep.mubr.bf16.mxu1 %v3468_v50  ;;  %vm13822_vm10 = vsmask.f32 4352  ;;  %v3475_v7 = vrot.slane %v3473_v32, 1  ;;  %8651 = vmatprep.subr.bf16.mxu0 %v9122_v51 }
 0x1e9   : > { %vm11542_vm6 = vcmp.ne.s16.totalorder %v13818_v49, 0  ;;  %v4013_v34 = vsel %vm13822_vm10, %v4003_v19, %v4012_v3  ;;  %v4020_v18 = vrot.slane %v4018_v30, 4  ;;  %v7744_v53 = vcombine.low %v3306_v42, %v3307_v41  ;;  %v2826_v49 = vld [vmem:[#allocation2 + $0x4c] sm:$0xf] }
 0x1ea   : > { %v13820_v13 = vsel %vm11542_vm6, 4294967295, %v13819_v13  ;;  %v3477_v1 = vshrl.u32 %v7743_v37, 16  ;;  %vm13823_vm4 = vnez %v13605_v39  ;;  %vm13825_vm14 = vnez %v13601_v40  ;;  %8573 = vmatprep.mubr.bf16.mxu0 %v4013_v34  ;;  %v2828_v39 = vld [vmem:[#allocation2 + $0x54] sm:$0xf]  ;;  %8610 = vmatpush3.bf16.msra.mxu1 %v9119_v14  ;;  %v13855_v14 = vld [vmem:[#allocation101_spill] sm:$0xff] }
 0x1eb   : > { %13821 = vst [vmem:[#allocation75_spill] sm:$0xff] %v13820_v13  ;;  %v13824_v4 = vsel %vm13823_vm4, %v11003_v6, 0  ;;  %v13827_v45 = vsel %vm13825_vm14, %v13826_v48, 0  ;;  %vm13828_vm12 = vcmp.ne.s16.totalorder %v13797_v8, 0  ;;  %v3309_v19 = vsel %vm11499_vm3, %v2825_v36, 0  ;;  %8652 = vmatpush3.bf16.msra.mxu0 %v9122_v51  ;;  %v9125_v51 = vld [vmem:[#allocation9 + $0x160] sm:$0xff]  }
 0x1ec   : > { %v7767_v46 = vcombine.low %v13827_v45, %v13824_v4  ;;  %v3308_v50 = vsel %vm13828_vm12, %v2824_v31, 0  ;;  %v13830_v37 = vsel %vm10128_vm5, %v10114_v25, %v13829_v59  ;;  %v13831_v32 = vmov 0  ;;  %v2827_v31 = vld [vmem:[#allocation2 + $0x50] sm:$0xf]  ;;  %v13835_v4 = vld [vmem:[#allocation60_spill] sm:$0xff] }
 0x1ed   : > { %vm11564_vm10 = vcmp.ne.s16.totalorder %v13830_v37, 0  ;;  %vm13834_vm4 = vsmask.f32 7424  ;;  %v4021_v30 = vor.u32 %v4020_v18, %v4017_v22  ;;  %v3481_v42 = vshll.u32 %v7744_v53, 16  ;;  %v11571_v37 = vld [vmem:[#allocation2 + $0x80] sm:$0xf] }
 0x1ee   : > { %v13832_v32 = vsel %vm11564_vm10, 4294967295, %v13831_v32  ;;  %v3476_v6 = vsel %vm13834_vm4, %v3471_v63, %v3475_v7  ;;  %v7745_v41 = vcombine.low %v3308_v50, %v3309_v19  ;;  %v3479_v36 = vor.u32 %v3477_v1, %v3475_v7  ;;  %v13839_v50 = vld [vmem:[#allocation96_spill] sm:$0xff]  ;;  %v9120_v1 = vld [vmem:[#allocation9 + $0x110] sm:$0xff]  }
 0x1ef   : > { %13833 = vst [vmem:[#allocation53_spill] sm:$0xff] %v13832_v32  ;;  %v4024_v48 = vshrl.u32 %v7767_v46, 16  ;;  %v4027_v45 = vshll.u32 %v7767_v46, 16  ;;  %v3485_v59 = vshrl.u32 %v7744_v53, 16  ;;  %vm13836_vm14 = vsmask.f32 4352  ;;  %8530 = vmatmul.mubr.bf16.gmra.mxu1 %v3476_v6  ;;  %8611 = vmatprep.subr.bf16.mxu1 %v9120_v1 }
 0x1f0   : > { %v4022_v34 = vsel %vm13836_vm14, %v4012_v3, %v4021_v30  ;;  %v3483_v63 = vrot.slane %v3481_v42, 1  ;;  %v3489_v22 = vshll.u32 %v7745_v41, 16  ;;  %v13837_v18 = vsel %vm10876_vm15, %v11056_v61, 0  ;;  %v9124_v53 = vld [vmem:[#allocation9 + $0x168] sm:$0xff]   ;;  %v13844_v6 = vld [vmem:[#allocation87_spill] sm:$0xff]  ;;  %8612 = vmatpush3.bf16.msra.mxu1 %v9120_v1  ;;  %v13873_v32 = vld [vmem:[#allocation98_spill] sm:$0xff] }
 0x1f1   : > { %vm13838_vm4 = vnez %v13614_v11  ;;  %v4026_v60 = vrot.slane %v4024_v48, 3  ;;  %v4029_v46 = vrot.slane %v4027_v45, 4  ;;  %vm13841_vm12 = vcmp.ne.s16.totalorder %v13806_v52, 0  ;;  %8653 = vmatprep.subr.bf16.mxu0 %v9124_v53  ;;  %8574 = vmatmul.mubr.bf16.gmra.mxu0 %v4022_v34 }
 0x1f2   : > { %v13840_v5 = vsel %vm13838_vm4, %v13839_v50, 0  ;;  %v3310_v19 = vsel %vm13841_vm12, %v2826_v49, 0  ;;  %v3311_v3 = vsel %vm11521_vm2, %v2827_v31, 0  ;;  %vm13842_vm14 = vsmask.f32 7424  ;;  %v13843_v50 = vld [vmem:[#allocation84_spill] sm:$0xff]  ;;  %8654 = vmatpush3.bf16.msra.mxu0 %v9124_v53 }
 0x1f3   : > { %v7768_v7 = vcombine.low %v13840_v5, %v13837_v18  ;;  %v3484_v42 = vsel %vm13842_vm14, %v3479_v36, %v3483_v63  ;;  %v3487_v61 = vor.u32 %v3485_v59, %v3483_v63  ;;  %v3491_v40 = vrot.slane %v3489_v22, 1  ;;  %v2829_v5 = vld [vmem:[#allocation2 + $0x58] sm:$0xf]  ;;  %8655 = vmatprep.subr.bf16.mxu0 %v9125_v51 }
 0x1f4   : > { %8533 = vmatprep.mubr.bf16.mxu1 %v3484_v42  ;;  %v4030_v45 = vor.u32 %v4029_v46, %v4026_v60  ;;  %v7746_v18 = vcombine.low %v3310_v19, %v3311_v3  ;;  %v13845_v31 = vsel %vm10128_vm5, %v10114_v25, %v13844_v6  ;;  %v13846_v36 = vmov 0  ;;  %v13849_v42 = vld [vmem:[#allocation90_spill] sm:$0xff]  ;;  %v13853_v46 = vld [vmem:[#allocation89_spill] sm:$0xff] }
 0x1f5   : > { %v4033_v11 = vshrl.u32 %v7768_v7, 16  ;;  %v4036_v49 = vshll.u32 %v7768_v7, 16  ;;  %vm11596_vm12 = vcmp.ne.s16.totalorder %v13845_v31, 0  ;;  %v3492_v59 = vsel %vm13842_vm14, %v3487_v61, %v3491_v40  ;;  %v13851_v7 = vld [vmem:[#allocation102_spill] sm:$0xff]  ;;  %v9123_v6 = vld [vmem:[#allocation9 + $0x108] sm:$0xff]  }
 0x1f6   : > { %v13847_v36 = vsel %vm11596_vm12, 4294967295, %v13846_v36  ;;  %v3493_v22 = vshrl.u32 %v7745_v41, 16  ;;  %vm13850_vm4 = vnez %v13849_v42  ;;  %vm13854_vm2 = vnez %v13853_v46  ;;  %v2831_v41 = vld [vmem:[#allocation2 + $0x60] sm:$0xf]  ;;  %8613 = vmatprep.subr.bf16.mxu1 %v9123_v6  ;;  %8656 = vmatpush3.bf16.msra.mxu0 %v9125_v51 }
 0x1f7   : > { %13848 = vst [vmem:[#allocation55_spill] sm:$0xff] %v13847_v36  ;;  %v4035_v63 = vrot.slane %v4033_v11, 3  ;;  %v13852_v60 = vsel %vm13850_vm4, %v13851_v7, 0  ;;  %v13856_v19 = vsel %vm13854_vm2, %v13855_v14, 0  ;;  %vm13857_vm3 = vsmask.f32 4352  ;;  %8534 = vmatmul.mubr.bf16.gmra.mxu1 %v3492_v59 }
 0x1f8   : > { %v7769_v3 = vcombine.low %v13856_v19, %v13852_v60  ;;  %v4031_v31 = vsel %vm13857_vm3, %v4021_v30, %v4030_v45  ;;  %v4038_v48 = vrot.slane %v4036_v49, 4  ;;  %v3497_v52 = vshll.u32 %v7746_v18, 16  ;;  %v2830_v60 = vld [vmem:[#allocation2 + $0x5c] sm:$0xf]  ;;  %v13875_v59 = vld [vmem:[#allocation104_spill] sm:$0xff]  ;;  %8614 = vmatpush3.bf16.msra.mxu1 %v9123_v6 }
 0x1f9   : > { %vm13858_vm14 = vcmp.ne.s16.totalorder %v13815_v17, 0  ;;  %8577 = vmatprep.mubr.bf16.mxu0 %v4031_v31  ;;  %v3495_v61 = vor.u32 %v3493_v22, %v3491_v40  ;;  %v3313_v14 = vsel %vm11542_vm6, %v2829_v5, 0  ;;  %vm13860_vm3 = vnez %v13859_v10  ;;  %v13861_v30 = vld [vmem:[#allocation103_spill] sm:$0xff]  ;;  %v9126_v40 = vld [vmem:[#allocation9 + $0x100] sm:$0xff]  }
 0x1fa   : > { %v3312_v11 = vsel %vm13858_vm14, %v2828_v39, 0  ;;  %v4042_v7 = vshrl.u32 %v7769_v3, 16  ;;  %v4045_v33 = vshll.u32 %v7769_v3, 16  ;;  %v4039_v19 = vor.u32 %v4038_v48, %v4035_v63  ;;  %v13865_v39 = vld [vmem:[#allocation33_spill] sm:$0xff]  ;;  %v9127_v22 = vld [vmem:[#allocation9 + $0x158] sm:$0xff]   ;;  %8615 = vmatprep.subr.bf16.mxu1 %v9126_v40 }
 0x1fb   : > { %v3499_v8 = vrot.slane %v3497_v52, 1  ;;  %v7747_v34 = vcombine.low %v3312_v11, %v3313_v14  ;;  %v13862_v49 = vsel %vm13860_vm3, %v13861_v30, 0  ;;  %vm13864_vm4 = vnez %v13863_v24  ;;  %v11622_v3 = vld [vmem:[#allocation2 + $0x84] sm:$0xf]  ;;  %8657 = vmatprep.subr.bf16.mxu0 %v9127_v22  ;;  %13996 = vst [vmem:[#allocation33_spill] sm:$0xff] %v11913_v55 }
 0x1fc   : > { %v13866_v17 = vsel %vm13864_vm4, %v13865_v39, 0  ;;  %v4044_v5 = vrot.slane %v4042_v7, 3  ;;  %v4047_v53 = vrot.slane %v4045_v33, 4  ;;  %v3501_v48 = vshrl.u32 %v7746_v18, 16  ;;  %v2832_v7 = vld [vmem:[#allocation2 + $0x64] sm:$0xf]  ;;  %8658 = vmatpush3.bf16.msra.mxu0 %v9127_v22  ;;  %8616 = vmatpush3.bf16.msra.mxu1 %v9126_v40 }
 0x1fd   : > { %v7770_v31 = vcombine.low %v13866_v17, %v13862_v49  ;;  %v3315_v52 = vsel %vm11564_vm10, %v2831_v41, 0  ;;  %vm13867_vm14 = vsmask.f32 4352  ;;  %vm13868_vm6 = vsmask.f32 7424  ;;  %v13871_v41 = vld [vmem:[#allocation29_spill] sm:$0xff] }
 0x1fe   : > { %v4040_v63 = vsel %vm13867_vm14, %v4030_v45, %v4039_v19  ;;  %v3500_v11 = vsel %vm13868_vm6, %v3495_v61, %v3499_v8  ;;  %v3505_v14 = vshll.u32 %v7747_v34, 16  ;;  %vm13869_vm3 = vcmp.ne.s16.totalorder %v13835_v4, 0  ;;  %v2834_v22 = vld [vmem:[#allocation2 + $0x6c] sm:$0xf]  ;;  %v4764_v55 = vld [vmem:[#allocation2 + $0x68] sm:$0xf] }
 0x1ff   : > { %v3314_v17 = vsel %vm13869_vm3, %v2830_v60, 0  ;;  %v4048_v1 = vor.u32 %v4047_v53, %v4044_v5  ;;  %v4051_v30 = vshrl.u32 %v7770_v31, 16  ;;  %v4054_v49 = vshll.u32 %v7770_v31, 16  ;;  %8537 = vmatprep.mubr.bf16.mxu1 %v3500_v11  ;;  %v2833_v31 = vld [vmem:[#allocation2 + $0x68] sm:$0xf]  ;;  %v9129_v53 = vld [vmem:[#allocation9 + $0x150] sm:$0xff]   ;;  %8578 = vmatmul.mubr.bf16.gmra.mxu0 %v4040_v63 }
 0x200   : > { %v7748_v39 = vcombine.low %v3314_v17, %v3315_v52  ;;  %v3878_v33 = vsel %vm13753_vm1, %v11622_v3, 0  ;;  %v3503_v18 = vor.u32 %v3501_v48, %v3499_v8  ;;  %v3507_v45 = vrot.slane %v3505_v14, 1  ;;  %v11641_v8 = vld [vmem:[#allocation9 + $0x1b8] sm:$0xff]   ;;  %8659 = vmatprep.subr.bf16.mxu0 %v9129_v53 }
 0x201   : > { %vm13870_vm6 = vnez %v13655_v15  ;;  %vm13874_vm3 = vnez %v13873_v32  ;;  %v4053_v51 = vrot.slane %v4051_v30, 3  ;;  %v4056_v52 = vrot.slane %v4054_v49, 4  ;;  %8697 = vmatprep.subr.bf16.mxu1 %v11641_v8  ;;  %8660 = vmatpush3.bf16.msra.mxu0 %v9129_v53 }
 0x202   : > { %v13872_v61 = vsel %vm13870_vm6, %v13871_v41, 0  ;;  %v13876_v60 = vsel %vm13874_vm3, %v13875_v59, 0  ;;  %v3509_v17 = vshrl.u32 %v7747_v34, 16  ;;  %v3513_v4 = vshll.u32 %v7748_v39, 16 }
 0x203   : > { %v7771_v5 = vcombine.low %v13876_v60, %v13872_v61  ;;  %v4049_v48 = vsel %vm13867_vm14, %v4039_v19, %v4048_v1  ;;  %vm13877_vm10 = vcmp.ne.s16.totalorder %v13843_v50, 0  ;;  %vm13878_vm6 = vsmask.f32 7424 }
 0x204   : > { %v3316_v41 = vsel %vm13877_vm10, %v2832_v7, 0  ;;  %8581 = vmatprep.mubr.bf16.mxu0 %v4049_v48  ;;  %v3508_v6 = vsel %vm13878_vm6, %v3503_v18, %v3507_v45  ;;  %v4057_v61 = vor.u32 %v4056_v52, %v4053_v51  ;;  %v3515_v30 = vrot.slane %v3513_v4, 1  ;;  %v9131_v18 = vld [vmem:[#allocation9 + $0x148] sm:$0xff]   ;;  %v13884_v51 = vld [vmem:[#allocation100_spill] sm:$0xff] }
 0x205   : > { %v4060_v11 = vshrl.u32 %v7771_v5, 16  ;;  %v4063_v14 = vshll.u32 %v7771_v5, 16  ;;  %v3317_v34 = vsel %vm11596_vm12, %v2833_v31, 0  ;;  %vm13879_vm3 = vnez %v13668_v29  ;;  %8538 = vmatmul.mubr.bf16.gmra.mxu1 %v3508_v6  ;;  %8661 = vmatprep.subr.bf16.mxu0 %v9131_v18 }
 0x206   : > { %v7749_v60 = vcombine.low %v3316_v41, %v3317_v34  ;;  %v13880_v19 = vsel %vm13879_vm3, %v11239_v12, 0  ;;  %vm13881_vm14 = vnez %v13662_v16  ;;  %vm13883_vm10 = vsmask.f32 4352  ;;  %v2835_v16 = vld [vmem:[#allocation2 + $0x70] sm:$0xf]  ;;  %8662 = vmatpush3.bf16.msra.mxu0 %v9131_v18 }
 0x207   : > { %v4062_v49 = vrot.slane %v4060_v11, 3  ;;  %v4065_v59 = vrot.slane %v4063_v14, 4  ;;  %v13882_v63 = vsel %vm13881_vm14, %v11217_v2, 0  ;;  %v4058_v4 = vsel %vm13883_vm10, %v4048_v1, %v4057_v61  ;;  %v11680_v34 = vld [vmem:[#allocation2 + $0x88] sm:$0xf] }
 0x208   : > { %v7772_v7 = vcombine.low %v13882_v63, %v13880_v19  ;;  %v3511_v5 = vor.u32 %v3509_v17, %v3507_v45  ;;  %v3517_v31 = vshrl.u32 %v7748_v39, 16  ;;  %vm13380_vm6 = vcmp.ne.s16.totalorder %v13884_v51, 0  ;;  %13892 = vst [vmem:[#allocation91_spill] sm:$0xff] %v11680_v34  ;;  %v13893_v19 = vld [vmem:[#allocation67_spill] sm:$0xff]  ;;  %8582 = vmatmul.mubr.bf16.gmra.mxu0 %v4058_v4 }
 0x209   : > { %v4066_v29 = vor.u32 %v4065_v59, %v4062_v49  ;;  %v3521_v52 = vshll.u32 %v7749_v60, 16  ;;  %vm13885_vm3 = vsmask.f32 7424  ;;  %v13886_v1 = vsel %vm10128_vm5, %v10114_v25, %v11192_v43 }
 0x20a   : > { %v4069_v12 = vshrl.u32 %v7772_v7, 16  ;;  %v4072_v48 = vshll.u32 %v7772_v7, 16  ;;  %v3516_v2 = vsel %vm13885_vm3, %v3511_v5, %v3515_v30  ;;  %v3519_v40 = vor.u32 %v3517_v31, %v3515_v30  ;;  %v9133_v30 = vld [vmem:[#allocation9 + $0x140] sm:$0xff]  }
 0x20b   : > { %vm11666_vm14 = vcmp.ne.s16.totalorder %v13886_v1, 0  ;;  %v13887_v39 = vmov 0  ;;  %v13890_v45 = vsel %vm11150_vm8, %v11286_v38, 0  ;;  %v13891_v17 = vsel %vm11120_vm11, %v11283_v62, 0  ;;  %8541 = vmatprep.mubr.bf16.mxu1 %v3516_v2  ;;  %8663 = vmatprep.subr.bf16.mxu0 %v9133_v30  ;;  %v11699_v1 = vld [vmem:[#allocation9 + $0x1f8] sm:$0xff]  }
 0x20c   : > { %v13888_v39 = vsel %vm11666_vm14, 4294967295, %v13887_v39  ;;  %v7773_v11 = vcombine.low %v13891_v17, %v13890_v45  ;;  %v3523_v14 = vrot.slane %v3521_v52, 1  ;;  %v4071_v41 = vrot.slane %v4069_v12, 3  ;;  %v13894_v52 = vld [vmem:[#allocation20_spill] sm:$0xff]  ;;  %8664 = vmatpush3.bf16.msra.mxu0 %v9133_v30 }
 0x20d   : > { %13889 = vst [vmem:[#allocation57_spill] sm:$0xff] %v13888_v39  ;;  %v4074_v6 = vrot.slane %v4072_v48, 4  ;;  %v3318_v43 = vsel %vm13380_vm6, %v2834_v22, 0  ;;  %v3319_v38 = vsel %vm11666_vm14, %v2835_v16, 0  ;;  %v3222_v62 = vrot.slane %v13893_v19, 4  ;;  %v13896_v48 = vld [vmem:[#allocation69_spill] sm:$0xff]  ;;  %8745 = vmatprep.subr.bf16.mxu0 %v11699_v1 }
 0x20e   : > { %v4078_v49 = vshrl.u32 %v7773_v11, 16  ;;  %v4081_v59 = vshll.u32 %v7773_v11, 16  ;;  %v4067_v53 = vsel %vm13883_vm10, %v4057_v61, %v4066_v29  ;;  %v7750_v7 = vcombine.low %v3318_v43, %v3319_v38  ;;  %v2836_v11 = vld [vmem:[#allocation2 + $0x74] sm:$0xf] }
 0x20f   : > { %v4075_v63 = vor.u32 %v4074_v6, %v4071_v41  ;;  %v3525_v5 = vshrl.u32 %v7749_v60, 16  ;;  %8585 = vmatprep.mubr.bf16.mxu0 %v4067_v53  ;;  %v11689_v12 = vsel %vm10128_vm5, %v3222_v62, %v13894_v52  ;;  %v3233_v16 = vshrl.u32 %v13896_v48, 16  ;;  %v13910_v62 = vld [vmem:[#allocation105_spill] sm:$0xff]  ;;  %v14113_v26 = vld [vmem:[#allocation91_spill] sm:$0xff] }
 0x210   : > { %v4080_v31 = vrot.slane %v4078_v49, 3  ;;  %v4083_v22 = vrot.slane %v4081_v59, 4  ;;  %13895 = vst [vmem:[#allocation66_spill] sm:$0xff] %v11689_v12  ;;  %vm13897_vm3 = vcmp.ne.s16.totalorder %v9985_v20, 0  ;;  %vm13898_vm10 = vsmask.f32 7424 }
 0x211   : > { %v11695_v4 = vsel %vm13897_vm3, %v11680_v34, 0  ;;  %v3524_v61 = vsel %vm13898_vm10, %v3519_v40, %v3523_v14  ;;  %v3529_v2 = vshll.u32 %v7750_v7, 16  ;;  %v3236_v60 = vshll.u32 %v13896_v48, 16  ;;  %v13902_v40 = vld [vmem:[#allocation37_spill] sm:$0xff] }
 0x212   : > { %v3527_v45 = vor.u32 %v3525_v5, %v3523_v14  ;;  %v4084_v17 = vor.u32 %v4083_v22, %v4080_v31  ;;  %v3235_v41 = vrot.slane %v3233_v16, 7  ;;  %vm13899_vm14 = vnez %v13690_v9  ;;  %v13904_v49 = vld [vmem:[#allocation61_spill] sm:$0xff]  ;;  %v13908_v14 = vld [vmem:[#allocation30_spill] sm:$0xff]  ;;  %v13912_v5 = vld [vmem:[#allocation35_spill] sm:$0xff]  ;;  %8542 = vmatmul.mubr.bf16.gmra.mxu1 %v3524_v61 }
 0x213   : > { %v3531_v18 = vrot.slane %v3529_v2, 1  ;;  %v13900_v6 = vsel %vm13899_vm14, %v11308_v21, 0  ;;  %vm13901_vm3 = vnez %v13686_v23  ;;  %v13905_v59 = vand.u32 15, %v13904_v49  ;;  %v13914_v9 = vld [vmem:[#allocation24_spill] sm:$0xff]  ;;  %v2837_v49 = vld [vmem:[#allocation2 + $0x78] sm:$0xf] }
 0x214   : > { %v13903_v43 = vsel %vm13901_vm3, %v13902_v40, 0  ;;  %vm13909_vm12 = vnez %v13908_v14  ;;  %vm13913_vm6 = vnez %v13912_v5  ;;  %vm13916_vm14 = vsmask.f32 4352  ;;  %v4760_v5 = vld [vmem:[#allocation2 + $0x58] sm:$0xf] }
 0x215   : > { %v7774_v38 = vcombine.low %v13903_v43, %v13900_v6  ;;  %vm11712_vm10 = vcmp.lt.s32.totalorder %v13905_v59, 15  ;;  %v13911_v53 = vsel %vm13909_vm12, %v13910_v62, 0  ;;  %v13915_v31 = vsel %vm13913_vm6, %v13914_v9, 0  ;;  %v13919_v6 = vld [vmem:[#allocation106_spill] sm:$0xff] }
 0x216   : > { %v7775_v21 = vcombine.low %v13915_v31, %v13911_v53  ;;  %v4076_v23 = vsel %vm13916_vm14, %v4066_v29, %v4075_v63  ;;  %v3238_v22 = vor.u32 %v3236_v60, %v3235_v41  ;;  %vm2936_vm3 = vmpackc.low %vm11712_vm10, %vm11712_vm10  ;;  %v3240_v48 = vrot.slane %v3235_v41, 4 }
 0x217   : > { %v13917_v16 = vsel %vm11262_vm13, %v11399_v27, 0  ;;  %v13920_v40 = vsel %vm11253_vm9, %v13919_v6, 0  ;;  %vm13921_vm12 = vsmask.f32 7424  ;;  %vm13922_vm14 = vcmp.ne.s16.totalorder %v11689_v12, 0  ;;  %8586 = vmatmul.mubr.bf16.gmra.mxu0 %v4076_v23 }
 0x218   : > { %v7776_v43 = vcombine.low %v13920_v40, %v13917_v16  ;;  %v3532_v61 = vsel %vm13921_vm12, %v3527_v45, %v3531_v18  ;;  %v3320_v29 = vsel %vm13922_vm14, %v2836_v11, 0  ;;  %v4087_v60 = vshrl.u32 %v7774_v38, 16 }
 0x219   : > { %v4090_v59 = vshll.u32 %v7774_v38, 16  ;;  %8545 = vmatprep.mubr.bf16.mxu1 %v3532_v61  ;;  %vm13923_vm10 = vsmask.f32 4352  ;;  %v3239_v27 = vsel %vm10128_vm5, %v10114_v25, %v3238_v22  ;;  %v13924_v41 = vmov 0  }
 0x21a   : > { %v4085_v56 = vsel %vm13923_vm10, %v4075_v63, %v4084_v17  ;;  %v2968_v19 = vsel %vm2936_vm3, 65537, %v13924_v41  ;;  %v4096_v30 = vshrl.u32 %v7775_v21, 16  ;;  %vm11745_vm13 = vcmp.ne.s16.totalorder %v3239_v27, 0  ;;  %vm13930_vm12 = vmmov %vm13923_vm10 }
 0x21b   : > { %v13925_v45 = vmov 0  ;;  %v4089_v11 = vrot.slane %v4087_v60, 3  ;;  %v4092_v62 = vrot.slane %v4090_v59, 4  ;;  %v3251_v38 = vshrl.u32 %v2968_v19, 16  ;;  %8589 = vmatprep.mubr.bf16.mxu0 %v4085_v56  ;;  %v2838_v59 = vld [vmem:[#allocation2 + $0x7c] sm:$0xf] }
 0x21c   : > { %v13926_v45 = vsel %vm11745_vm13, 4294967295, %v13925_v45  ;;  %v3321_v53 = vsel %vm11745_vm13, %v2837_v49, 0  ;;  %v3533_v63 = vshrl.u32 %v7750_v7, 16  ;;  %v11754_v9 = vsel %vm10128_vm5, %v3240_v48, %v13894_v52  ;;  %v2839_v56 = vld [vmem:[#allocation2 + $0x80] sm:$0xf] }
 0x21d   : > { %13927 = vst [vmem:[#allocation96_spill] sm:$0xff] %v13926_v45  ;;  %13928 = vst [vmem:[#allocation87_spill] sm:$0xff] %v11754_v9  ;;  %v3254_v31 = vshll.u32 %v2968_v19, 16  ;;  %v7751_v22 = vcombine.low %v3320_v29, %v3321_v53  ;;  %v4093_v23 = vor.u32 %v4092_v62, %v4089_v11  ;;  %v3253_v16 = vrot.slane %v3251_v38, 7 }
 0x21e   : > { %v4098_v2 = vrot.slane %v4096_v30, 3  ;;  %v4099_v6 = vshll.u32 %v7775_v21, 16  ;;  %v4105_v40 = vshrl.u32 %v7776_v43, 16  ;;  %v4108_v61 = vshll.u32 %v7776_v43, 16  ;;  %v2840_v21 = vld [vmem:[#allocation2 + $0x84] sm:$0x1] }
 0x21f   : > { %v13929_v7 = vsel %vm11279_vm7, %v11571_v37, 0  ;;  %v3535_v60 = vor.u32 %v3533_v63, %v3531_v18  ;;  %v3537_v48 = vshll.u32 %v7751_v22, 16  ;;  %v3256_v29 = vor.u32 %v3254_v31, %v3253_v16 }
 0x220   : > { %v7777_v49 = vcombine.low %v13929_v7, %v3878_v33  ;;  %vm13385_vm9 = vcmp.ne.s16.totalorder %v11754_v9, 0  ;;  %v4101_v27 = vrot.slane %v4099_v6, 4  ;;  %v3258_v41 = vrot.slane %v3253_v16, 4 }
 0x221   : > { %v4107_v43 = vrot.slane %v4105_v40, 3  ;;  %v4110_v19 = vrot.slane %v4108_v61, 4  ;;  %v3539_v30 = vrot.slane %v3537_v48, 1  ;;  %v3257_v3 = vsel %vm10128_vm5, %v10114_v25, %v3256_v29  ;;  %vm13938_vm5 = vmmov %vm13930_vm12  ;;  %v4742_v40 = vld [vmem:[#allocation2 + $0x10] sm:$0xf] }
 0x222   : > { %v4114_v11 = vshrl.u32 %v7777_v49, 16  ;;  %v4117_v62 = vshll.u32 %v7777_v49, 16  ;;  %v4094_v33 = vsel %vm13930_vm12, %v4084_v17, %v4093_v23  ;;  %vm11769_vm3 = vcmp.ne.s16.totalorder %v3257_v3, 0  ;;  %v4741_v48 = vld [vmem:[#allocation2 + $0xc] sm:$0xf] }
 0x223   : > { %v13931_v18 = vmov 0  ;;  %v4102_v38 = vor.u32 %v4101_v27, %v4098_v2  ;;  %vm11773_vm14 = vcmp.ne.s16.totalorder %v3258_v41, 0  ;;  %v13934_v53 = vmov 0  ;;  %8590 = vmatmul.mubr.bf16.gmra.mxu0 %v4094_v33  ;;  %v4743_v41 = vld [vmem:[#allocation2 + $0x14] sm:$0xf]  ;;  %v13939_v33 = vld [vmem:[#allocation27_spill] sm:$0xff] }
 0x224   : > { %v13932_v18 = vsel %vm11769_vm3, 4294967295, %v13931_v18  ;;  %v13935_v53 = vsel %vm11773_vm14, 4294967295, %v13934_v53  ;;  %vm13937_vm10 = vsmask.f32 7424  ;;  %v3322_v44 = vsel %vm13385_vm9, %v2838_v59, 0 }
 0x225   : > { %13933 = vst [vmem:[#allocation90_spill] sm:$0xff] %v13932_v18  ;;  %13936 = vst [vmem:[#allocation102_spill] sm:$0xff] %v13935_v53  ;;  %v3540_v63 = vsel %vm13937_vm10, %v3535_v60, %v3539_v30  ;;  %v3323_v25 = vsel %vm11769_vm3, %v2839_v56, 0  ;;  %v3324_v17 = vsel %vm11773_vm14, %v2840_v21, 0  ;;  %v3541_v16 = vshrl.u32 %v7751_v22, 16  ;;  %v13982_v53 = vld [vmem:[#allocation79_spill] sm:$0xff] }
 0x226   : > { %8546 = vmatmul.mubr.bf16.gmra.mxu1 %v3540_v63  ;;  %v7752_v31 = vcombine.low %v3322_v44, %v3323_v25  ;;  %v4103_v2 = vsel %vm13938_vm5, %v4093_v23, %v4102_v38  ;;  %v7753_v6 = vcombine.low %v3324_v17, %v3324_v17  ;;  %v4111_v61 = vor.u32 %v4110_v19, %v4107_v43  ;;  %v4744_v59 = vld [vmem:[#allocation2 + $0x18] sm:$0xf]  ;;  %v11787_v56 = vld [vmem:[#allocation2 + $0x44] sm:$0xf]  ;;  %v11791_v43 = vld [vmem:[#allocation2 + $0x48] sm:$0xf] }
 0x227   : > { %8593 = vmatprep.mubr.bf16.mxu0 %v4103_v2  ;;  %v4116_v7 = vrot.slane %v4114_v11, 3  ;;  %v4119_v49 = vrot.slane %v4117_v62, 4  ;;  %v7778_v60 = vcombine.low %v11695_v4, %v11695_v4  ;;  %v3543_v29 = vor.u32 %v3541_v16, %v3539_v30  ;;  %v13943_v17 = vld [vmem:[#allocation25_spill] sm:$0xff]  ;;  %v13948_v62 = vld [vmem:[#allocation38_spill] sm:$0xff]  ;;  %v14041_v18 = vld [vmem:[#allocation72_spill] sm:$0xff] }
 0x228   : > { %v3545_v27 = vshll.u32 %v7752_v31, 16  ;;  %v3553_v21 = vshll.u32 %v7753_v6, 16  ;;  %vm13940_vm12 = vnez %v13939_v33  ;;  %v3549_v11 = vshrl.u32 %v7752_v31, 16  ;;  %v4745_v6 = vld [vmem:[#allocation2 + $0x1c] sm:$0xf] }
 0x229   : > { %v4120_v22 = vor.u32 %v4119_v49, %v4116_v7  ;;  %v4123_v3 = vshrl.u32 %v7778_v60, 16  ;;  %v4126_v23 = vshll.u32 %v7778_v60, 16  ;;  %v4775_v63 = vsel %vm13940_vm12, %v4742_v40, 0  ;;  %v4746_v40 = vld [vmem:[#allocation2 + $0x20] sm:$0xf] }
 0x22a   : > { %v3547_v19 = vrot.slane %v3545_v27, 1  ;;  %vm13941_vm10 = vcmp.ne.s16.totalorder %v13894_v52, 0  ;;  %v4777_v44 = vsel %vm11327_vm0, %v4744_v59, 0  ;;  %v4112_v25 = vsel %vm13938_vm5, %v4102_v38, %v4111_v61  ;;  %v11803_v7 = vld [vmem:[#allocation2 + $0x4c] sm:$0xf] }
 0x22b   : > { %v4774_v4 = vsel %vm13941_vm10, %v4741_v48, 0  ;;  %vm13944_vm9 = vcmp.ne.s16.totalorder %v13943_v17, 0  ;;  %vm13945_vm12 = vsmask.f32 7424  ;;  %v3555_v60 = vrot.slane %v3553_v21, 1  ;;  %8594 = vmatmul.mubr.bf16.gmra.mxu0 %v4112_v25  ;;  %vm13946_vm10 = vmmov %vm13938_vm5  ;;  %v13950_v21 = vld [vmem:[#allocation40_spill] sm:$0xff] }
 0x22c   : > { %v4776_v16 = vsel %vm13944_vm9, %v4743_v41, 0  ;;  %v7811_v2 = vcombine.low %v4774_v4, %v4775_v63  ;;  %v3548_v31 = vsel %vm13945_vm12, %v3543_v29, %v3547_v19  ;;  %v3551_v49 = vor.u32 %v3549_v11, %v3547_v19  ;;  %v4747_v59 = vld [vmem:[#allocation2 + $0x24] sm:$0xf]  ;;  %v4748_v41 = vld [vmem:[#allocation2 + $0x28] sm:$0xf]  ;;  %vm13947_vm9 = vmmov %vm13945_vm12 }
 0x22d   : > { %v11806_v48 = vcombine.low %v4776_v16, %v4777_v44  ;;  %8549 = vmatprep.mubr.bf16.mxu1 %v3548_v31  ;;  %v4121_v27 = vsel %vm13946_vm10, %v4111_v61, %v4120_v22  ;;  %v4125_v38 = vrot.slane %v4123_v3, 3  ;;  %v4128_v30 = vrot.slane %v4126_v23, 4  ;;  %v4750_v44 = vld [vmem:[#allocation2 + $0x30] sm:$0xf]  ;;  %v11825_v16 = vld [vmem:[#allocation2 + $0x54] sm:$0xf] }
 0x22e   : > { %v4909_v17 = vshll.u32 %v7811_v2, 16  ;;  %v3556_v63 = vsel %vm13947_vm9, %v3551_v49, %v3555_v60  ;;  %8597 = vmatprep.mubr.bf16.mxu0 %v4121_v27  ;;  %vm13949_vm12 = vcmp.ne.s16.totalorder %v13948_v62, 0  ;;  %vm13951_vm5 = vnez %v13950_v21  ;;  %v11823_v25 = vld [vmem:[#allocation2 + $0x50] sm:$0xf]  ;;  %v13954_v31 = vld [vmem:[#allocation64_spill] sm:$0xff]  ;;  %v13956_v49 = vld [vmem:[#allocation45_spill] sm:$0xff] }
 0x22f   : > { %v4914_v4 = vshll.u32 %v11806_v48, 16  ;;  %v4778_v29 = vsel %vm13949_vm12, %v4745_v6, 0  ;;  %v4779_v19 = vsel %vm13951_vm5, %v4746_v40, 0  ;;  %vm13952_vm10 = vnez %v13849_v42  ;;  %8550 = vmatmul.mubr.bf16.gmra.mxu1 %v3556_v63  ;;  %v13953_v6 = vld [vmem:[#allocation63_spill] sm:$0xff]  ;;  %v13958_v27 = vld [vmem:[#allocation42_spill] sm:$0xff] }
 0x230   : > { %v4911_v3 = vrot.slane %v4909_v17, 1  ;;  %v11821_v23 = vcombine.low %v4778_v29, %v4779_v19  ;;  %v13955_v40 = vcombine.low %v13953_v6, %v13954_v31  ;;  %vm13957_vm9 = vcmp.ne.s16.totalorder %v13956_v49, 0  ;;  %v11834_v61 = vld [vmem:[#allocation2 + $0x58] sm:$0xf]  ;;  %v4749_v19 = vld [vmem:[#allocation2 + $0x2c] sm:$0xf] }
 0x231   : > { %v4780_v60 = vsel %vm13957_vm9, %v4747_v59, 0  ;;  %vm13959_vm12 = vnez %v13958_v27  ;;  %13960 = vst [vmem:[#allocation89_spill] sm:$0xff] %v11834_v61  ;;  %v4907_v17 = vshrl.u32 %v7811_v2, 16  ;;  %v4916_v63 = vrot.slane %v4914_v4, 1  ;;  %v11838_v62 = vld [vmem:[#allocation2 + $0x5c] sm:$0xf] }
 0x232   : > { %8617 = vmatprep.mubr.bf16.mxu1 %v13955_v40  ;;  %v4781_v11 = vsel %vm13959_vm12, %v4748_v41, 0  ;;  %13961 = vst [vmem:[#allocation101_spill] sm:$0xff] %v11838_v62  ;;  %v11840_v21 = vld [vmem:[#allocation2 + $0x68] sm:$0xf]  ;;  %v4129_v52 = vor.u32 %v4128_v30, %v4125_v38  ;;  %v4922_v6 = vshll.u32 %v11821_v23, 16  ;;  %v13963_v31 = vld [vmem:[#allocation43_spill] sm:$0xff]  ;;  %vm13965_vm9 = vnez %v13859_v10 }
 0x233   : > { %v11836_v29 = vcombine.low %v4780_v60, %v4781_v11  ;;  %13962 = vst [vmem:[#allocation94_spill] sm:$0xff] %v11840_v21  ;;  %vm13964_vm5 = vnez %v13963_v31  ;;  %v11851_v4 = vld [vmem:[#allocation2 + $0x6c] sm:$0xf]  ;;  %v4912_v11 = vor.u32 %v4911_v3, %v4907_v17  ;;  %v4752_v40 = vld [vmem:[#allocation2 + $0x38] sm:$0xf]  ;;  %vm13967_vm12 = vnez %v13873_v32  ;;  %v9134_v60 = vld [vmem:[#allocation9 + $0x1b0] sm:$0xff]  }
 0x234   : > { %v4783_v59 = vsel %vm13964_vm5, %v4750_v44, 0  ;;  %13966 = vst [vmem:[#allocation103_spill] sm:$0xff] %v11851_v4  ;;  %v11856_v38 = vld [vmem:[#allocation2 + $0x78] sm:$0xf]  ;;  %vm13969_vm0 = vsmask.f32 4352  ;;  %vm13972_vm1 = vnez %v13655_v15 }
 0x235   : > { %13968 = vst [vmem:[#allocation93_spill] sm:$0xff] %v11856_v38  ;;  %v4130_v44 = vsel %vm13969_vm0, %v4120_v22, %v4129_v52  ;;  %v4930_v31 = vshll.u32 %v11836_v29, 16  ;;  %v13970_v41 = vld [vmem:[#allocation46_spill] sm:$0xff]  ;;  %vm13973_vm14 = vsmask.f32 7424  ;;  %v4924_v2 = vrot.slane %v4922_v6, 1 }
 0x236   : > { %vm13971_vm5 = vcmp.ne.s16.totalorder %v13970_v41, 0  ;;  %8598 = vmatmul.mubr.bf16.gmra.mxu0 %v4130_v44  ;;  %v4917_v17 = vsel %vm13973_vm14, %v4912_v11, %v4916_v63  ;;  %v4751_v52 = vld [vmem:[#allocation2 + $0x34] sm:$0xf]  ;;  %v4754_v22 = vld [vmem:[#allocation2 + $0x40] sm:$0xf]  ;;  %vm13974_vm0 = vnez %v13775_v47  ;;  %v13975_v44 = vld [vmem:[#allocation21_spill] sm:$0xff]  ;;  %vm13981_vm14 = vnez %v13980_v35 }
 0x237   : > { %v4782_v49 = vsel %vm13971_vm5, %v4749_v19, 0  ;;  %v9232_v19 = vld [vmem:[#allocation2 + $0x1c] sm:$0xf]  ;;  %v9233_v27 = vld [vmem:[#allocation2 + $0x20] sm:$0xf]  ;;  %8665 = vmatprep.mubr.bf16.mxu0 %v4917_v17  ;;  %v4785_v20 = vsel %vm13974_vm0, %v4752_v40, 0  ;;  %vm13976_vm5 = vnez %v13975_v44 }
 0x238   : > { %v11869_v30 = vcombine.low %v4782_v49, %v4783_v59  ;;  %v7789_v33 = vcombine.low %v9232_v19, %v9233_v27  ;;  %v4756_v3 = vld [vmem:[#allocation2 + $0x48] sm:$0xf]  ;;  %v13977_v11 = vld [vmem:[#allocation74_spill] sm:$0xff]  ;;  %v13983_v41 = vsel %vm13981_vm14, %v13982_v53, 0  ;;  %v13984_v21 = vld [vmem:[#allocation23_spill] sm:$0xff]  ;;  %v4926_v53 = vshrl.u32 %v11821_v23, 16 }
 0x239   : > { %v13978_v49 = vsel %vm13976_vm5, %v13977_v11, 0  ;;  %v13979_v59 = vld [vmem:[#allocation81_spill] sm:$0xff]  ;;  %vm13985_vm11 = vnez %v13984_v21  ;;  %v13986_v27 = vld [vmem:[#allocation78_spill] sm:$0xff]  ;;  %v13988_v19 = vld [vmem:[#allocation68_spill] sm:$0xff]  ;;  %v4932_v21 = vrot.slane %v4930_v31, 1  ;;  %vm13992_vm5 = vnez %v13783_v57 }
 0x23a   : > { %v11881_v34 = vcombine.low %v13979_v59, %v13978_v49  ;;  %v13987_v17 = vsel %vm13985_vm11, %v13986_v27, 0  ;;  %v13989_v44 = vld [vmem:[#allocation70_spill] sm:$0xff]  ;;  %v4918_v49 = vshrl.u32 %v11806_v48, 16  ;;  %v4753_v59 = vld [vmem:[#allocation2 + $0x3c] sm:$0xf]  ;;  %vm13991_vm11 = vcmp.ne.s16.totalorder %v13770_v58, 0 }
 0x23b   : > { %v11891_v6 = vcombine.low %v13987_v17, %v13983_v41  ;;  %v13990_v11 = vcombine.low %v13988_v19, %v13989_v44  ;;  %v4755_v35 = vld [vmem:[#allocation2 + $0x44] sm:$0xf]  ;;  %v4784_v41 = vsel %vm13991_vm11, %v4751_v52, 0  ;;  %v4787_v27 = vsel %vm13992_vm5, %v4754_v22, 0  ;;  %v4758_v17 = vld [vmem:[#allocation2 + $0x50] sm:$0xf] }
 0x23c   : > { %v9234_v19 = vld [vmem:[#allocation2 + $0x24] sm:$0xf]  ;;  %v9235_v44 = vld [vmem:[#allocation2 + $0x28] sm:$0xf]  ;;  %v4938_v40 = vshll.u32 %v11869_v30, 16  ;;  %v11907_v47 = vcombine.low %v4784_v41, %v4785_v20  ;;  %vm13993_vm14 = vnez %v13793_v54  ;;  %v4928_v58 = vor.u32 %v4926_v53, %v4924_v2  ;;  %v13994_v57 = vld [vmem:[#allocation50_spill] sm:$0xff] }
 0x23d   : > { %8618 = vmatmul.mubr.bf16.vlgmr.msra.gmra.mxu1 %v13990_v11  ;;  %v7790_v11 = vcombine.low %v9234_v19, %v9235_v44  ;;  %v9137_v48 = vld [vmem:[#allocation9 + $0x1a8] sm:$0xff]   ;;  %v9237_v31 = vld [vmem:[#allocation2 + $0x30] sm:$0xf]  ;;  %vm13995_vm11 = vcmp.ne.s16.totalorder %v13994_v57, 0  ;;  %v11915_v19 = vld [vmem:[#allocation2 + $0x34] sm:$0xf] }
 0x23e   : > { %8698 = vmatpush3.bf16.msra.mxu1 %v11641_v8  ;;  %8621 = vmatprep.mubr.bf16.mxu1 %v7789_v33  ;;  %v4789_v8 = vsel %vm13993_vm14, %v4756_v3, 0  ;;  %v4920_v33 = vor.u32 %v4918_v49, %v4916_v63  ;;  %v9236_v23 = vld [vmem:[#allocation2 + $0x2c] sm:$0xf]  ;;  %v4786_v22 = vsel %vm13995_vm11, %v4753_v59, 0  ;;  %v11917_v44 = vld [vmem:[#allocation2 + $0x38] sm:$0xf] }
 0x23f   : > { %8699 = vmatprep.subr.bf16.mxu1 %v9134_v60  ;;  %v7791_v52 = vcombine.low %v9236_v23, %v9237_v31  ;;  %v4757_v38 = vld [vmem:[#allocation2 + $0x4c] sm:$0xf]  ;;  %v11921_v3 = vcombine.low %v4786_v22, %v4787_v27  ;;  %v13997_v63 = vld [vmem:[#allocation54_spill] sm:$0xff]  ;;  %v13999_v53 = vld [vmem:[#allocation44_spill] sm:$0xff]  ;;  %vm14001_vm11 = vsmask.f32 7424 }
 0x240   : > { %vm13998_vm14 = vcmp.ne.s16.totalorder %v13997_v63, 0  ;;  %vm14000_vm5 = vnez %v13999_v53  ;;  %v9150_v59 = vld [vmem:[#allocation9 + $0x1f0] sm:$0xff]   ;;  %v4925_v23 = vsel %vm14001_vm11, %v4920_v33, %v4924_v2  ;;  %vm14002_vm0 = vmmov %vm14001_vm11  ;;  %v4934_v54 = vshrl.u32 %v11836_v29, 16  ;;  %v4762_v20 = vld [vmem:[#allocation2 + $0x60] sm:$0xf] }
 0x241   : > { %v4788_v49 = vsel %vm13998_vm14, %v4755_v35, 0  ;;  %v4791_v41 = vsel %vm14000_vm5, %v4758_v17, 0  ;;  %v4933_v31 = vsel %vm14002_vm0, %v4928_v58, %v4932_v21  ;;  %v4759_v4 = vld [vmem:[#allocation2 + $0x54] sm:$0xf]  ;;  %8666 = vmatmul.mubr.bf16.vlgmr.msra.gmra.mxu0 %v4925_v23  ;;  %v4940_v27 = vrot.slane %v4938_v40, 1  ;;  %v9140_v22 = vld [vmem:[#allocation9 + $0x1a0] sm:$0xff]  }
 0x242   : > { %8700 = vmatpush3.bf16.msra.mxu1 %v9134_v60  ;;  %v11930_v57 = vcombine.low %v4788_v49, %v4789_v8  ;;  %v4946_v35 = vshll.u32 %v11907_v47, 16  ;;  %v14003_v53 = vld [vmem:[#allocation56_spill] sm:$0xff]  ;;  %v14005_v63 = vld [vmem:[#allocation51_spill] sm:$0xff]  ;;  %vm14007_vm0 = vnez %v13908_v14  ;;  %8669 = vmatprep.mubr.bf16.mxu0 %v4933_v31  ;;  %v11948_v33 = vld [vmem:[#allocation2 + $0x48] sm:$0xf]  ;;  %v4936_v31 = vor.u32 %v4934_v54, %v4932_v21 }
 0x243   : > { %8701 = vmatprep.subr.bf16.mxu1 %v9137_v48  ;;  %vm14004_vm14 = vcmp.ne.s16.totalorder %v14003_v53, 0  ;;  %vm14006_vm11 = vnez %v14005_v63  ;;  %v11940_v29 = vld [vmem:[#allocation2 + $0x3c] sm:$0xf]  ;;  %v11942_v60 = vld [vmem:[#allocation2 + $0x40] sm:$0xf]  ;;  %8746 = vmatpush3.bf16.msra.mxu0 %v11699_v1  ;;  %v4954_v58 = vshll.u32 %v11921_v3, 16 }
 0x244   : > { %v4790_v17 = vsel %vm14004_vm14, %v4757_v38, 0  ;;  %v4793_v2 = vsel %vm14006_vm11, %v4760_v5, 0  ;;  %v11946_v8 = vld [vmem:[#allocation2 + $0x44] sm:$0xf]  ;;  %v4761_v49 = vld [vmem:[#allocation2 + $0x5c] sm:$0xf]  ;;  %vm14010_vm11 = vnez %v13820_v13  ;;  %8747 = vmatprep.subr.bf16.mxu0 %v9150_v59 }
 0x245   : > { %v11952_v5 = vcombine.low %v4790_v17, %v4791_v41  ;;  %v4763_v23 = vld [vmem:[#allocation2 + $0x64] sm:$0xf]  ;;  %8622 = vmatmul.mubr.bf16.gmra.mxu1 %v7790_v11  ;;  %v14008_v63 = vld [vmem:[#allocation58_spill] sm:$0xff]  ;;  %v4795_v53 = vsel %vm14010_vm11, %v4762_v20, 0  ;;  %v9153_v14 = vld [vmem:[#allocation9 + $0x1e8] sm:$0xff]   ;;  %v4942_v41 = vshrl.u32 %v11869_v30, 16 }
 0x246   : > { %vm14009_vm14 = vcmp.ne.s16.totalorder %v14008_v63, 0  ;;  %8625 = vmatprep.mubr.bf16.mxu1 %v7791_v52  ;;  %8702 = vmatpush3.bf16.msra.mxu1 %v9137_v48  ;;  %v4950_v17 = vshrl.u32 %v11907_v47, 16  ;;  %v4962_v1 = vshll.u32 %v11930_v57, 16  ;;  %v9143_v54 = vld [vmem:[#allocation9 + $0x198] sm:$0xff]   ;;  %vm14011_vm5 = vsmask.f32 7424 }
 0x247   : > { %v4792_v40 = vsel %vm14009_vm14, %v4759_v4, 0  ;;  %v4941_v11 = vsel %vm14011_vm5, %v4936_v31, %v4940_v27  ;;  %v4948_v4 = vrot.slane %v4946_v35, 1  ;;  %8703 = vmatprep.subr.bf16.mxu1 %v9140_v22  ;;  %v11966_v38 = vld [vmem:[#allocation2 + $0x4c] sm:$0xf]  ;;  %v11968_v20 = vld [vmem:[#allocation2 + $0x50] sm:$0xf]  ;;  %8748 = vmatpush3.bf16.msra.mxu0 %v9150_v59  ;;  %v4944_v61 = vor.u32 %v4942_v41, %v4940_v27 }
 0x248   : > { %v11963_v21 = vcombine.low %v4792_v40, %v4793_v2  ;;  %v14012_v52 = vld [vmem:[#allocation59_spill] sm:$0xff]  ;;  %v4765_v47 = vld [vmem:[#allocation2 + $0x6c] sm:$0xf]  ;;  %v4766_v13 = vld [vmem:[#allocation2 + $0x70] sm:$0xf]  ;;  %v4970_v63 = vshll.u32 %v11952_v5, 16  ;;  %8749 = vmatprep.subr.bf16.mxu0 %v9153_v14 }
 0x249   : > { %vm14013_vm14 = vcmp.ne.s16.totalorder %v14012_v52, 0  ;;  %v14014_v40 = vld [vmem:[#allocation60_spill] sm:$0xff]  ;;  %v14016_v31 = vld [vmem:[#allocation53_spill] sm:$0xff]  ;;  %v4956_v32 = vrot.slane %v4954_v58, 1  ;;  %v11981_v62 = vld [vmem:[#allocation2 + $0x54] sm:$0xf]  ;;  %8670 = vmatmul.mubr.bf16.gmra.mxu0 %v4941_v11  ;;  %v4952_v58 = vor.u32 %v4950_v17, %v4948_v4 }
 0x24a   : > { %v4794_v30 = vsel %vm14013_vm14, %v4761_v49, 0  ;;  %vm14015_vm5 = vcmp.ne.s16.totalorder %v14014_v40, 0  ;;  %vm14017_vm11 = vnez %v14016_v31  ;;  %v11983_v48 = vld [vmem:[#allocation2 + $0x58] sm:$0xf]  ;;  %8704 = vmatpush3.bf16.msra.mxu1 %v9140_v22  ;;  %vm14018_vm14 = vcmp.ne.s16.totalorder %v13843_v50, 0  ;;  %v14075_v10 = vld [vmem:[#allocation89_spill] sm:$0xff] }
 0x24b   : > { %v11975_v2 = vcombine.low %v4794_v30, %v4795_v53  ;;  %v4796_v35 = vsel %vm14015_vm5, %v4763_v23, 0  ;;  %v4797_v28 = vsel %vm14017_vm11, %v4764_v55, 0  ;;  %v9155_v53 = vld [vmem:[#allocation9 + $0x1e0] sm:$0xff]   ;;  %v4964_v30 = vrot.slane %v4962_v1, 1  ;;  %8705 = vmatprep.subr.bf16.mxu1 %v9143_v54  ;;  %v4768_v22 = vld [vmem:[#allocation2 + $0x78] sm:$0xf]  ;;  %8750 = vmatpush3.bf16.msra.mxu0 %v9153_v14 }
 0x24c   : > { %v11987_v52 = vcombine.low %v4796_v35, %v4797_v28  ;;  %v4978_v23 = vshll.u32 %v11963_v21, 16  ;;  %v4798_v55 = vsel %vm14018_vm14, %v4765_v47, 0  ;;  %vm14019_vm5 = vnez %v13847_v36  ;;  %v9146_v28 = vld [vmem:[#allocation9 + $0x190] sm:$0xff]   ;;  %v11999_v50 = vld [vmem:[#allocation2 + $0x5c] sm:$0xf]  ;;  %8751 = vmatprep.subr.bf16.mxu0 %v9155_v53 }
 0x24d   : > { %v4799_v59 = vsel %vm14019_vm5, %v4766_v13, 0  ;;  %vm14020_vm11 = vsmask.f32 7424  ;;  %v4958_v41 = vshrl.u32 %v11921_v3, 16  ;;  %v4966_v1 = vshrl.u32 %v11930_v57, 16 }
 0x24e   : > { %v4949_v27 = vsel %vm14020_vm11, %v4944_v61, %v4948_v4  ;;  %v11996_v35 = vcombine.low %v4798_v55, %v4799_v59  ;;  %v4972_v49 = vrot.slane %v4970_v63, 1  ;;  %v12001_v47 = vld [vmem:[#allocation2 + $0x60] sm:$0xf]  ;;  %v4986_v61 = vshll.u32 %v11975_v2, 16  ;;  %v4767_v4 = vld [vmem:[#allocation2 + $0x74] sm:$0xf]  ;;  %8706 = vmatpush3.bf16.msra.mxu1 %v9143_v54  ;;  %vm14024_vm5 = vmmov %vm14020_vm11 }
 0x24f   : > { %8673 = vmatprep.mubr.bf16.mxu0 %v4949_v27  ;;  %v14021_v3 = vcombine.low %v11915_v19, %v11917_v44  ;;  %v4957_v17 = vsel %vm14020_vm11, %v4952_v58, %v4956_v32  ;;  %v4960_v11 = vor.u32 %v4958_v41, %v4956_v32  ;;  %v4974_v57 = vshrl.u32 %v11952_v5, 16  ;;  %v9158_v55 = vld [vmem:[#allocation9 + $0x1d8] sm:$0xff]   ;;  %v12015_v13 = vld [vmem:[#allocation2 + $0x64] sm:$0xf]  ;;  %v12017_v19 = vld [vmem:[#allocation2 + $0x68] sm:$0xf]  ;;  %8707 = vmatprep.subr.bf16.mxu1 %v9146_v28 }
 0x250   : > { %v4994_v63 = vshll.u32 %v11987_v52, 16  ;;  %v14022_v59 = vcombine.low %v11940_v29, %v11942_v60  ;;  %v4968_v27 = vor.u32 %v4966_v1, %v4964_v30  ;;  %v4980_v14 = vrot.slane %v4978_v23, 1  ;;  %v4770_v5 = vld [vmem:[#allocation2 + $0x80] sm:$0xf]  ;;  %v12025_v60 = vld [vmem:[#allocation2 + $0x6c] sm:$0xf]  ;;  %8752 = vmatpush3.bf16.msra.mxu0 %v9155_v53 }
 0x251   : > { %8626 = vmatmul.mubr.bf16.gmra.mxu1 %v14021_v3  ;;  %vm14023_vm14 = vnez %v13888_v39  ;;  %v4965_v58 = vsel %vm14020_vm11, %v4960_v11, %v4964_v30  ;;  %v4982_v29 = vshrl.u32 %v11963_v21, 16  ;;  %v12027_v54 = vld [vmem:[#allocation2 + $0x70] sm:$0xf]  ;;  %v9151_v41 = vld [vmem:[#allocation9 + $0x188] sm:$0xff]   ;;  %v5002_v1 = vshll.u32 %v11996_v35, 16  ;;  %8753 = vmatprep.subr.bf16.mxu0 %v9158_v55 }
 0x252   : > { %8629 = vmatprep.mubr.bf16.mxu1 %v14022_v59  ;;  %v4801_v44 = vsel %vm14023_vm14, %v4768_v22, 0  ;;  %v12033_v3 = vsel %vm14024_vm5, %v4968_v27, %v4972_v49  ;;  %v4976_v22 = vor.u32 %v4974_v57, %v4972_v49  ;;  %v4988_v59 = vrot.slane %v4986_v61, 1  ;;  %v4769_v21 = vld [vmem:[#allocation2 + $0x7c] sm:$0xf]  ;;  %v12037_v11 = vld [vmem:[#allocation2 + $0x88] sm:$0xf]  ;;  %8708 = vmatpush3.bf16.msra.mxu1 %v9146_v28 }
 0x253   : > { %vm14025_vm11 = vcmp.ne.s16.totalorder %v13884_v51, 0  ;;  %v4990_v32 = vshrl.u32 %v11975_v2, 16  ;;  %v4996_v39 = vrot.slane %v4994_v63, 1  ;;  %v4803_v23 = vsel %vm11745_vm13, %v4770_v5, 0  ;;  %v9159_v27 = vld [vmem:[#allocation9 + $0x1d0] sm:$0xff]   ;;  %8674 = vmatmul.mubr.bf16.gmra.mxu0 %v4957_v17  ;;  %8709 = vmatprep.subr.bf16.mxu1 %v9151_v41 }
 0x254   : > { %v4800_v30 = vsel %vm14025_vm11, %v4767_v4, 0  ;;  %v12045_v49 = vsel %vm14024_vm5, %v4976_v22, %v4980_v14  ;;  %v4984_v61 = vor.u32 %v4982_v29, %v4980_v14  ;;  %v12047_v57 = vld [vmem:[#allocation2 + $0x74] sm:$0xf]  ;;  %v12049_v53 = vld [vmem:[#allocation2 + $0x78] sm:$0xf]  ;;  %v4998_v63 = vshrl.u32 %v11987_v52, 16  ;;  %8677 = vmatprep.mubr.bf16.mxu0 %v4965_v58  ;;  %8754 = vmatpush3.bf16.msra.mxu0 %v9158_v55 }
 0x255   : > { %v12040_v36 = vcombine.low %v4800_v30, %v4801_v44  ;;  %v9156_v4 = vld [vmem:[#allocation9 + $0x180] sm:$0xff]   ;;  %v5004_v5 = vrot.slane %v5002_v1, 1  ;;  %vm14026_vm11 = vcmp.ne.s16.totalorder %v11689_v12, 0  ;;  %v4772_v30 = vld [vmem:[#allocation2 + $0x88] sm:$0xf]  ;;  %v5469_v28 = vshrl.u32 %v11891_v6, 16  ;;  %8755 = vmatprep.subr.bf16.mxu0 %v9159_v27 }
 0x256   : > { %v4771_v44 = vld [vmem:[#allocation2 + $0x84] sm:$0xf]  ;;  %v4802_v22 = vsel %vm14026_vm11, %v4769_v21, 0  ;;  %v5472_v14 = vshll.u32 %v11891_v6, 16  ;;  %v4992_v2 = vor.u32 %v4990_v32, %v4988_v59  ;;  %v12061_v52 = vld [vmem:[#allocation2 + $0x7c] sm:$0xf]  ;;  %v14027_v21 = vcombine.low %v11946_v8, %v11948_v33  ;;  %vm14029_vm11 = vmmov %vm14024_vm5  ;;  %8710 = vmatpush3.bf16.msra.mxu1 %v9151_v41 }
 0x257   : > { %v12065_v1 = vcombine.low %v4802_v22, %v4803_v23  ;;  %v12071_v6 = vsel %vm14024_vm5, %v4984_v61, %v4988_v59  ;;  %v5000_v45 = vor.u32 %v4998_v63, %v4996_v39  ;;  %v5006_v29 = vshrl.u32 %v11996_v35, 16  ;;  %v9161_v58 = vld [vmem:[#allocation9 + $0x1c8] sm:$0xff]   ;;  %vm14031_vm13 = vmmov %vm14029_vm11  ;;  %8711 = vmatprep.subr.bf16.mxu1 %v9156_v4  ;;  %v14035_v22 = vld [vmem:[#allocation86_spill] sm:$0xff] }
 0x258   : > { %v5010_v32 = vshll.u32 %v12040_v36, 16  ;;  %v14028_v17 = vcombine.low %v11966_v38, %v11968_v20  ;;  %v12079_v55 = vsel %vm14029_vm11, %v4992_v2, %v4996_v39  ;;  %vm14030_vm5 = vcmp.ne.s16.totalorder %v11754_v9, 0  ;;  %v12089_v38 = vld [vmem:[#allocation9 + $0x238] sm:$0xff]   ;;  %v14032_v20 = vld [vmem:[#allocation80_spill] sm:$0xff]  ;;  %8756 = vmatpush3.bf16.msra.mxu0 %v9159_v27 }
 0x259   : > { %8630 = vmatmul.mubr.bf16.gmra.mxu1 %v14027_v21  ;;  %v4804_v33 = vsel %vm14030_vm5, %v4771_v44, 0  ;;  %v4805_v35 = vsel %vm11769_vm3, %v4772_v30, 0  ;;  %v12087_v23 = vsel %vm14031_vm13, %v5000_v45, %v5004_v5  ;;  %v5471_v59 = vrot.slane %v5469_v28, 3  ;;  %v14033_v44 = vld [vmem:[#allocation65_spill] sm:$0xff]  ;;  %v14037_v45 = vld [vmem:[#allocation62_spill] sm:$0xff]  ;;  %8757 = vmatprep.subr.bf16.mxu0 %v9161_v58  ;;  %v14043_v27 = vld [vmem:[#allocation92_spill] sm:$0xff] }
 0x25a   : > { %8633 = vmatprep.mubr.bf16.mxu1 %v14028_v17  ;;  %v5474_v61 = vrot.slane %v5472_v14, 4  ;;  %v5478_v39 = vshrl.u32 %v14032_v20, 16  ;;  %v12092_v2 = vor.u32 %v5006_v29, %v5004_v5  ;;  %v5018_v41 = vshll.u32 %v12065_v1, 16  ;;  %v14039_v17 = vld [vmem:[#allocation83_spill] sm:$0xff]  ;;  %v9163_v29 = vld [vmem:[#allocation9 + $0x1c0] sm:$0xff]   ;;  %8712 = vmatpush3.bf16.msra.mxu1 %v9156_v4 }
 0x25b   : > { %v5481_v63 = vshll.u32 %v14032_v20, 16  ;;  %vm14034_vm11 = vnez %v14033_v44  ;;  %vm14038_vm13 = vnez %v14037_v45  ;;  %v12104_v21 = vrot.slane %v5010_v32, 1  ;;  %v14045_v9 = vld [vmem:[#allocation71_spill] sm:$0xff]  ;;  %v14047_v44 = vld [vmem:[#allocation88_spill] sm:$0xff]  ;;  %v14049_v32 = vld [vmem:[#allocation77_spill] sm:$0xff]  ;;  %8678 = vmatmul.mubr.bf16.gmra.mxu0 %v12033_v3  ;;  %8793 = vmatprep.subr.bf16.mxu1 %v12089_v38 }
 0x25c   : > { %v14036_v30 = vsel %vm14034_vm11, %v14035_v22, 0  ;;  %v14040_v28 = vsel %vm14038_vm13, %v14039_v17, 0  ;;  %v12106_v8 = vcombine.low %v4804_v33, %v4805_v35  ;;  %v5480_v5 = vrot.slane %v5478_v39, 3  ;;  %v14051_v33 = vld [vmem:[#allocation97_spill] sm:$0xff]  ;;  %v14053_v39 = vld [vmem:[#allocation76_spill] sm:$0xff]  ;;  %8681 = vmatprep.mubr.bf16.mxu0 %v12045_v49  ;;  %8758 = vmatpush3.bf16.msra.mxu0 %v9161_v58 }
 0x25d   : > { %v7839_v14 = vcombine.low %v14040_v28, %v14036_v30  ;;  %vm14042_vm5 = vnez %v14041_v18  ;;  %vm14046_vm3 = vnez %v14045_v9  ;;  %v5483_v45 = vrot.slane %v5481_v63, 4  ;;  %v14055_v28 = vld [vmem:[#allocation95_spill] sm:$0xff]  ;;  %8759 = vmatprep.subr.bf16.mxu0 %v9163_v29 }
 0x25e   : > { %v14044_v20 = vsel %vm14042_vm5, %v14043_v27, 0  ;;  %v14048_v22 = vsel %vm14046_vm3, %v14047_v44, 0  ;;  %vm14050_vm11 = vnez %v14049_v32  ;;  %vm14054_vm13 = vnez %v14053_v39 }
 0x25f   : > { %v7840_v12 = vcombine.low %v14048_v22, %v14044_v20  ;;  %v5487_v17 = vshrl.u32 %v7839_v14, 16  ;;  %v5490_v30 = vshll.u32 %v7839_v14, 16  ;;  %v14052_v35 = vsel %vm14050_vm11, %v14051_v33, 0 }
 0x260   : > { %v14056_v51 = vsel %vm14054_vm13, %v14055_v28, 0  ;;  %v5022_v9 = vshrl.u32 %v12065_v1, 16  ;;  %v12126_v27 = vor.u32 %v5474_v61, %v5471_v59  ;;  %v5484_v14 = vor.u32 %v5483_v45, %v5480_v5  ;;  %v14063_v45 = vld [vmem:[#allocation99_spill] sm:$0xff]  ;;  %8760 = vmatpush3.bf16.msra.mxu0 %v9163_v29 }
 0x261   : > { %v7841_v18 = vcombine.low %v14056_v51, %v14052_v35  ;;  %v5496_v4 = vshrl.u32 %v7840_v12, 16  ;;  %v5499_v63 = vshll.u32 %v7840_v12, 16  ;;  %v5489_v20 = vrot.slane %v5487_v17, 3 }
 0x262   : > { %v5492_v44 = vrot.slane %v5490_v30, 4  ;;  %v14057_v51 = vcombine.low %v11981_v62, %v11983_v48  ;;  %v5461_v3 = vshrl.u32 %v11881_v34, 16  ;;  %v14058_v12 = vcombine.low %v11999_v50, %v12001_v47  ;;  %v14061_v48 = vld [vmem:[#allocation82_spill] sm:$0xff] }
 0x263   : > { %v5505_v22 = vshrl.u32 %v7841_v18, 16  ;;  %v5498_v59 = vrot.slane %v5496_v4, 3  ;;  %v5501_v61 = vrot.slane %v5499_v63, 4  ;;  %v5508_v32 = vshll.u32 %v7841_v18, 16  ;;  %8682 = vmatmul.mubr.bf16.gmra.mxu0 %v12071_v6 }
 0x264   : > { %8634 = vmatmul.mubr.bf16.gmra.mxu1 %v14057_v51  ;;  %vm14059_vm3 = vsmask.f32 4352  ;;  %v5493_v58 = vor.u32 %v5492_v44, %v5489_v20  ;;  %v14060_v62 = vsel %vm10876_vm15, %v11787_v56, 0  ;;  %vm14062_vm5 = vnez %v14061_v48  ;;  %8685 = vmatprep.mubr.bf16.mxu0 %v12079_v55 }
 0x265   : > { %8637 = vmatprep.mubr.bf16.mxu1 %v14058_v12  ;;  %v12139_v49 = vsel %vm14059_vm3, %v12126_v27, %v5484_v14  ;;  %v5507_v5 = vrot.slane %v5505_v22, 3  ;;  %v14064_v17 = vsel %vm14062_vm5, %v14063_v45, 0  ;;  %v5464_v33 = vshll.u32 %v11881_v34, 16  ;;  %vm14067_vm15 = vmmov %vm14059_vm3 }
 0x266   : > { %v7842_v30 = vcombine.low %v14064_v17, %v14060_v62  ;;  %v5502_v35 = vor.u32 %v5501_v61, %v5498_v59  ;;  %v5510_v50 = vrot.slane %v5508_v32, 4  ;;  %v14065_v47 = vsel %vm13952_vm10, %v11803_v7, 0  ;;  %vm14068_vm11 = vmmov %vm14059_vm3 }
 0x267   : > { %v14066_v39 = vsel %vm13854_vm2, %v11791_v43, 0  ;;  %v12158_v28 = vrot.slane %v5018_v41, 1  ;;  %v12161_v18 = vsel %vm14067_vm15, %v5484_v14, %v5493_v58  ;;  %v5026_v51 = vshll.u32 %v12106_v8, 16  ;;  %vm14071_vm2 = vmmov %vm14059_vm3 }
 0x268   : > { %v7843_v0 = vcombine.low %v14066_v39, %v14065_v47  ;;  %v5514_v4 = vshrl.u32 %v7842_v30, 16  ;;  %v5517_v63 = vshll.u32 %v7842_v30, 16  ;;  %v12164_v20 = vsel %vm14068_vm11, %v5493_v58, %v5502_v35  ;;  %v14072_v58 = vld [vmem:[#allocation101_spill] sm:$0xff]  ;;  %v14079_v39 = vld [vmem:[#allocation36_spill] sm:$0xff] }
 0x269   : > { %v5511_v44 = vor.u32 %v5510_v50, %v5507_v5  ;;  %v14069_v41 = vsel %vm13965_vm9, %v11825_v16, 0  ;;  %v14070_v29 = vsel %vm13864_vm4, %v11823_v25, 0  ;;  %v14073_v5 = vsel %vm13972_vm1, %v14072_v58, 0  ;;  %vm14081_vm1 = vmmov %vm14071_vm2 }
 0x26a   : > { %v5523_v42 = vshrl.u32 %v7843_v0, 16  ;;  %v5526_v22 = vshll.u32 %v7843_v0, 16  ;;  %v5516_v46 = vrot.slane %v5514_v4, 3  ;;  %v5519_v59 = vrot.slane %v5517_v63, 4  ;;  %vm14082_vm10 = vmmov %vm14081_vm1 }
 0x26b   : > { %v7844_v14 = vcombine.low %v14070_v29, %v14069_v41  ;;  %v12177_v61 = vsel %vm14071_vm2, %v5502_v35, %v5511_v44  ;;  %v14076_v48 = vsel %vm13967_vm12, %v14075_v10, 0  ;;  %vm14077_vm4 = vsmask.f32 7424  ;;  %v4773_v29 = vld [vmem:[#allocation2 + $0x8c] sm:$0x1]  ;;  %vm14092_vm9 = vmmov %vm14081_vm1  ;;  %8686 = vmatmul.mubr.bf16.gmra.mxu0 %v12087_v23 }
 0x26c   : > { %v5525_v32 = vrot.slane %v5523_v42, 3  ;;  %v5528_v12 = vrot.slane %v5526_v22, 4  ;;  %v7845_v45 = vcombine.low %v14076_v48, %v14073_v5  ;;  %v5013_v24 = vsel %vm14077_vm4, %v12092_v2, %v12104_v21  ;;  %v14089_v5 = vld [vmem:[#allocation94_spill] sm:$0xff]  ;;  %vm14095_vm13 = vmmov %vm14081_vm1  ;;  %v14101_v23 = vld [vmem:[#allocation93_spill] sm:$0xff] }
 0x26d   : > { %v5520_v6 = vor.u32 %v5519_v59, %v5516_v46  ;;  %v5532_v17 = vshrl.u32 %v7844_v14, 16  ;;  %v5535_v30 = vshll.u32 %v7844_v14, 16  ;;  %v14078_v35 = vcombine.low %v12015_v13, %v12017_v19  ;;  %8689 = vmatprep.mubr.bf16.mxu0 %v5013_v24  ;;  %vm14096_vm3 = vmmov %vm14081_vm1 }
 0x26e   : > { %v5529_v15 = vor.u32 %v5528_v12, %v5525_v32  ;;  %v5541_v50 = vshrl.u32 %v7845_v45, 16  ;;  %v5544_v47 = vshll.u32 %v7845_v45, 16  ;;  %v5550_v0 = vshrl.u32 %v14079_v39, 16  ;;  %v14087_v12 = vld [vmem:[#allocation28_spill] sm:$0xff]  ;;  %vm14115_vm15 = vmmov %vm14077_vm4 }
 0x26f   : > { %8638 = vmatmul.mubr.bf16.gmra.mxu1 %v14078_v35  ;;  %v14080_v4 = vcombine.low %v12025_v60, %v12027_v54  ;;  %v12199_v55 = vsel %vm14081_vm1, %v5511_v44, %v5520_v6  ;;  %v5534_v2 = vrot.slane %v5532_v17, 3  ;;  %v5537_v63 = vrot.slane %v5535_v30, 4  ;;  %v14085_v44 = vld [vmem:[#allocation103_spill] sm:$0xff]  ;;  %v14091_v17 = vld [vmem:[#allocation32_spill] sm:$0xff] }
 0x270   : > { %v5553_v42 = vshll.u32 %v14079_v39, 16  ;;  %v12203_v22 = vsel %vm14082_vm10, %v5520_v6, %v5529_v15  ;;  %v5543_v13 = vrot.slane %v5541_v50, 3  ;;  %v5546_v19 = vrot.slane %v5544_v47, 4  ;;  %v14093_v39 = vld [vmem:[#allocation102_spill] sm:$0xff] }
 0x271   : > { %8641 = vmatprep.mubr.bf16.mxu1 %v14080_v4  ;;  %v5552_v46 = vrot.slane %v5550_v0, 3  ;;  %v14083_v59 = vshrl.u32 %v12040_v36, 16  ;;  %v5538_v60 = vor.u32 %v5537_v63, %v5534_v2  ;;  %v14086_v32 = vsel %vm11150_vm8, %v14085_v44, 0 }
 0x272   : > { %v5555_v54 = vrot.slane %v5553_v42, 4  ;;  %vm14088_vm12 = vnez %v14087_v12  ;;  %v5463_v45 = vrot.slane %v5461_v3, 3  ;;  %v5547_v6 = vor.u32 %v5546_v19, %v5543_v13  ;;  %v14098_v19 = vld [vmem:[#allocation33_spill] sm:$0xff] }
 0x273   : > { %v5016_v41 = vor.u32 %v14083_v59, %v12104_v21  ;;  %v14090_v62 = vsel %vm14088_vm12, %v14089_v5, 0  ;;  %v5568_v30 = vshrl.u32 %v14091_v17, 16  ;;  %v5571_v35 = vshll.u32 %v14091_v17, 16 }
 0x274   : > { %v7847_v48 = vcombine.low %v14090_v62, %v14086_v32  ;;  %v12219_v36 = vsel %vm14092_vm9, %v5529_v15, %v5538_v60  ;;  %v5556_v21 = vor.u32 %v5555_v54, %v5552_v46  ;;  %vm14094_vm8 = vnez %v14093_v39  ;;  %v14104_v32 = vld [vmem:[#allocation85_spill] sm:$0xff] }
 0x275   : > { %v4806_v0 = vsel %vm14094_vm8, %v4773_v29, 0  ;;  %v12225_v4 = vsel %vm14095_vm13, %v5538_v60, %v5547_v6  ;;  %v5570_v3 = vrot.slane %v5568_v30, 3  ;;  %v5573_v2 = vrot.slane %v5571_v35, 4 }
 0x276   : > { %v5559_v50 = vshrl.u32 %v7847_v48, 16  ;;  %v5562_v47 = vshll.u32 %v7847_v48, 16  ;;  %v12228_v63 = vsel %vm14096_vm3, %v5547_v6, %v5556_v21  ;;  %v14099_v46 = vsel %vm14007_vm0, %v14098_v19, 0  ;;  %v8427_v6 = vpop.f32.mrf.mxu1  ;;  %vm14111_vm0 = vmmov %vm14081_vm1 }
 0x277   : > { %v14102_v54 = vsel %vm13913_vm6, %v14101_v23, 0  ;;  %v14103_v60 = vcombine.low %v12047_v57, %v12049_v53  ;;  %v5466_v24 = vrot.slane %v5464_v33, 4  ;;  %v5574_v14 = vor.u32 %v5573_v2, %v5570_v3  ;;  %v14106_v33 = vld [vmem:[#allocation41_spill] sm:$0xff]  ;;  %vm14112_vm5 = vmmov %vm14111_vm0 }
 0x278   : > { %v5561_v42 = vrot.slane %v5559_v50, 3  ;;  %v5564_v15 = vrot.slane %v5562_v47, 4  ;;  %v7849_v29 = vcombine.low %v14102_v54, %v14099_v46  ;;  %v5586_v12 = vshrl.u32 %v14104_v32, 16  ;;  %v14108_v47 = vld [vmem:[#allocation39_spill] sm:$0xff]  ;;  %v2220_v2 = vpop.f32.mrf.mxu1  ;;  %v9257_v54 = vld [vmem:[#allocation2 + $0x84] sm:$0xf]  ;;  %vm14116_vm11 = vmmov %vm14111_vm0 }
 0x279   : > { %8642 = vmatmul.mubr.bf16.gmra.mxu1 %v14103_v60  ;;  %v5589_v62 = vshll.u32 %v14104_v32, 16  ;;  %v14105_v48 = vcombine.low %v12061_v52, %v11571_v37  ;;  %v7827_v17 = vcombine.low %v4806_v0, %v4806_v0  ;;  %v5024_v57 = vor.u32 %v5022_v9, %v12158_v28  ;;  %vm14117_vm2 = vmmov %vm14111_vm0 }
 0x27a   : > { %v5565_v30 = vor.u32 %v5564_v15, %v5561_v42  ;;  %v5577_v35 = vshrl.u32 %v7849_v29, 16  ;;  %v5580_v50 = vshll.u32 %v7849_v29, 16  ;;  %v5588_v34 = vrot.slane %v5586_v12, 3  ;;  %vm14119_vm1 = vmmov %vm14111_vm0 }
 0x27b   : > { %8645 = vmatprep.mubr.bf16.mxu1 %v14105_v48  ;;  %v5591_v53 = vrot.slane %v5589_v62, 4  ;;  %vm14107_vm6 = vnez %v14106_v33  ;;  %v14110_v37 = vsel %vm11279_vm7, %v12037_v11, 0  ;;  %v5028_v15 = vrot.slane %v5026_v51, 1  ;;  %vm14114_vm7 = vmmov %vm14077_vm4  ;;  %v9258_v33 = vld [vmem:[#allocation2 + $0x14] sm:$0xf] }
 0x27c   : > { %v14109_v3 = vsel %vm14107_vm6, %v14108_v47, 0  ;;  %v12260_v0 = vsel %vm14111_vm0, %v5556_v21, %v5565_v30  ;;  %v12263_v42 = vsel %vm14112_vm5, %v5565_v30, %v5574_v14  ;;  %v5579_v1 = vrot.slane %v5577_v35, 3  ;;  %v8428_v21 = vpop.f32.mrf.mxu1  ;;  %vm14118_vm4 = vmmov %vm14111_vm0  ;;  %v9259_v47 = vld [vmem:[#allocation2 + $0x18] sm:$0xf] }
 0x27d   : > { %v7851_v52 = vcombine.low %v14110_v37, %v14109_v3  ;;  %v5582_v9 = vrot.slane %v5580_v50, 4  ;;  %v5592_v13 = vor.u32 %v5591_v53, %v5588_v34  ;;  %v7802_v29 = vcombine.low %v9257_v54, %v14113_v26  ;;  %vm14120_vm10 = vmmov %vm14114_vm7  ;;  %v8475_v37 = vpop.f32.mrf.mxu0  ;;  %v9166_v54 = vld [vmem:[#allocation9 + $0x228] sm:$0xff]  }
 0x27e   : > { %v5021_v60 = vsel %vm14114_vm7, %v5016_v41, %v12158_v28  ;;  %v5034_v32 = vshll.u32 %v7827_v17, 16  ;;  %v5029_v62 = vsel %vm14115_vm15, %v5024_v57, %v5028_v15  ;;  %v5467_v48 = vor.u32 %v5466_v24, %v5463_v45  ;;  %v2223_v50 = vpop.f32.mrf.mxu1 }
 0x27f   : > { %v5595_v46 = vshrl.u32 %v7851_v52, 16  ;;  %v5598_v59 = vshll.u32 %v7851_v52, 16  ;;  %v5583_v12 = vor.u32 %v5582_v9, %v5579_v1  ;;  %8690 = vmatmul.mubr.bf16.gmra.mxu0 %v5021_v60  ;;  %v5030_v51 = vshrl.u32 %v12106_v8, 16  ;;  %v9164_v52 = vld [vmem:[#allocation9 + $0x230] sm:$0xff]   ;;  %v2681_v9 = vpop.f32.mrf.mxu0  ;;  %v9261_v60 = vld [vmem:[#allocation2 + $0x1c] sm:$0xf] }
 0x280   : > { %8693 = vmatprep.mubr.bf16.mxu0 %v5029_v62  ;;  %v5476_v28 = vsel %vm14118_vm4, %v5467_v48, %v12126_v27  ;;  %v5036_v24 = vrot.slane %v5034_v32, 1  ;;  %v8431_v17 = vpop.f32.mrf.mxu1  ;;  %v7861_v3 = vcombine.low %v9258_v33, %v9259_v47  ;;  %v12287_v27 = vadd.f32 %v8475_v37, %v8427_v6  ;;  %v9263_v62 = vld [vmem:[#allocation2 + $0x28] sm:$0xf]  ;;  %v9266_v47 = vld [vmem:[#allocation2 + $0x34] sm:$0xf]  ;;  %vm14142_vm4 = vmmov %vm14120_vm10 }
 0x281   : > { %v5597_v30 = vrot.slane %v5595_v46, 3  ;;  %v5600_v35 = vrot.slane %v5598_v59, 4  ;;  %v12273_v34 = vsel %vm14116_vm11, %v5574_v14, %v5583_v12  ;;  %v12276_v53 = vsel %vm14117_vm2, %v5583_v12, %v5592_v13  ;;  %8646 = vmatmul.mubr.bf16.gmra.mxu1 %v7802_v29  ;;  %v8476_v46 = vpop.f32.mrf.mxu0  ;;  %v9260_v29 = vld [vmem:[#allocation2 + $0x20] sm:$0xf]  ;;  %vm14139_vm11 = vmmov %vm14119_vm1 }
 0x282   : > { %8713 = vmatprep.mubr.bf16.mxu1 %v5476_v28  ;;  %v5032_v45 = vor.u32 %v5030_v51, %v5028_v15  ;;  %v2236_v57 = vpop.f32.mrf.mxu1  ;;  %v12290_v15 = vadd.f32 %v2681_v9, %v2220_v2  ;;  %v12294_v59 = vadd.f32 %v8476_v46, %v8428_v21  ;;  %v7862_v32 = vcombine.low %v9261_v60, %v9260_v29  ;;  %v9262_v2 = vld [vmem:[#allocation2 + $0x24] sm:$0xf]  ;;  %v9172_v51 = vld [vmem:[#allocation9 + $0x218] sm:$0xff]   ;;  %v9264_v28 = vld [vmem:[#allocation2 + $0x2c] sm:$0xf] }
 0x283   : > { %v12280_v41 = vor.u32 %v5600_v35, %v5597_v30  ;;  %v2684_v6 = vpop.f32.mrf.mxu0  ;;  %v7863_v48 = vcombine.low %v9262_v2, %v9263_v62  ;;  %v7867_v62 = vcombine.low %v11787_v56, %v11791_v43 }
 0x284   : > { %v5037_v14 = vsel %vm14120_vm10, %v5032_v45, %v5036_v24  ;;  %v8432_v1 = vpop.f32.mrf.mxu1  ;;  %v12296_v12 = vadd.f32 %v2684_v6, %v2223_v50  ;;  %v9265_v45 = vld [vmem:[#allocation2 + $0x30] sm:$0xf]  ;;  %v9178_v6 = vld [vmem:[#allocation9 + $0x208] sm:$0xff]  }
 0x285   : > { %v12284_v8 = vsel %vm14119_vm1, %v5592_v13, %v12280_v41  ;;  %v8479_v30 = vpop.f32.mrf.mxu0  ;;  %v7864_v24 = vcombine.low %v9264_v28, %v9265_v45  ;;  %v7868_v28 = vcombine.low %v11803_v7, %v11823_v25 }
 0x286   : > { %v2239_v13 = vpop.f32.mrf.mxu1  ;;  %v12300_v35 = vadd.f32 %v8479_v30, %v8431_v17  ;;  %v9175_v17 = vld [vmem:[#allocation9 + $0x210] sm:$0xff]  }
 0x287   : > { %8694 = vmatmul.mubr.bf16.gmra.mxu0 %v5037_v14  ;;  %v2697_v50 = vpop.f32.mrf.mxu0 }
 0x288   : > { %8761 = vmatprep.mubr.bf16.mxu0 %v7861_v3  ;;  %v8435_v26 = vpop.f32.mrf.mxu1  ;;  %v12302_v14 = vadd.f32 %v2697_v50, %v2236_v57  ;;  %v9267_v3 = vld [vmem:[#allocation2 + $0x38] sm:$0xf] }
 0x289   : > { %8714 = vmatmul.mubr.bf16.vlgmr.msra.gmra.mxu1 %v12139_v49  ;;  %v7865_v37 = vcombine.low %v9266_v47, %v9267_v3  ;;  %v12333_v47 = vld [vmem:[#allocation2 + $0x90] sm:$0xf] }
 0x28a   : > { %8794 = vmatpush3.bf16.msra.mxu1 %v12089_v38  ;;  %8717 = vmatprep.mubr.bf16.mxu1 %v12161_v18  ;;  %v2252_v49 = vpop.f32.mrf.mxu1  ;;  %v9169_v18 = vld [vmem:[#allocation9 + $0x220] sm:$0xff]  }
 0x28b   : > { %8795 = vmatprep.subr.bf16.mxu1 %v9164_v52 }
 0x28c   : > { %v8436_v38 = vpop.f32.mrf.mxu1 }
 0x28e   : > { %8796 = vmatpush3.bf16.msra.mxu1 %v9164_v52  ;;  %v2255_v21 = vpop.f32.mrf.mxu1 }
 0x28f   : > { %8762 = vmatmul.mubr.bf16.vlgmr.msra.gmra.mxu0 %v7862_v32  ;;  %8797 = vmatprep.subr.bf16.mxu1 %v9166_v54  ;;  %v9269_v32 = vld [vmem:[#allocation2 + $0x40] sm:$0xf] }
 0x290   : > { %8765 = vmatprep.mubr.bf16.mxu0 %v7863_v48  ;;  %v8439_v33 = vpop.f32.mrf.mxu1 }
 0x291   : > { %8718 = vmatmul.mubr.bf16.gmra.mxu1 %v12164_v20  ;;  %v8480_v20 = vpop.f32.mrf.mxu0 }
 0x292   : > { %8721 = vmatprep.mubr.bf16.mxu1 %v12177_v61  ;;  %8798 = vmatpush3.bf16.msra.mxu1 %v9166_v54  ;;  %v12304_v61 = vadd.f32 %v8480_v20, %v8432_v1  ;;  %v2268_v52 = vpop.f32.mrf.mxu1  ;;  %v9268_v1 = vld [vmem:[#allocation2 + $0x3c] sm:$0xf]  ;;  %v9270_v20 = vld [vmem:[#allocation2 + $0x60] sm:$0xf] }
 0x293   : > { %8799 = vmatprep.subr.bf16.mxu1 %v9169_v18  ;;  %v2700_v9 = vpop.f32.mrf.mxu0  ;;  %v7866_v2 = vcombine.low %v9268_v1, %v9269_v32 }
 0x294   : > { %v12307_v46 = vadd.f32 %v2700_v9, %v2239_v13  ;;  %v8440_v57 = vpop.f32.mrf.mxu1 }
 0x295   : > { %v8483_v29 = vpop.f32.mrf.mxu0 }
 0x296   : > { %8800 = vmatpush3.bf16.msra.mxu1 %v9169_v18  ;;  %v2271_v54 = vpop.f32.mrf.mxu1  ;;  %v12310_v60 = vadd.f32 %v8483_v29, %v8435_v26 }
 0x297   : > { %8766 = vmatmul.mubr.bf16.gmra.mxu0 %v7864_v24  ;;  %8801 = vmatprep.subr.bf16.mxu1 %v9172_v51  ;;  %v2713_v48 = vpop.f32.mrf.mxu0 }
 0x298   : > { %8769 = vmatprep.mubr.bf16.mxu0 %v7865_v37  ;;  %v12314_v13 = vadd.f32 %v2713_v48, %v2252_v49  ;;  %v6224_v48 = vld [vmem:[#allocation2 + $0x1c] sm:$0xf] }
 0x299   : > { %8722 = vmatmul.mubr.bf16.gmra.mxu1 %v12199_v55  ;;  %v8443_v55 = vpop.f32.mrf.mxu1  ;;  %v8484_v18 = vpop.f32.mrf.mxu0 }
 0x29a   : > { %8725 = vmatprep.mubr.bf16.mxu1 %v12203_v22  ;;  %8802 = vmatpush3.bf16.msra.mxu1 %v9172_v51  ;;  %v9181_v22 = vld [vmem:[#allocation9 + $0x200] sm:$0xff]   ;;  %v12317_v26 = vadd.f32 %v8484_v18, %v8436_v38 }
 0x29b   : > { %8803 = vmatprep.subr.bf16.mxu1 %v9175_v17  ;;  %v2284_v30 = vpop.f32.mrf.mxu1  ;;  %v2716_v51 = vpop.f32.mrf.mxu0  ;;  %v14125_v18 = vld [vmem:[#allocation20_spill] sm:$0xff] }
 0x29c   : > { %v12320_v56 = vadd.f32 %v2716_v51, %v2255_v21  ;;  %vm14126_vm13 = vcmp.ne.s16.totalorder %v14125_v18, 0  ;;  %v14127_v51 = vld [vmem:[#allocation26_spill] sm:$0xff] }
 0x29d   : > { %v8444_v50 = vpop.f32.mrf.mxu1  ;;  %v8487_v49 = vpop.f32.mrf.mxu0  ;;  %vm14128_vm3 = vnez %v14127_v51  ;;  %v6228_v51 = vld [vmem:[#allocation2 + $0x2c] sm:$0xf] }
 0x29e   : > { %8804 = vmatpush3.bf16.msra.mxu1 %v9175_v17  ;;  %v12326_v45 = vadd.f32 %v8487_v49, %v8439_v33  ;;  %v9271_v17 = vld [vmem:[#allocation2 + $0x64] sm:$0xf] }
 0x29f   : > { %8770 = vmatmul.mubr.bf16.gmra.mxu0 %v7866_v2  ;;  %8805 = vmatprep.subr.bf16.mxu1 %v9178_v6  ;;  %v12322_v43 = vpop.f32.mrf.mxu1  ;;  %v7871_v9 = vcombine.low %v9271_v17, %v14089_v5  ;;  %v14123_v2 = vld [vmem:[#allocation27_spill] sm:$0xff]  ;;  %v9273_v17 = vld [vmem:[#allocation2 + $0x74] sm:$0xf] }
 0x2a0   : > { %8773 = vmatprep.mubr.bf16.mxu0 %v7867_v62  ;;  %vm14124_vm9 = vnez %v14123_v2 }
 0x2a1   : > { %8726 = vmatmul.mubr.bf16.gmra.mxu1 %v12219_v36  ;;  %v7869_v36 = vcombine.low %v11825_v16, %v14075_v10  ;;  %v8447_v21 = vpop.f32.mrf.mxu1  ;;  %v14121_v10 = vld [vmem:[#allocation22_spill] sm:$0xff] }
 0x2a2   : > { %8729 = vmatprep.mubr.bf16.mxu1 %v12225_v4  ;;  %8806 = vmatpush3.bf16.msra.mxu1 %v9178_v6  ;;  %v2729_v4 = vpop.f32.mrf.mxu0  ;;  %vm14122_vm12 = vcmp.ne.s16.totalorder %v14121_v10, 0  ;;  %v6222_v6 = vld [vmem:[#allocation2 + $0x14] sm:$0xf]  ;;  %v14129_v10 = vld [vmem:[#allocation25_spill] sm:$0xff] }
 0x2a3   : > { %8807 = vmatprep.subr.bf16.mxu1 %v9181_v22  ;;  %v12330_v38 = vadd.f32 %v2729_v4, %v2268_v52  ;;  %v2300_v25 = vpop.f32.mrf.mxu1  ;;  %v5360_v37 = vsel %vm14122_vm12, %v12333_v47, 0  ;;  %v6223_v52 = vld [vmem:[#allocation2 + $0x18] sm:$0xf]  ;;  %vm14130_vm6 = vcmp.ne.s16.totalorder %v14129_v10, 0 }
 0x2a4   : > { %v8488_v24 = vpop.f32.mrf.mxu0  ;;  %v7852_v29 = vcombine.low %v5360_v37, %v5360_v37  ;;  %v6256_v62 = vsel %vm14124_vm9, %v6223_v52, 0  ;;  %v9272_v37 = vld [vmem:[#allocation2 + $0x70] sm:$0xf]  ;;  %v6227_v52 = vld [vmem:[#allocation2 + $0x28] sm:$0xf]  ;;  %vm14149_vm9 = vmmov %vm14142_vm4 }
 0x2a5   : > { %v12336_v7 = vadd.f32 %v8488_v24, %v8440_v57  ;;  %v12340_v16 = vpop.f32.mrf.mxu1 }
 0x2a6   : > { %8808 = vmatpush3.bf16.msra.mxu1 %v9181_v22  ;;  %v2732_v33 = vpop.f32.mrf.mxu0 }
 0x2a7   : > { %8774 = vmatmul.mubr.bf16.gmra.mxu0 %v7868_v28  ;;  %v12338_v3 = vadd.f32 %v2732_v33, %v2271_v54  ;;  %v6225_v54 = vld [vmem:[#allocation2 + $0x20] sm:$0xf]  ;;  %v5607_v33 = vshll.u32 %v7852_v29, 16 }
 0x2a8   : > { %8777 = vmatprep.mubr.bf16.mxu0 %v7869_v36  ;;  %v8491_v57 = vpop.f32.mrf.mxu0  ;;  %v6258_v49 = vsel %vm14128_vm3, %v6225_v54, 0  ;;  %v6226_v54 = vld [vmem:[#allocation2 + $0x24] sm:$0xf]  ;;  %vm14152_vm3 = vmmov %vm14142_vm4 }
 0x2a9   : > { %8730 = vmatmul.mubr.bf16.gmra.mxu1 %v12228_v63  ;;  %v7870_v63 = vcombine.low %v14072_v58, %v9270_v20  ;;  %v12349_v1 = vadd.f32 %v8491_v57, %v8443_v55  ;;  %v6255_v55 = vsel %vm14126_vm13, %v6222_v6, 0  ;;  %v7872_v20 = vcombine.low %v14085_v44, %v9272_v37 }
 0x2aa   : > { %8733 = vmatprep.mubr.bf16.mxu1 %v12260_v0  ;;  %v12347_v0 = vpop.f32.mrf.mxu1  ;;  %v2745_v58 = vpop.f32.mrf.mxu0  ;;  %v7885_v36 = vcombine.low %v6255_v55, %v6256_v62  ;;  %v5609_v44 = vrot.slane %v5607_v33, 4 }
 0x2ab   : > { %v12357_v5 = vadd.f32 %v2745_v58, %v2284_v30 }
 0x2ac   : > { %v12351_v32 = vpop.f32.mrf.mxu1  ;;  %v8492_v28 = vpop.f32.mrf.mxu0  ;;  %v6390_v6 = vshll.u32 %v7885_v36, 16 }
 0x2ad   : > { %v12365_v4 = vadd.f32 %v8492_v28, %v8444_v50  ;;  %v14133_v28 = vld [vmem:[#allocation38_spill] sm:$0xff] }
 0x2ae   : > { %v12359_v22 = vpop.f32.mrf.mxu1  ;;  %v12371_v30 = vpop.f32.mrf.mxu0  ;;  %vm14134_vm5 = vcmp.ne.s16.totalorder %v14133_v28, 0  ;;  %v6392_v37 = vrot.slane %v6390_v6, 1  ;;  %v6231_v6 = vld [vmem:[#allocation2 + $0x38] sm:$0xf] }
 0x2af   : > { %8778 = vmatmul.mubr.bf16.gmra.mxu0 %v7870_v63  ;;  %v6259_v10 = vsel %vm14134_vm5, %v6226_v54, 0 }
 0x2b0   : > { %8781 = vmatprep.mubr.bf16.mxu0 %v7871_v9  ;;  %v12367_v24 = vpop.f32.mrf.mxu1  ;;  %v7873_v9 = vcombine.low %v9273_v17, %v14101_v23  ;;  %v8495_v57 = vpop.f32.mrf.mxu0 }
 0x2b1   : > { %8734 = vmatmul.mubr.bf16.gmra.mxu1 %v12263_v42  ;;  %v5604_v42 = vshrl.u32 %v7852_v29, 16  ;;  %v6229_v29 = vld [vmem:[#allocation2 + $0x30] sm:$0xf]  ;;  %v12379_v2 = vadd.f32 %v8495_v57, %v8447_v21  ;;  %v9274_v57 = vld [vmem:[#allocation2 + $0x80] sm:$0xf] }
 0x2b2   : > { %8737 = vmatprep.mubr.bf16.mxu1 %v12273_v34  ;;  %v6257_v34 = vsel %vm14130_vm6, %v6224_v48, 0  ;;  %v12377_v50 = vpop.f32.mrf.mxu1  ;;  %v14131_v48 = vld [vmem:[#allocation40_spill] sm:$0xff]  ;;  %v2761_v23 = vpop.f32.mrf.mxu0  ;;  %v7874_v54 = vcombine.low %v14098_v19, %v9274_v57 }
 0x2b3   : > { %v12374_v63 = vcombine.low %v6257_v34, %v6258_v49  ;;  %v5606_v58 = vrot.slane %v5604_v42, 3  ;;  %vm14132_vm0 = vnez %v14131_v48  ;;  %v12388_v49 = vadd.f32 %v2761_v23, %v2300_v25  ;;  %v14135_v42 = vld [vmem:[#allocation42_spill] sm:$0xff] }
 0x2b4   : > { %v12381_v62 = vpop.f32.mrf.mxu1  ;;  %v6260_v18 = vsel %vm14132_vm0, %v6227_v52, 0  ;;  %vm14136_vm7 = vnez %v14135_v42  ;;  %v8496_v34 = vpop.f32.mrf.mxu0  ;;  %v6388_v48 = vshrl.u32 %v7885_v36, 16  ;;  %v6233_v42 = vld [vmem:[#allocation2 + $0x40] sm:$0xf] }
 0x2b5   : > { %v6395_v55 = vshll.u32 %v12374_v63, 16  ;;  %v6262_v33 = vsel %vm14136_vm7, %v6229_v29, 0  ;;  %v5610_v52 = vor.u32 %v5609_v44, %v5606_v58  ;;  %vm14160_vm7 = vmmov %vm14152_vm3 }
 0x2b6   : > { %v12390_v21 = vpop.f32.mrf.mxu1  ;;  %v6393_v58 = vor.u32 %v6392_v37, %v6388_v48  ;;  %v9276_v48 = vld [vmem:[#allocation2 + $0x8c] sm:$0xf] }
 0x2b7   : > { %8782 = vmatmul.mubr.bf16.gmra.mxu0 %v7872_v20  ;;  %v7887_v20 = vcombine.low %v6259_v10, %v6260_v18  ;;  %v6397_v23 = vrot.slane %v6395_v55, 1  ;;  %v9275_v18 = vld [vmem:[#allocation2 + $0x84] sm:$0xf]  ;;  %v6230_v10 = vld [vmem:[#allocation2 + $0x34] sm:$0xf]  ;;  %v5611_v19 = vsel %vm14139_vm11, %v12280_v41, %v5610_v52  ;;  %v14140_v55 = vld [vmem:[#allocation43_spill] sm:$0xff] }
 0x2b8   : > { %8785 = vmatprep.mubr.bf16.mxu0 %v7873_v9  ;;  %v12399_v17 = vpop.f32.mrf.mxu1  ;;  %v12403_v9 = vpop.f32.mrf.mxu0  ;;  %vm14141_vm2 = vnez %v14140_v55  ;;  %v14145_v52 = vld [vmem:[#allocation73_spill] sm:$0xff]  ;;  %vm14163_vm11 = vmmov %vm14152_vm3 }
 0x2b9   : > { %8738 = vmatmul.mubr.bf16.gmra.mxu1 %v12276_v53  ;;  %v12397_v53 = vadd.f32 %v8496_v34, %v12340_v16  ;;  %v7875_v16 = vcombine.low %v9275_v18, %v12037_v11  ;;  %v6403_v44 = vshll.u32 %v7887_v20, 16  ;;  %v6398_v11 = vsel %vm14142_vm4, %v6393_v58, %v6397_v23 }
 0x2ba   : > { %8741 = vmatprep.mubr.bf16.mxu1 %v12284_v8  ;;  %v14137_v8 = vld [vmem:[#allocation45_spill] sm:$0xff]  ;;  %v8499_v28 = vpop.f32.mrf.mxu0  ;;  %v12414_v36 = vpop.f32.mrf.mxu1  ;;  %vm14146_vm10 = vnez %v14145_v52 }
 0x2bb   : > { %vm14138_vm15 = vcmp.ne.s16.totalorder %v14137_v8, 0  ;;  %v6232_v8 = vld [vmem:[#allocation2 + $0x3c] sm:$0xf]  ;;  %v6266_v57 = vsel %vm14146_vm10, %v6233_v42, 0  ;;  %v6405_v18 = vrot.slane %v6403_v44, 1  ;;  %v6407_v42 = vshrl.u32 %v7887_v20, 16  ;;  %vm14171_vm10 = vmmov %vm14152_vm3 }
 0x2bc   : > { %v6261_v25 = vsel %vm14138_vm15, %v6228_v51, 0  ;;  %v12410_v51 = vadd.f32 %v8499_v28, %v12351_v32  ;;  %v2777_v34 = vpop.f32.mrf.mxu0  ;;  %v6399_v28 = vshrl.u32 %v12374_v63, 16 }
 0x2bd   : > { %v12406_v29 = vcombine.low %v6261_v25, %v6262_v33  ;;  %v6264_v33 = vsel %vm14141_vm2, %v6231_v6, 0  ;;  %v12421_v32 = vadd.f32 %v2777_v34, %v12359_v22  ;;  %v14143_v25 = vld [vmem:[#allocation46_spill] sm:$0xff]  ;;  %v7876_v6 = vcombine.low %v9276_v48, %v12333_v47  ;;  %v14147_v22 = vld [vmem:[#allocation49_spill] sm:$0xff] }
 0x2be   : > { %vm14144_vm1 = vcmp.ne.s16.totalorder %v14143_v25, 0  ;;  %vm14148_vm12 = vcmp.ne.s16.totalorder %v14147_v22, 0  ;;  %v6235_v47 = vld [vmem:[#allocation2 + $0x48] sm:$0xf]  ;;  %v6401_v44 = vor.u32 %v6399_v28, %v6397_v23  ;;  %v6409_v63 = vor.u32 %v6407_v42, %v6405_v18  ;;  %v6237_v48 = vld [vmem:[#allocation2 + $0x50] sm:$0xf] }
 0x2bf   : > { %8786 = vmatmul.mubr.bf16.gmra.mxu0 %v7874_v54  ;;  %v6411_v37 = vshll.u32 %v12406_v29, 16  ;;  %v6263_v41 = vsel %vm14144_vm1, %v6230_v10, 0  ;;  %v8500_v54 = vpop.f32.mrf.mxu0  ;;  %v6265_v55 = vsel %vm14148_vm12, %v6232_v8, 0  ;;  %v14155_v42 = vld [vmem:[#allocation48_spill] sm:$0xff] }
 0x2c0   : > { %8789 = vmatprep.mubr.bf16.mxu0 %v7875_v16  ;;  %v7889_v16 = vcombine.low %v6263_v41, %v6264_v33  ;;  %v12430_v58 = vadd.f32 %v8500_v54, %v12367_v24  ;;  %v12437_v25 = vcombine.low %v6265_v55, %v6266_v57  ;;  %v6234_v54 = vld [vmem:[#allocation2 + $0x44] sm:$0xf]  ;;  %v14153_v55 = vld [vmem:[#allocation50_spill] sm:$0xff]  ;;  %vm14156_vm0 = vnez %v14155_v42 }
 0x2c1   : > { %8742 = vmatmul.mubr.bf16.gmra.mxu1 %v5611_v19  ;;  %v8523_v19 = vpop.f32.mrf.mxu1  ;;  %v6413_v34 = vrot.slane %v6411_v37, 1  ;;  %v14150_v37 = vld [vmem:[#allocation47_spill] sm:$0xff]  ;;  %vm14154_vm6 = vcmp.ne.s16.totalorder %v14153_v55, 0 }
 0x2c2   : > { %8809 = vmatprep.mubr.bf16.mxu1 %v6398_v11  ;;  %v12434_v11 = vpop.f32.mrf.mxu0  ;;  %v3784_v10 = vadd.f32 %v8523_v19, %v12287_v27  ;;  %v6419_v52 = vshll.u32 %v7889_v16, 16  ;;  %v6406_v27 = vsel %vm14149_vm9, %v6401_v44, %v6405_v18  ;;  %vm14151_vm13 = vnez %v14150_v37  ;;  %v6236_v19 = vld [vmem:[#allocation2 + $0x4c] sm:$0xf]  ;;  %vm14174_vm9 = vmmov %vm14152_vm3 }
 0x2c3   : > { %v3655_v33 = vpop.f32.mrf.mxu1  ;;  %v6268_v57 = vsel %vm14151_vm13, %v6235_v47, 0  ;;  %v6414_v23 = vsel %vm14152_vm3, %v6409_v63, %v6413_v34  ;;  %v6267_v18 = vsel %vm14154_vm6, %v6234_v54, 0  ;;  %v6270_v47 = vsel %vm14156_vm0, %v6237_v48, 0  ;;  %vm14179_vm0 = vmmov %vm14160_vm7 }
 0x2c4   : > { %v8503_v41 = vpop.f32.mrf.mxu0  ;;  %v3782_v24 = vadd.f32 %v3655_v33, %v12290_v15  ;;  %v6427_v15 = vshll.u32 %v12437_v25, 16  ;;  %v6423_v48 = vshrl.u32 %v7889_v16, 16  ;;  %vm14177_vm3 = vnez %v14016_v31 }
 0x2c5   : > { %v12441_v8 = vadd.f32 %v8503_v41, %v12381_v62  ;;  %v8524_v20 = vpop.f32.mrf.mxu1  ;;  %v6421_v41 = vrot.slane %v6419_v52, 1  ;;  %vm14178_vm6 = vcmp.ne.s16.totalorder %v14014_v40, 0  ;;  %v6246_v40 = vld [vmem:[#allocation2 + $0x74] sm:$0xf] }
 0x2c6   : > { %v2793_v28 = vpop.f32.mrf.mxu0 }
 0x2c7   : > { %8790 = vmatmul.mubr.bf16.gmra.mxu0 %v7876_v6  ;;  %v3785_v6 = vadd.f32 %v8524_v20, %v12294_v59  ;;  %v12450_v22 = vadd.f32 %v2793_v28, %v12390_v21  ;;  %v3658_v62 = vpop.f32.mrf.mxu1  ;;  %v7891_v59 = vcombine.low %v6267_v18, %v6268_v57  ;;  %v6415_v21 = vshrl.u32 %v12406_v29, 16  ;;  %v14158_v20 = vld [vmem:[#allocation54_spill] sm:$0xff] }
 0x2c8   : > { %v8504_v44 = vpop.f32.mrf.mxu0  ;;  %v12457_v33 = vadd.f32 %v3658_v62, %v12296_v12  ;;  %vm14159_vm5 = vcmp.ne.s16.totalorder %v14158_v20, 0  ;;  %v6429_v28 = vrot.slane %v6427_v15, 1  ;;  %v6239_v12 = vld [vmem:[#allocation2 + $0x58] sm:$0xf]  ;;  %v6238_v29 = vld [vmem:[#allocation2 + $0x54] sm:$0xf] }
 0x2c9   : > { %8810 = vmatmul.mubr.bf16.vlgmr.msra.gmra.mxu1 %v6406_v27  ;;  %v12460_v63 = vadd.f32 %v8504_v44, %v12399_v17  ;;  %v8527_v27 = vpop.f32.mrf.mxu1  ;;  %v6269_v37 = vsel %vm14159_vm5, %v6236_v19, 0  ;;  %v6417_v52 = vor.u32 %v6415_v21, %v6413_v34  ;;  %v6425_v17 = vor.u32 %v6423_v48, %v6421_v41  ;;  %v6241_v44 = vld [vmem:[#allocation2 + $0x60] sm:$0xf]  ;;  %v14166_v48 = vld [vmem:[#allocation51_spill] sm:$0xff] }
 0x2ca   : > { %8813 = vmatprep.mubr.bf16.mxu1 %v6414_v23  ;;  %14157 = vst [vmem:[#allocation29_spill] sm:$0xff] %v12457_v33  ;;  %v12465_v23 = vpop.f32.mrf.mxu0  ;;  %v3788_v54 = vadd.f32 %v8527_v27, %v12300_v35  ;;  %v12468_v55 = vcombine.low %v6269_v37, %v6270_v47  ;;  %v6435_v42 = vshll.u32 %v7891_v59, 16  ;;  %v14161_v35 = vld [vmem:[#allocation44_spill] sm:$0xff]  ;;  %vm14167_vm4 = vnez %v14166_v48 }
 0x2cb   : > { %v3671_v57 = vpop.f32.mrf.mxu1  ;;  %v6422_v19 = vsel %vm14160_vm7, %v6417_v52, %v6421_v41  ;;  %vm14162_vm15 = vnez %v14161_v35  ;;  %v6430_v15 = vsel %vm14163_vm11, %v6425_v17, %v6429_v28  ;;  %v14164_v37 = vld [vmem:[#allocation56_spill] sm:$0xff]  ;;  %v6274_v52 = vsel %vm14167_vm4, %v6241_v44, 0  ;;  %vm14182_vm7 = vmmov %vm14179_vm0 }
 0x2cc   : > { %v8571_v62 = vpop.f32.mrf.mxu0  ;;  %v3786_v18 = vadd.f32 %v3671_v57, %v12302_v14  ;;  %v6272_v16 = vsel %vm14162_vm15, %v6239_v12, 0  ;;  %v6443_v27 = vshll.u32 %v12468_v55, 16  ;;  %v6240_v14 = vld [vmem:[#allocation2 + $0x5c] sm:$0xf]  ;;  %vm14165_vm2 = vcmp.ne.s16.totalorder %v14164_v37, 0 }
 0x2cd   : > { %v12471_v20 = vadd.f32 %v8571_v62, %v3784_v10  ;;  %v8528_v33 = vpop.f32.mrf.mxu1  ;;  %v6271_v41 = vsel %vm14165_vm2, %v6238_v29, 0  ;;  %v6437_v62 = vrot.slane %v6435_v42, 1  ;;  %vm14191_vm2 = vmmov %vm14179_vm0 }
 0x2ce   : > { %v4229_v34 = vpop.f32.mrf.mxu0  ;;  %v3789_v47 = vadd.f32 %v8528_v33, %v12304_v61  ;;  %v7893_v17 = vcombine.low %v6271_v41, %v6272_v16  ;;  %v6445_v44 = vrot.slane %v6443_v27, 1  ;;  %v9185_v27 = vld [vmem:[#allocation12 + $0x38] sm:$0xff]  }
 0x2cf   : > { %v12479_v21 = vadd.f32 %v4229_v34, %v3782_v24  ;;  %v3674_v10 = vpop.f32.mrf.mxu1  ;;  %v14169_v24 = vld [vmem:[#allocation58_spill] sm:$0xff]  ;;  %v6439_v34 = vshrl.u32 %v7891_v59, 16  ;;  %8841 = vmatprep.subr.bf16.mxu0 %v9185_v27 }
 0x2d0   : > { %v8572_v12 = vpop.f32.mrf.mxu0  ;;  %v12486_v57 = vadd.f32 %v3674_v10, %v12307_v46  ;;  %vm14170_vm1 = vcmp.ne.s16.totalorder %v14169_v24, 0  ;;  %v6243_v46 = vld [vmem:[#allocation2 + $0x68] sm:$0xf]  ;;  %v6451_v48 = vshll.u32 %v7893_v17, 16  ;;  %8842 = vmatpush3.bf16.msra.mxu0 %v9185_v27 }
 0x2d1   : > { %8814 = vmatmul.mubr.bf16.gmra.mxu1 %v6422_v19  ;;  %v12488_v61 = vadd.f32 %v8572_v12, %v3785_v6  ;;  %v8531_v33 = vpop.f32.mrf.mxu1  ;;  %v6431_v19 = vshrl.u32 %v12437_v25, 16  ;;  %v6273_v35 = vsel %vm14170_vm1, %v6240_v14, 0  ;;  %v6441_v6 = vor.u32 %v6439_v34, %v6437_v62  ;;  %v6242_v25 = vld [vmem:[#allocation2 + $0x64] sm:$0xf]  ;;  %v6245_v12 = vld [vmem:[#allocation2 + $0x70] sm:$0xf]  ;;  %vm14194_vm1 = vmmov %vm14179_vm0 }
 0x2d2   : > { %8817 = vmatprep.mubr.bf16.mxu1 %v6430_v15  ;;  %14168 = vst [vmem:[#allocation104_spill] sm:$0xff] %v12486_v57  ;;  %v12493_v15 = vpop.f32.mrf.mxu0  ;;  %v3792_v29 = vadd.f32 %v8531_v33, %v12310_v60  ;;  %v12496_v37 = vcombine.low %v6273_v35, %v6274_v52  ;;  %v14172_v60 = vld [vmem:[#allocation75_spill] sm:$0xff]  ;;  %v6244_v35 = vld [vmem:[#allocation2 + $0x6c] sm:$0xf] }
 0x2d3   : > { %v6433_v10 = vor.u32 %v6431_v19, %v6429_v28  ;;  %v3687_v42 = vpop.f32.mrf.mxu1  ;;  %vm14173_vm12 = vnez %v14172_v60  ;;  %v9186_v52 = vld [vmem:[#allocation11 + $0x38] sm:$0xff]   ;;  %v6446_v28 = vsel %vm14174_vm9, %v6441_v6, %v6445_v44  ;;  %v6453_v6 = vrot.slane %v6451_v48, 1  ;;  %vm14200_vm9 = vmmov %vm14179_vm0 }
 0x2d4   : > { %v8575_v16 = vpop.f32.mrf.mxu0  ;;  %v3790_v41 = vadd.f32 %v3687_v42, %v12314_v13  ;;  %v6276_v59 = vsel %vm14173_vm12, %v6243_v46, 0  ;;  %v6459_v13 = vshll.u32 %v12496_v37, 16  ;;  %v6278_v46 = vsel %vm14177_vm3, %v6245_v12, 0  ;;  %8889 = vmatprep.subr.bf16.mxu1 %v9186_v52  ;;  %vm14203_vm3 = vmmov %vm14179_vm0 }
 0x2d5   : > { %v12499_v24 = vadd.f32 %v8575_v16, %v3788_v54  ;;  %v6438_v14 = vsel %vm14171_vm10, %v6433_v10, %v6437_v62  ;;  %v8532_v57 = vpop.f32.mrf.mxu1  ;;  %v14175_v62 = vld [vmem:[#allocation59_spill] sm:$0xff]  ;;  %8890 = vmatpush3.bf16.msra.mxu1 %v9186_v52 }
 0x2d6   : > { %v4245_v33 = vpop.f32.mrf.mxu0  ;;  %v3793_v19 = vadd.f32 %v8532_v57, %v12317_v26  ;;  %vm14176_vm13 = vcmp.ne.s16.totalorder %v14175_v62, 0  ;;  %v6461_v60 = vrot.slane %v6459_v13, 1 }
 0x2d7   : > { %v12507_v54 = vadd.f32 %v4245_v33, %v3786_v18  ;;  %v3690_v34 = vpop.f32.mrf.mxu1  ;;  %v6275_v10 = vsel %vm14176_vm13, %v6242_v25, 0  ;;  %v6277_v25 = vsel %vm14178_vm6, %v6244_v35, 0  ;;  %v6249_v35 = vld [vmem:[#allocation2 + $0x80] sm:$0xf]  ;;  %vm14201_vm13 = vmmov %vm14179_vm0 }
 0x2d8   : > { %v8576_v42 = vpop.f32.mrf.mxu0  ;;  %v12514_v16 = vadd.f32 %v3690_v34, %v12320_v56  ;;  %v12516_v26 = vcombine.low %v6275_v10, %v6276_v59  ;;  %v6455_v56 = vshrl.u32 %v7893_v17, 16  ;;  %v12526_v48 = vcombine.low %v6277_v25, %v6278_v46  ;;  %v6247_v59 = vld [vmem:[#allocation2 + $0x78] sm:$0xf]  ;;  %v9187_v10 = vld [vmem:[#allocation12 + $0x30] sm:$0xff]   ;;  %vm14204_vm6 = vmmov %vm14179_vm0 }
 0x2d9   : > { %8818 = vmatmul.mubr.bf16.gmra.mxu1 %v6438_v14  ;;  %v12518_v57 = vadd.f32 %v8576_v42, %v3789_v47  ;;  %v8535_v18 = vpop.f32.mrf.mxu1  ;;  %v6447_v14 = vshrl.u32 %v12468_v55, 16  ;;  %v14180_v17 = vld [vmem:[#allocation55_spill] sm:$0xff]  ;;  %v9188_v46 = vld [vmem:[#allocation11 + $0x30] sm:$0xff]   ;;  %8843 = vmatprep.subr.bf16.mxu0 %v9187_v10 }
 0x2da   : > { %8821 = vmatprep.mubr.bf16.mxu1 %v6446_v28  ;;  %v12523_v31 = vpop.f32.mrf.mxu0  ;;  %v3796_v12 = vadd.f32 %v8535_v18, %v12326_v45  ;;  %v6457_v33 = vor.u32 %v6455_v56, %v6453_v6  ;;  %v6467_v55 = vshll.u32 %v12516_v26, 16  ;;  %vm14181_vm5 = vnez %v14180_v17  ;;  %8891 = vmatprep.subr.bf16.mxu1 %v9188_v46 }
 0x2db   : > { %v6449_v28 = vor.u32 %v6447_v14, %v6445_v44  ;;  %v3703_v27 = vpop.f32.mrf.mxu1  ;;  %v6280_v13 = vsel %vm14181_vm5, %v6247_v59, 0  ;;  %v6475_v18 = vshll.u32 %v12526_v48, 16  ;;  %v6248_v14 = vld [vmem:[#allocation2 + $0x7c] sm:$0xf]  ;;  %v6282_v59 = vsel %vm14023_vm14, %v6249_v35, 0  ;;  %8844 = vmatpush3.bf16.msra.mxu0 %v9187_v10  ;;  %8892 = vmatpush3.bf16.msra.mxu1 %v9188_v46 }
 0x2dc   : > { %v8579_v47 = vpop.f32.mrf.mxu0  ;;  %v3794_v34 = vadd.f32 %v3703_v27, %v12330_v38  ;;  %v6462_v44 = vsel %vm14182_vm7, %v6457_v33, %v6461_v60  ;;  %v6469_v33 = vrot.slane %v6467_v55, 1  ;;  %v6463_v17 = vshrl.u32 %v12496_v37, 16 }
 0x2dd   : > { %v12530_v52 = vadd.f32 %v8579_v47, %v3792_v29  ;;  %v6454_v62 = vsel %vm14179_vm0, %v6449_v28, %v6453_v6  ;;  %v8536_v45 = vpop.f32.mrf.mxu1  ;;  %v14183_v6 = vld [vmem:[#allocation84_spill] sm:$0xff]  ;;  %v6477_v55 = vrot.slane %v6475_v18, 1 }
 0x2de   : > { %v4261_v42 = vpop.f32.mrf.mxu0  ;;  %v3797_v38 = vadd.f32 %v8536_v45, %v12336_v7  ;;  %vm14184_vm15 = vcmp.ne.s16.totalorder %v14183_v6, 0  ;;  %v6465_v10 = vor.u32 %v6463_v17, %v6461_v60  ;;  %v14189_v6 = vld [vmem:[#allocation66_spill] sm:$0xff]  ;;  %v14192_v18 = vld [vmem:[#allocation96_spill] sm:$0xff]  ;;  %v9189_v60 = vld [vmem:[#allocation12 + $0x28] sm:$0xff]  }
 0x2df   : > { %v12538_v29 = vadd.f32 %v4261_v42, %v3790_v41  ;;  %v3706_v25 = vpop.f32.mrf.mxu1  ;;  %v6279_v56 = vsel %vm14184_vm15, %v6246_v40, 0  ;;  %vm14190_vm14 = vcmp.ne.s16.totalorder %v14189_v6, 0  ;;  %vm14193_vm4 = vnez %v14192_v18  ;;  %v14197_v6 = vld [vmem:[#allocation90_spill] sm:$0xff]  ;;  %8845 = vmatprep.subr.bf16.mxu0 %v9189_v60 }
 0x2e0   : > { %v8580_v27 = vpop.f32.mrf.mxu0  ;;  %v12545_v47 = vadd.f32 %v3706_v25, %v12338_v3  ;;  %v7897_v7 = vcombine.low %v6279_v56, %v6280_v13  ;;  %v6471_v3 = vshrl.u32 %v12516_v26, 16  ;;  %v6251_v25 = vld [vmem:[#allocation2 + $0x88] sm:$0xf]  ;;  %vm14198_vm12 = vnez %v14197_v6  ;;  %8846 = vmatpush3.bf16.msra.mxu0 %v9189_v60 }
 0x2e1   : > { %8822 = vmatmul.mubr.bf16.gmra.mxu1 %v6454_v62  ;;  %v6250_v62 = vld [vmem:[#allocation2 + $0x84] sm:$0xf]  ;;  %v12547_v45 = vadd.f32 %v8580_v27, %v3793_v19  ;;  %v8539_v41 = vpop.f32.mrf.mxu1  ;;  %v6252_v27 = vld [vmem:[#allocation2 + $0x8c] sm:$0xf] }
 0x2e2   : > { %8825 = vmatprep.mubr.bf16.mxu1 %v6462_v44  ;;  %14186 = vst [vmem:[#allocation67_spill] sm:$0xff] %v12545_v47  ;;  %v14187_v44 = vld [vmem:[#allocation100_spill] sm:$0xff]  ;;  %v12552_v35 = vpop.f32.mrf.mxu0  ;;  %v3800_v42 = vadd.f32 %v8539_v41, %v12349_v1  ;;  %v6283_v56 = vsel %vm14190_vm14, %v6250_v62, 0  ;;  %v6473_v28 = vor.u32 %v6471_v3, %v6469_v33  ;;  %v6483_v46 = vshll.u32 %v7897_v7, 16  ;;  %v9190_v41 = vld [vmem:[#allocation11 + $0x28] sm:$0xff]  }
 0x2e3   : > { %vm14188_vm11 = vcmp.ne.s16.totalorder %v14187_v44, 0  ;;  %v3719_v19 = vpop.f32.mrf.mxu1  ;;  %v6253_v44 = vld [vmem:[#allocation2 + $0x90] sm:$0xf]  ;;  %v6470_v1 = vsel %vm14191_vm2, %v6465_v10, %v6469_v33  ;;  %v14195_v33 = vld [vmem:[#allocation87_spill] sm:$0xff]  ;;  %8893 = vmatprep.subr.bf16.mxu1 %v9190_v41 }
 0x2e4   : > { %v6281_v40 = vsel %vm14188_vm11, %v6248_v14, 0  ;;  %v8583_v37 = vpop.f32.mrf.mxu0  ;;  %v3798_v14 = vadd.f32 %v3719_v19, %v12357_v5  ;;  %v6478_v62 = vsel %vm14194_vm1, %v6473_v28, %v6477_v55  ;;  %vm14196_vm10 = vcmp.ne.s16.totalorder %v14195_v33, 0  ;;  %8894 = vmatpush3.bf16.msra.mxu1 %v9190_v41 }
 0x2e5   : > { %v12556_v13 = vcombine.low %v6281_v40, %v6282_v59  ;;  %v12561_v47 = vadd.f32 %v8583_v37, %v3796_v12  ;;  %v8540_v26 = vpop.f32.mrf.mxu1  ;;  %v6284_v59 = vsel %vm14193_vm4, %v6251_v25, 0  ;;  %v6285_v10 = vsel %vm14196_vm10, %v6252_v27, 0 }
 0x2e6   : > { %v4277_v17 = vpop.f32.mrf.mxu0  ;;  %v3801_v40 = vadd.f32 %v8540_v26, %v12365_v4  ;;  %v7899_v3 = vcombine.low %v6283_v56, %v6284_v59  ;;  %v6286_v25 = vsel %vm14198_vm12, %v6253_v44, 0  ;;  %v6479_v56 = vshrl.u32 %v12526_v48, 16 }
 0x2e7   : > { %v6491_v5 = vshll.u32 %v12556_v13, 16  ;;  %v12569_v12 = vadd.f32 %v4277_v17, %v3794_v34  ;;  %v3722_v19 = vpop.f32.mrf.mxu1  ;;  %v6487_v26 = vshrl.u32 %v7897_v7, 16  ;;  %v6254_v34 = vld [vmem:[#allocation2 + $0x94] sm:$0x1]  ;;  %v7900_v44 = vcombine.low %v6285_v10, %v6286_v25 }
 0x2e8   : > { %v8584_v37 = vpop.f32.mrf.mxu0  ;;  %v6481_v17 = vor.u32 %v6479_v56, %v6477_v55  ;;  %v6287_v60 = vsel %vm14094_vm8, %v6254_v34, 0  ;;  %v6503_v56 = vshrl.u32 %v7899_v3, 16  ;;  %vm14202_vm8 = vmmov %vm14179_vm0 }
 0x2e9   : > { %8826 = vmatmul.mubr.bf16.gmra.mxu1 %v6470_v1  ;;  %v6485_v1 = vrot.slane %v6483_v46, 1  ;;  %v12575_v28 = vadd.f32 %v8584_v37, %v3797_v38  ;;  %v8543_v4 = vpop.f32.mrf.mxu1  ;;  %v6493_v59 = vrot.slane %v6491_v5, 1  ;;  %v9191_v37 = vld [vmem:[#allocation12 + $0x20] sm:$0xff]   ;;  %v6507_v25 = vshll.u32 %v7900_v44, 16 }
 0x2ea   : > { %8829 = vmatprep.mubr.bf16.mxu1 %v6478_v62  ;;  %v12578_v18 = vpop.f32.mrf.mxu0  ;;  %v3804_v27 = vadd.f32 %v8543_v4, %v12379_v2  ;;  %v6499_v62 = vshll.u32 %v7899_v3, 16  ;;  %8847 = vmatprep.subr.bf16.mxu0 %v9191_v37 }
 0x2eb   : > { %14199 = vst [vmem:[#allocation69_spill] sm:$0xff] %v12578_v18  ;;  %v3735_v33 = vpop.f32.mrf.mxu1  ;;  %v6489_v6 = vor.u32 %v6487_v26, %v6485_v1  ;;  %v6486_v7 = vsel %vm14200_vm9, %v6481_v17, %v6485_v1  ;;  %v9192_v18 = vld [vmem:[#allocation11 + $0x20] sm:$0xff]   ;;  %v7901_v1 = vcombine.low %v6287_v60, %v6287_v60  ;;  %8848 = vmatpush3.bf16.msra.mxu0 %v9191_v37 }
 0x2ec   : > { %v8587_v46 = vpop.f32.mrf.mxu0  ;;  %v3802_v38 = vadd.f32 %v3735_v33, %v12388_v49  ;;  %v6501_v10 = vrot.slane %v6499_v62, 1  ;;  %v2749_v49 = vadd.f32 %v12371_v30, %v12322_v43  ;;  %8895 = vmatprep.subr.bf16.mxu1 %v9192_v18  ;;  %v6509_v43 = vrot.slane %v6507_v25, 1 }
 0x2ed   : > { %v12584_v48 = vadd.f32 %v8587_v46, %v3800_v42  ;;  %v8544_v41 = vpop.f32.mrf.mxu1  ;;  %v6494_v2 = vsel %vm14201_vm13, %v6489_v6, %v6493_v59  ;;  %v6495_v42 = vshrl.u32 %v12556_v13, 16  ;;  %8896 = vmatpush3.bf16.msra.mxu1 %v9192_v18  ;;  %v6515_v46 = vshll.u32 %v7901_v1, 16 }
 0x2ee   : > { %v4293_v5 = vpop.f32.mrf.mxu0  ;;  %v3805_v55 = vadd.f32 %v8544_v41, %v12397_v53  ;;  %v3799_v26 = vadd.f32 %v3722_v19, %v2749_v49  ;;  %v6505_v33 = vor.u32 %v6503_v56, %v6501_v10  ;;  %v9194_v19 = vld [vmem:[#allocation11 + $0x18] sm:$0xff]   ;;  %v2765_v41 = vadd.f32 %v12403_v9, %v12347_v0 }
 0x2ef   : > { %v12591_v39 = vadd.f32 %v4293_v5, %v3798_v14  ;;  %v3738_v53 = vpop.f32.mrf.mxu1  ;;  %v6497_v62 = vor.u32 %v6495_v42, %v6493_v59  ;;  %v6511_v14 = vshrl.u32 %v7900_v44, 16  ;;  %8897 = vmatprep.subr.bf16.mxu1 %v9194_v19 }
 0x2f0   : > { %v8588_v4 = vpop.f32.mrf.mxu0  ;;  %v6510_v18 = vsel %vm14203_vm3, %v6505_v33, %v6509_v43 }
 0x2f1   : > { %8830 = vmatmul.mubr.bf16.gmra.mxu1 %v6486_v7  ;;  %v12594_v34 = vadd.f32 %v8588_v4, %v3801_v40  ;;  %v8547_v6 = vpop.f32.mrf.mxu1  ;;  %v6502_v3 = vsel %vm14202_vm8, %v6497_v62, %v6501_v10  ;;  %v9193_v7 = vld [vmem:[#allocation12 + $0x18] sm:$0xff]  }
 0x2f2   : > { %8833 = vmatprep.mubr.bf16.mxu1 %v6494_v2  ;;  %v4296_v17 = vpop.f32.mrf.mxu0  ;;  %v3808_v40 = vadd.f32 %v8547_v6, %v12410_v51  ;;  %v6513_v2 = vor.u32 %v6511_v14, %v6509_v43  ;;  %8849 = vmatprep.subr.bf16.mxu0 %v9193_v7  ;;  %v3803_v51 = vadd.f32 %v3738_v53, %v2765_v41 }
 0x2f3   : > { %v12596_v30 = vadd.f32 %v4296_v17, %v3799_v26  ;;  %v3751_v44 = vpop.f32.mrf.mxu1  ;;  %8850 = vmatpush3.bf16.msra.mxu0 %v9193_v7  ;;  %8898 = vmatpush3.bf16.msra.mxu1 %v9194_v19  ;;  %v9196_v26 = vld [vmem:[#allocation11 + $0x10] sm:$0xff]  }
 0x2f4   : > { %v8591_v13 = vpop.f32.mrf.mxu0  ;;  %v3806_v5 = vadd.f32 %v3751_v44, %v12421_v32  ;;  %v9195_v32 = vld [vmem:[#allocation12 + $0x10] sm:$0xff]   ;;  %8899 = vmatprep.subr.bf16.mxu1 %v9196_v26  ;;  %v2797_v44 = vadd.f32 %v12465_v23, %v12414_v36 }
 0x2f5   : > { %v12598_v60 = vadd.f32 %v8591_v13, %v3804_v27  ;;  %v6517_v27 = vrot.slane %v6515_v46, 1  ;;  %v8548_v25 = vpop.f32.mrf.mxu1  ;;  %8851 = vmatprep.subr.bf16.mxu0 %v9195_v32 }
 0x2f6   : > { %v4309_v59 = vpop.f32.mrf.mxu0  ;;  %v3809_v42 = vadd.f32 %v8548_v25, %v12430_v58 }
 0x2f7   : > { %v12605_v37 = vadd.f32 %v4309_v59, %v3802_v38  ;;  %v3754_v9 = vpop.f32.mrf.mxu1  ;;  %v6518_v38 = vsel %vm14204_vm6, %v6513_v2, %v6517_v27  ;;  %8852 = vmatpush3.bf16.msra.mxu0 %v9195_v32  ;;  %8900 = vmatpush3.bf16.msra.mxu1 %v9196_v26 }
 0x2f8   : > { %v8592_v10 = vpop.f32.mrf.mxu0 }
 0x2f9   : > { %8834 = vmatmul.mubr.bf16.gmra.mxu1 %v6502_v3  ;;  %v12608_v49 = vadd.f32 %v8592_v10, %v3805_v55  ;;  %v8551_v62 = vpop.f32.mrf.mxu1  ;;  %v2781_v55 = vadd.f32 %v12434_v11, %v12377_v50 }
 0x2fa   : > { %8837 = vmatprep.mubr.bf16.mxu1 %v6510_v18  ;;  %v4312_v0 = vpop.f32.mrf.mxu0  ;;  %v3812_v17 = vadd.f32 %v8551_v62, %v12441_v8  ;;  %v9198_v18 = vld [vmem:[#allocation11 + $0x8] sm:$0xff]  }
 0x2fb   : > { %v12611_v1 = vadd.f32 %v4312_v0, %v3803_v51  ;;  %v3767_v33 = vpop.f32.mrf.mxu1  ;;  %v3807_v14 = vadd.f32 %v3754_v9, %v2781_v55  ;;  %8901 = vmatprep.subr.bf16.mxu1 %v9198_v18  ;;  %v9200_v55 = vld [vmem:[#allocation11] sm:$0xff]  }
 0x2fc   : > { %v8595_v4 = vpop.f32.mrf.mxu0  ;;  %v3810_v46 = vadd.f32 %v3767_v33, %v12450_v22  ;;  %8902 = vmatpush3.bf16.msra.mxu1 %v9198_v18 }
 0x2fd   : > { %v12614_v56 = vadd.f32 %v8595_v4, %v3808_v40  ;;  %v8552_v6 = vpop.f32.mrf.mxu1  ;;  %v9197_v40 = vld [vmem:[#allocation12 + $0x8] sm:$0xff]   ;;  %8903 = vmatprep.subr.bf16.mxu1 %v9200_v55 }
 0x2fe   : > { %v4325_v53 = vpop.f32.mrf.mxu0  ;;  %v3813_v7 = vadd.f32 %v8552_v6, %v12460_v63  ;;  %8853 = vmatprep.subr.bf16.mxu0 %v9197_v40 }
 0x2ff   : > { %v12619_v58 = vadd.f32 %v4325_v53, %v3806_v5  ;;  %v3770_v11 = vpop.f32.mrf.mxu1  ;;  %8854 = vmatpush3.bf16.msra.mxu0 %v9197_v40  ;;  %v9199_v53 = vld [vmem:[#allocation12] sm:$0xff]  }
 0x300   : > { %v8596_v43 = vpop.f32.mrf.mxu0  ;;  %v3811_v5 = vadd.f32 %v3770_v11, %v2797_v44  ;;  %8855 = vmatprep.subr.bf16.mxu0 %v9199_v53  ;;  %8904 = vmatpush3.bf16.msra.mxu1 %v9200_v55 }
 0x301   : > { %8838 = vmatmul.mubr.bf16.gmra.mxu1 %v6518_v38  ;;  %v12622_v13 = vadd.f32 %v8596_v43, %v3809_v42  ;;  %v8619_v59 = vpop.f32.mrf.mxu1  ;;  %v9277_v43 = vld [vmem:[%s9759_s3 + $0x8] sm:$0xff]  }
 0x302   : > { %v4328_v3 = vpop.f32.mrf.mxu0  ;;  %v4711_v22 = vadd.f32 %v8619_v59, %v12471_v20 }
 0x303   : > { %v12625_v50 = vadd.f32 %v4328_v3, %v3807_v14  ;;  %v4582_v63 = vpop.f32.mrf.mxu1  ;;  %8856 = vmatpush3.bf16.msra.mxu0 %v9199_v53 }
 0x304   : > { %v8599_v8 = vpop.f32.mrf.mxu0  ;;  %v4709_v10 = vadd.f32 %v4582_v63, %v12479_v21 }
 0x305   : > { %v12627_v19 = vadd.f32 %v8599_v8, %v3812_v17  ;;  %v8620_v25 = vpop.f32.mrf.mxu1 }
 0x306   : > { %v4341_v41 = vpop.f32.mrf.mxu0  ;;  %v12638_v0 = vadd.f32 %v8620_v25, %v12488_v61 }
 0x307   : > { %v12632_v2 = vadd.f32 %v4341_v41, %v3810_v46  ;;  %v12642_v23 = vpop.f32.mrf.mxu1  ;;  %v9278_v46 = vld [vmem:[%s9759_s3] sm:$0xff]  }
 0x308   : > { %v8600_v27 = vpop.f32.mrf.mxu0  ;;  %8857 = vmatprep.mubr.bf16.mxu0 %v9278_v46 }
 0x309   : > { %v12635_v51 = vadd.f32 %v8600_v27, %v3813_v7  ;;  %v8623_v38 = vpop.f32.mrf.mxu1  ;;  %8858 = vmatmul.mubr.bf16.vlgmr.msra.gmra.mxu0 %v9277_v43 }
 0x30a   : > { %v4344_v42 = vpop.f32.mrf.mxu0  ;;  %v4715_v21 = vadd.f32 %v8623_v38, %v12499_v24 }
 0x30b   : > { %v12640_v36 = vadd.f32 %v4344_v42, %v3811_v5  ;;  %v4598_v26 = vpop.f32.mrf.mxu1  ;;  %v9280_v5 = vld [vmem:[%s9759_s3 + $0x18] sm:$0xff]  }
 0x30c   : > { %v8667_v20 = vpop.f32.mrf.mxu0  ;;  %v4713_v61 = vadd.f32 %v4598_v26, %v12507_v54 }
 0x30d   : > { %v12644_v9 = vadd.f32 %v8667_v20, %v4711_v22  ;;  %v8624_v17 = vpop.f32.mrf.mxu1  ;;  %v9279_v22 = vld [vmem:[%s9759_s3 + $0x10] sm:$0xff]  }
 0x30e   : > { %v5136_v4 = vpop.f32.mrf.mxu0  ;;  %v12656_v14 = vadd.f32 %v8624_v17, %v12518_v57  ;;  %8861 = vmatprep.mubr.bf16.mxu0 %v9279_v22  ;;  %v9282_v17 = vld [vmem:[%s9759_s3 + $0x28] sm:$0xff]  }
 0x30f   : > { %v12647_v32 = vadd.f32 %v5136_v4, %v4709_v10  ;;  %v12659_v24 = vpop.f32.mrf.mxu1 }
 0x310   : > { %v12649_v62 = vpop.f32.mrf.mxu0 }
 0x311   : > { %v8627_v54 = vpop.f32.mrf.mxu1  ;;  %8862 = vmatmul.mubr.bf16.gmra.mxu0 %v9280_v5 }
 0x312   : > { %v12652_v33 = vpop.f32.mrf.mxu0  ;;  %v4719_v11 = vadd.f32 %v8627_v54, %v12530_v52 }
 0x313   : > { %v4614_v57 = vpop.f32.mrf.mxu1 }
 0x314   : > { %v8671_v6 = vpop.f32.mrf.mxu0  ;;  %v4717_v18 = vadd.f32 %v4614_v57, %v12538_v29 }
 0x315   : > { %v12661_v3 = vadd.f32 %v8671_v6, %v4715_v21  ;;  %v8628_v59 = vpop.f32.mrf.mxu1 }
 0x316   : > { %v5152_v7 = vpop.f32.mrf.mxu0  ;;  %v12672_v44 = vadd.f32 %v8628_v59, %v12547_v45  ;;  %v9283_v59 = vld [vmem:[%s9759_s3 + $0x30] sm:$0xff]  }
 0x317   : > { %v12664_v8 = vadd.f32 %v5152_v7, %v4713_v61  ;;  %v12675_v63 = vpop.f32.mrf.mxu1  ;;  %v9281_v61 = vld [vmem:[%s9759_s3 + $0x20] sm:$0xff]  }
 0x318   : > { %v12666_v40 = vpop.f32.mrf.mxu0  ;;  %8865 = vmatprep.mubr.bf16.mxu0 %v9281_v61 }
 0x319   : > { %v8631_v10 = vpop.f32.mrf.mxu1  ;;  %8866 = vmatmul.mubr.bf16.gmra.mxu0 %v9282_v17  ;;  %v9285_v17 = vld [vmem:[%s9759_s3 + $0x40] sm:$0xff]  }
 0x31a   : > { %v12669_v41 = vpop.f32.mrf.mxu0  ;;  %v4723_v29 = vadd.f32 %v8631_v10, %v12561_v47  ;;  %8869 = vmatprep.mubr.bf16.mxu0 %v9283_v59  ;;  %v9284_v10 = vld [vmem:[%s9759_s3 + $0x38] sm:$0xff]  }
 0x31b   : > { %v4630_v20 = vpop.f32.mrf.mxu1 }
 0x31c   : > { %v8675_v27 = vpop.f32.mrf.mxu0  ;;  %v4721_v38 = vadd.f32 %v4630_v20, %v12569_v12 }
 0x31d   : > { %v12677_v52 = vadd.f32 %v8675_v27, %v4719_v11  ;;  %v8632_v4 = vpop.f32.mrf.mxu1 }
 0x31e   : > { %v5168_v25 = vpop.f32.mrf.mxu0  ;;  %v12689_v26 = vadd.f32 %v8632_v4, %v12575_v28 }
 0x31f   : > { %v12681_v42 = vadd.f32 %v5168_v25, %v4717_v18  ;;  %v12692_v53 = vpop.f32.mrf.mxu1 }
 0x320   : > { %v12683_v45 = vpop.f32.mrf.mxu0 }
 0x321   : > { %8870 = vmatmul.mubr.bf16.gmra.mxu0 %v9284_v10 }
 0x322   : > { %v12686_v21 = vpop.f32.mrf.mxu0  ;;  %8873 = vmatprep.mubr.bf16.mxu0 %v9285_v17 }
 0x324   : > { %v8679_v55 = vpop.f32.mrf.mxu0  ;;  %v8635_v43 = vpop.f32.mrf.mxu1 }
 0x325   : > { %v12694_v47 = vadd.f32 %v8679_v55, %v4723_v29  ;;  %v4727_v12 = vadd.f32 %v8635_v43, %v12584_v48 }
 0x326   : > { %v5184_v46 = vpop.f32.mrf.mxu0  ;;  %v4646_v54 = vpop.f32.mrf.mxu1 }
 0x327   : > { %v12698_v6 = vadd.f32 %v5184_v46, %v4721_v38  ;;  %v4725_v7 = vadd.f32 %v4646_v54, %v12591_v39  ;;  %v9286_v54 = vld [vmem:[%s9759_s3 + $0x48] sm:$0xff]  }
 0x328   : > { %v12700_v28 = vpop.f32.mrf.mxu0  ;;  %v8636_v11 = vpop.f32.mrf.mxu1 }
 0x329   : > { %v12706_v18 = vadd.f32 %v8636_v11, %v12594_v34  ;;  %8874 = vmatmul.mubr.bf16.gmra.mxu0 %v9286_v54 }
 0x32a   : > { %v12703_v57 = vpop.f32.mrf.mxu0  ;;  %v4649_v22 = vpop.f32.mrf.mxu1 }
 0x32b   : > { %14205 = vst [vmem:[#allocation37_spill] sm:$0xff] %v12706_v18  ;;  %v12710_v48 = vadd.f32 %v4649_v22, %v12596_v30 }
 0x32c   : > { %v8683_v27 = vpop.f32.mrf.mxu0 }
 0x32d   : > { %14206 = vst [vmem:[#allocation61_spill] sm:$0xff] %v12710_v48  ;;  %v12712_v5 = vadd.f32 %v8683_v27, %v4727_v12 }
 0x32e   : > { %v5200_v29 = vpop.f32.mrf.mxu0 }
 0x32f   : > { %v8639_v25 = vpop.f32.mrf.mxu1  ;;  %v12716_v20 = vadd.f32 %v5200_v29, %v4725_v7  ;;  %v9287_v29 = vld [vmem:[%s9759_s3 + $0x50] sm:$0xff]  }
 0x330   : > { %v4731_v39 = vadd.f32 %v8639_v25, %v12598_v60  ;;  %v12718_v38 = vpop.f32.mrf.mxu0  ;;  %8877 = vmatprep.mubr.bf16.mxu0 %v9287_v29 }
 0x331   : > { %v4662_v34 = vpop.f32.mrf.mxu1  ;;  %14207 = vst [vmem:[#allocation105_spill] sm:$0xff] %v12718_v38 }
 0x332   : > { %v4729_v4 = vadd.f32 %v4662_v34, %v12605_v37  ;;  %v12721_v30 = vpop.f32.mrf.mxu0 }
 0x333   : > { %v8640_v61 = vpop.f32.mrf.mxu1  ;;  %14208 = vst [vmem:[#allocation24_spill] sm:$0xff] %v12721_v30 }
 0x334   : > { %v12724_v55 = vadd.f32 %v8640_v61, %v12608_v49  ;;  %v8687_v46 = vpop.f32.mrf.mxu0  ;;  %v9288_v61 = vld [vmem:[%s9759_s3 + $0x58] sm:$0xff]  }
 0x335   : > { %v4665_v43 = vpop.f32.mrf.mxu1  ;;  %v12730_v12 = vadd.f32 %v8687_v46, %v4731_v39  ;;  %8878 = vmatmul.mubr.bf16.gmra.mxu0 %v9288_v61 }
 0x336   : > { %14209 = vst [vmem:[#allocation31_spill] sm:$0xff] %v12724_v55  ;;  %v12728_v60 = vadd.f32 %v4665_v43, %v12611_v1  ;;  %v5216_v11 = vpop.f32.mrf.mxu0 }
 0x337   : > { %v12734_v59 = vadd.f32 %v5216_v11, %v4729_v4 }
 0x338   : > { %14210 = vst [vmem:[#allocation106_spill] sm:$0xff] %v12728_v60  ;;  %v12736_v22 = vpop.f32.mrf.mxu0 }
 0x339   : > { %v8643_v7 = vpop.f32.mrf.mxu1  ;;  %14211 = vst [vmem:[#allocation63_spill] sm:$0xff] %v12736_v22 }
 0x33a   : > { %v4735_v37 = vadd.f32 %v8643_v7, %v12614_v56  ;;  %v12739_v1 = vpop.f32.mrf.mxu0 }
 0x33b   : > { %v4678_v49 = vpop.f32.mrf.mxu1  ;;  %14212 = vst [vmem:[#allocation64_spill] sm:$0xff] %v12739_v1 }
 0x33c   : > { %v4733_v27 = vadd.f32 %v4678_v49, %v12619_v58  ;;  %v9289_v49 = vld [vmem:[%s9759_s3 + $0x60] sm:$0xff]  }
 0x33d   : > { %v8644_v10 = vpop.f32.mrf.mxu1  ;;  %8881 = vmatprep.mubr.bf16.mxu0 %v9289_v49  ;;  %v9292_v49 = vld [vmem:[%s9759_s3 + $0x78] sm:$0xff]  }
 0x33e   : > { %v12742_v25 = vadd.f32 %v8644_v10, %v12622_v13 }
 0x33f   : > { %v4681_v39 = vpop.f32.mrf.mxu1  ;;  %v8691_v34 = vpop.f32.mrf.mxu0 }
 0x340   : > { %14213 = vst [vmem:[#allocation21_spill] sm:$0xff] %v12742_v25  ;;  %v12746_v56 = vadd.f32 %v4681_v39, %v12625_v50  ;;  %v12748_v4 = vadd.f32 %v8691_v34, %v4735_v37  ;;  %v9290_v39 = vld [vmem:[%s9759_s3 + $0x68] sm:$0xff]  }
 0x341   : > { %v8647_v17 = vpop.f32.mrf.mxu1  ;;  %v5232_v43 = vpop.f32.mrf.mxu0  ;;  %8882 = vmatmul.mubr.bf16.gmra.mxu0 %v9290_v39 }
 0x342   : > { %14214 = vst [vmem:[#allocation74_spill] sm:$0xff] %v12746_v56  ;;  %v4739_v58 = vadd.f32 %v8647_v17, %v12627_v19  ;;  %v12752_v46 = vadd.f32 %v5232_v43, %v4733_v27 }
 0x343   : > { %v4694_v13 = vpop.f32.mrf.mxu1  ;;  %v12754_v54 = vpop.f32.mrf.mxu0 }
 0x344   : > { %14215 = vst [vmem:[#allocation81_spill] sm:$0xff] %v12754_v54  ;;  %v4737_v7 = vadd.f32 %v4694_v13, %v12632_v2 }
 0x345   : > { %v8648_v11 = vpop.f32.mrf.mxu1  ;;  %v12757_v50 = vpop.f32.mrf.mxu0 }
 0x346   : > { %14216 = vst [vmem:[#allocation52_spill] sm:$0xff] %v12757_v50  ;;  %v12760_v37 = vadd.f32 %v8648_v11, %v12635_v51 }
 0x347   : > { %v4697_v10 = vpop.f32.mrf.mxu1  ;;  %v8695_v29 = vpop.f32.mrf.mxu0 }
 0x348   : > { %14217 = vst [vmem:[#allocation79_spill] sm:$0xff] %v12760_v37  ;;  %v12764_v19 = vadd.f32 %v4697_v10, %v12640_v36  ;;  %v12766_v27 = vadd.f32 %v8695_v29, %v4739_v58  ;;  %v9291_v36 = vld [vmem:[%s9759_s3 + $0x70] sm:$0xff]  }
 0x349   : > { %v8715_v34 = vpop.f32.mrf.mxu1  ;;  %v5248_v2 = vpop.f32.mrf.mxu0  ;;  %8885 = vmatprep.mubr.bf16.mxu0 %v9291_v36 }
 0x34a   : > { %14218 = vst [vmem:[#allocation23_spill] sm:$0xff] %v12764_v19  ;;  %v12770_v61 = vadd.f32 %v8715_v34, %v12644_v9  ;;  %v12772_v17 = vadd.f32 %v5248_v2, %v4737_v7  ;;  %8886 = vmatmul.mubr.bf16.gmra.mxu0 %v9292_v49 }
 0x34b   : > { %v5710_v51 = vpop.f32.mrf.mxu1  ;;  %v12774_v43 = vpop.f32.mrf.mxu0 }
 0x34c   : > { %14219 = vst [vmem:[#allocation78_spill] sm:$0xff] %v12774_v43  ;;  %v12777_v13 = vadd.f32 %v5710_v51, %v12647_v32 }
 0x34d   : > { %v12780_v11 = vpop.f32.mrf.mxu1  ;;  %v12782_v58 = vpop.f32.mrf.mxu0 }
 0x34e   : > { %14220 = vst [vmem:[#allocation68_spill] sm:$0xff] %v12782_v58 }
 0x34f   : > { %v12785_v10 = vpop.f32.mrf.mxu1  ;;  %v12787_v9 = vpop.f32.mrf.mxu0 }
 0x351   : > { %v8719_v7 = vpop.f32.mrf.mxu1  ;;  %v12789_v29 = vpop.f32.mrf.mxu0 }
 0x352   : > { %v12792_v39 = vadd.f32 %v8719_v7, %v12661_v3 }
 0x353   : > { %v5726_v32 = vpop.f32.mrf.mxu1  ;;  %v12794_v34 = vpop.f32.mrf.mxu0 }
 0x354   : > { %v12797_v2 = vadd.f32 %v5726_v32, %v12664_v8 }
 0x355   : > { %v12799_v51 = vpop.f32.mrf.mxu1  ;;  %v12801_v36 = vpop.f32.mrf.mxu0 }
 0x357   : > { %v12803_v58 = vpop.f32.mrf.mxu1  ;;  %v12805_v19 = vpop.f32.mrf.mxu0 }
 0x359   : > { %v8723_v43 = vpop.f32.mrf.mxu1  ;;  %v12810_v49 = vpop.f32.mrf.mxu0 }
 0x35a   : > { %v12808_v37 = vadd.f32 %v8723_v43, %v12677_v52 }
 0x35b   : > { %v5742_v3 = vpop.f32.mrf.mxu1  ;;  %v12817_v32 = vpop.f32.mrf.mxu0 }
 0x35c   : > { %v12813_v7 = vadd.f32 %v5742_v3, %v12681_v42 }
 0x35d   : > { %v12815_v8 = vpop.f32.mrf.mxu1  ;;  %v12824_v25 = vpop.f32.mrf.mxu0 }
 0x35f   : > { %v12819_v50 = vpop.f32.mrf.mxu1  ;;  %v12831_v42 = vpop.f32.mrf.mxu0 }
 0x361   : > { %v8727_v56 = vpop.f32.mrf.mxu1  ;;  %v12838_v55 = vpop.f32.mrf.mxu0 }
 0x362   : > { %v12822_v54 = vadd.f32 %v8727_v56, %v12694_v47 }
 0x363   : > { %v5758_v52 = vpop.f32.mrf.mxu1 }
 0x364   : > { %v12827_v43 = vadd.f32 %v5758_v52, %v12698_v6  ;;  %v12845_v6 = vpop.f32.mrf.mxu0 }
 0x365   : > { %v12829_v1 = vpop.f32.mrf.mxu1 }
 0x366   : > { %v12852_v18 = vpop.f32.mrf.mxu0 }
 0x367   : > { %v12833_v3 = vpop.f32.mrf.mxu1 }
 0x369   : > { %v8731_v60 = vpop.f32.mrf.mxu1 }
 0x36a   : > { %v12836_v22 = vadd.f32 %v8731_v60, %v12712_v5 }
 0x36b   : > { %v5774_v47 = vpop.f32.mrf.mxu1 }
 0x36c   : > { %14221 = vst [vmem:[#allocation70_spill] sm:$0xff] %v12836_v22  ;;  %v12841_v56 = vadd.f32 %v5774_v47, %v12716_v20  ;;  %v12859_v20 = vpop.f32.mrf.mxu0 }
 0x36d   : > { %v12843_v30 = vpop.f32.mrf.mxu1 }
 0x36e   : > { %14222 = vst [vmem:[#allocation60_spill] sm:$0xff] %v12841_v56  ;;  %14223 = vst [vmem:[#allocation53_spill] sm:$0xff] %v12843_v30 }
 0x36f   : > { %v12847_v52 = vpop.f32.mrf.mxu1 }
 0x370   : > { %14224 = vst [vmem:[#allocation80_spill] sm:$0xff] %v12847_v52  ;;  %v12866_v52 = vpop.f32.mrf.mxu0 }
 0x371   : > { %v8735_v48 = vpop.f32.mrf.mxu1 }
 0x372   : > { %v12850_v38 = vadd.f32 %v8735_v48, %v12730_v12 }
 0x373   : > { %v5790_v5 = vpop.f32.mrf.mxu1 }
 0x374   : > { %14225 = vst [vmem:[#allocation65_spill] sm:$0xff] %v12850_v38  ;;  %v12855_v60 = vadd.f32 %v5790_v5, %v12734_v59  ;;  %v12873_v59 = vpop.f32.mrf.mxu0 }
 0x375   : > { %v12857_v22 = vpop.f32.mrf.mxu1 }
 0x376   : > { %14226 = vst [vmem:[#allocation86_spill] sm:$0xff] %v12855_v60  ;;  %14227 = vst [vmem:[#allocation62_spill] sm:$0xff] %v12857_v22 }
 0x377   : > { %v12861_v47 = vpop.f32.mrf.mxu1 }
 0x378   : > { %14228 = vst [vmem:[#allocation83_spill] sm:$0xff] %v12861_v47  ;;  %v12880_v47 = vpop.f32.mrf.mxu0 }
 0x379   : > { %v8739_v56 = vpop.f32.mrf.mxu1 }
 0x37a   : > { %v12864_v30 = vadd.f32 %v8739_v56, %v12748_v4 }
 0x37b   : > { %v5806_v48 = vpop.f32.mrf.mxu1 }
 0x37c   : > { %14229 = vst [vmem:[#allocation72_spill] sm:$0xff] %v12864_v30  ;;  %v12869_v12 = vadd.f32 %v5806_v48, %v12752_v46  ;;  %v14235_v46 = vld [vmem:[#allocation29_spill] sm:$0xff] }
 0x37d   : > { %v12871_v38 = vpop.f32.mrf.mxu1  ;;  %v4357_v48 = vadd.f32 %v12493_v15, %v14235_v46  ;;  %v6190_v15 = vadd.f32 %v12789_v29, %v12777_v13  ;;  %v5270_v29 = vadd.f32 %v12666_v40, %v12656_v14 }
 0x37e   : > { %14230 = vst [vmem:[#allocation92_spill] sm:$0xff] %v12869_v12  ;;  %14231 = vst [vmem:[#allocation71_spill] sm:$0xff] %v12871_v38  ;;  %v12889_v12 = vpop.f32.mrf.mxu0 }
 0x37f   : > { %v12875_v5 = vpop.f32.mrf.mxu1 }
 0x380   : > { %14232 = vst [vmem:[#allocation88_spill] sm:$0xff] %v12875_v5  ;;  %v4710_v5 = vadd.f32 %v12642_v23, %v4357_v48 }
 0x381   : > { %v8743_v60 = vpop.f32.mrf.mxu1 }
 0x382   : > { %v12878_v22 = vadd.f32 %v8743_v60, %v12766_v27  ;;  %v5266_v27 = vadd.f32 %v12649_v62, %v12638_v0  ;;  %v6192_v60 = vadd.f32 %v12787_v9, %v12770_v61  ;;  %v14237_v61 = vld [vmem:[#allocation104_spill] sm:$0xff] }
 0x383   : > { %v5822_v4 = vpop.f32.mrf.mxu1  ;;  %v4361_v9 = vadd.f32 %v12523_v31, %v14237_v61 }
 0x384   : > { %14233 = vst [vmem:[#allocation77_spill] sm:$0xff] %v12878_v22  ;;  %v12883_v56 = vadd.f32 %v5822_v4, %v12772_v17  ;;  %v5264_v17 = vadd.f32 %v12652_v33, %v4710_v5  ;;  %v5840_v4 = vadd.f32 %v12780_v11, %v5266_v27 }
 0x385   : > { %v12885_v30 = vpop.f32.mrf.mxu1 }
 0x386   : > { %14234 = vst [vmem:[#allocation97_spill] sm:$0xff] %v12883_v56  ;;  %v12902_v56 = vpop.f32.mrf.mxu0  ;;  %v5838_v48 = vadd.f32 %v12785_v10, %v5264_v17  ;;  %v6193_v0 = vadd.f32 %v12794_v34, %v5840_v4  ;;  %v6196_v34 = vadd.f32 %v12805_v19, %v12792_v39  ;;  %v5844_v4 = vadd.f32 %v12799_v51, %v5270_v29 }
 0x387   : > { %v12891_v38 = vpop.f32.mrf.mxu1  ;;  %v6200_v29 = vadd.f32 %v12831_v42, %v12808_v37 }
 0x388   : > { %14236 = vst [vmem:[#allocation76_spill] sm:$0xff] %v12891_v38  ;;  %v12904_v38 = vld [vmem:[#allocation6 + $0x3] ss:$0 sm:$0xff]  ;;  %v6191_v11 = vadd.f32 %v12801_v36, %v5838_v48  ;;  %v12915_v27 = vpop.f32.mrf.mxu0  ;;  %v6197_v39 = vadd.f32 %v12817_v32, %v5844_v4  ;;  %v5274_v32 = vadd.f32 %v12683_v45, %v12672_v44 }
 0x389   : > { %v8811_v22 = vpop.f32.mrf.mxu1 }
 0x38a   : > { %v6746_v46 = vadd.f32 %v8811_v22, %v6192_v60  ;;  %v4714_v22 = vadd.f32 %v12659_v24, %v4361_v9  ;;  %v6194_v24 = vadd.f32 %v12810_v49, %v12797_v2  ;;  %v12928_v48 = vpop.f32.mrf.mxu0  ;;  %v4365_v2 = vadd.f32 %v12552_v35, %v12514_v16 }
 0x38b   : > { %v6617_v23 = vpop.f32.mrf.mxu1 }
 0x38c   : > { %v6744_v62 = vadd.f32 %v6617_v23, %v6190_v15  ;;  %v6782_v5 = vadd.f32 %v12904_v38, %v6746_v46  ;;  %v5268_v36 = vadd.f32 %v12669_v41, %v4714_v22 }
 0x38d   : > { %v8812_v33 = vpop.f32.mrf.mxu1 }
 0x38e   : > { %v6747_v13 = vadd.f32 %v8812_v33, %v6193_v0  ;;  %v6780_v60 = vadd.f32 %v12904_v38, %v6744_v62  ;;  %v6814_v14 = vmax.f32 %v6782_v5, 0.0  ;;  %v5842_v19 = vadd.f32 %v12803_v58, %v5268_v36 }
 0x38f   : > { %v6620_v10 = vpop.f32.mrf.mxu1  ;;  %v4718_v58 = vadd.f32 %v12675_v63, %v4365_v2  ;;  %v6198_v63 = vadd.f32 %v12838_v55, %v12813_v7  ;;  %v14239_v55 = vld [vmem:[#allocation69_spill] sm:$0xff] }
 0x390   : > { %v6783_v31 = vadd.f32 %v12904_v38, %v6747_v13  ;;  %v6745_v17 = vadd.f32 %v6620_v10, %v6191_v11  ;;  %v6812_v62 = vmax.f32 %v6780_v60, 0.0  ;;  %v6195_v9 = vadd.f32 %v12824_v25, %v5842_v19  ;;  %v12937_v13 = vpop.f32.mrf.mxu0 }
 0x391   : > { %v8815_v15 = vpop.f32.mrf.mxu1  ;;  %v5272_v10 = vadd.f32 %v12686_v21, %v4718_v58 }
 0x392   : > { %v6815_v40 = vmax.f32 %v6783_v31, 0.0  ;;  %v6781_v46 = vadd.f32 %v12904_v38, %v6745_v17  ;;  %v6750_v23 = vadd.f32 %v8815_v15, %v6196_v34  ;;  %v5848_v34 = vadd.f32 %v12815_v8, %v5274_v32  ;;  %v12950_v36 = vpop.f32.mrf.mxu0 }
 0x393   : > { %v6633_v0 = vpop.f32.mrf.mxu1  ;;  %v5846_v42 = vadd.f32 %v12819_v50, %v5272_v10  ;;  %v14241_v10 = vld [vmem:[#allocation105_spill] sm:$0xff] }
 0x394   : > { %v6845_v41 = vpack.c.bf16 %v6815_v40, %v6814_v14  ;;  %v6813_v61 = vmax.f32 %v6781_v46, 0.0  ;;  %v6748_v51 = vadd.f32 %v6633_v0, %v6194_v24  ;;  %v6786_v33 = vadd.f32 %v12904_v38, %v6750_v23  ;;  %v14238_v14 = vld [vmem:[#allocation67_spill] sm:$0xff]  ;;  %v12959_v0 = vpop.f32.mrf.mxu0 }
 0x395   : > { %v8816_v49 = vpop.f32.mrf.mxu1  ;;  %v6201_v17 = vadd.f32 %v12845_v6, %v5848_v34  ;;  %v4369_v7 = vadd.f32 %v14239_v55, %v14238_v14  ;;  %v6199_v46 = vadd.f32 %v12852_v18, %v5846_v42  ;;  %v5278_v6 = vadd.f32 %v12700_v28, %v12689_v26 }
 0x396   : > { %v6751_v11 = vadd.f32 %v8816_v49, %v6197_v39  ;;  %v6844_v5 = vpack.c.bf16 %v6813_v61, %v6812_v62  ;;  %v6784_v16 = vadd.f32 %v12904_v38, %v6748_v51  ;;  %v6818_v45 = vmax.f32 %v6786_v33, 0.0 }
 0x397   : > { %v6636_v22 = vpop.f32.mrf.mxu1  ;;  %v4722_v50 = vadd.f32 %v12692_v53, %v4369_v7  ;;  %v5852_v49 = vadd.f32 %v12829_v1, %v5278_v6  ;;  %v6202_v53 = vadd.f32 %v12866_v52, %v12827_v43  ;;  %v14247_v7 = vld [vmem:[#allocation80_spill] sm:$0xff] }
 0x398   : > { %v6787_v35 = vadd.f32 %v12904_v38, %v6751_v11  ;;  %v6749_v25 = vadd.f32 %v6636_v22, %v6195_v9  ;;  %8905 = vmatprep.mubr.bf16.mxu1 %v6844_v5  ;;  %v6816_v21 = vmax.f32 %v6784_v16, 0.0  ;;  %v12972_v5 = vpop.f32.mrf.mxu0 }
 0x399   : > { %v8819_v44 = vpop.f32.mrf.mxu1  ;;  %8906 = vmatmul.mubr.bf16.vlgmr.msra.gmra.mxu1 %v6845_v41  ;;  %v6204_v41 = vadd.f32 %v12859_v20, %v12822_v54  ;;  %v5276_v2 = vadd.f32 %v12703_v57, %v4722_v50  ;;  %v6205_v11 = vadd.f32 %v12873_v59, %v5852_v49  ;;  %v14242_v59 = vld [vmem:[#allocation70_spill] sm:$0xff]  ;;  %v14249_v49 = vld [vmem:[#allocation63_spill] sm:$0xff] }
 0x39a   : > { %v6819_v60 = vmax.f32 %v6787_v35, 0.0  ;;  %v6785_v31 = vadd.f32 %v12904_v38, %v6749_v25  ;;  %v6754_v37 = vadd.f32 %v8819_v44, %v6200_v29  ;;  %v14240_v25 = vld [vmem:[#allocation37_spill] sm:$0xff]  ;;  %v6208_v44 = vadd.f32 %v12889_v12, %v14242_v59 }
 0x39b   : > { %v6649_v4 = vpop.f32.mrf.mxu1  ;;  %v5850_v20 = vadd.f32 %v12833_v3, %v5276_v2  ;;  %v5282_v34 = vadd.f32 %v14241_v10, %v14240_v25  ;;  %v8787_v3 = vpop.f32.mrf.mxu0  ;;  %v14248_v2 = vld [vmem:[#allocation31_spill] sm:$0xff] }
 0x39c   : > { %v6847_v24 = vpack.c.bf16 %v6819_v60, %v6818_v45  ;;  %v6817_v8 = vmax.f32 %v6785_v31, 0.0  ;;  %v6752_v15 = vadd.f32 %v6649_v4, %v6198_v63  ;;  %v6790_v23 = vadd.f32 %v12904_v38, %v6754_v37  ;;  %v14243_v37 = vld [vmem:[#allocation61_spill] sm:$0xff] }
 0x39d   : > { %v8820_v40 = vpop.f32.mrf.mxu1  ;;  %v6203_v43 = vadd.f32 %v12880_v47, %v5850_v20  ;;  %v14244_v47 = vld [vmem:[#allocation24_spill] sm:$0xff] }
 0x39e   : > { %v6755_v19 = vadd.f32 %v8820_v40, %v6201_v17  ;;  %v6846_v39 = vpack.c.bf16 %v6817_v8, %v6816_v21  ;;  %v6788_v61 = vadd.f32 %v12904_v38, %v6752_v15  ;;  %v6822_v28 = vmax.f32 %v6790_v23, 0.0  ;;  %v14245_v17 = vld [vmem:[#allocation53_spill] sm:$0xff]  ;;  %v14246_v21 = vld [vmem:[#allocation60_spill] sm:$0xff]  ;;  %v6159_v23 = vpop.f32.mrf.mxu0 }
 0x39f   : > { %v6652_v62 = vpop.f32.mrf.mxu1  ;;  %v5280_v42 = vadd.f32 %v14244_v47, %v14243_v37  ;;  %v5856_v4 = vadd.f32 %v14245_v17, %v5282_v34  ;;  %v14256_v17 = vld [vmem:[#allocation21_spill] sm:$0xff] }
 0x3a0   : > { %v6791_v51 = vadd.f32 %v12904_v38, %v6755_v19  ;;  %v6753_v18 = vadd.f32 %v6652_v62, %v6199_v46  ;;  %8909 = vmatprep.mubr.bf16.mxu1 %v6846_v39  ;;  %v6820_v57 = vmax.f32 %v6788_v61, 0.0 }
 0x3a1   : > { %v8823_v26 = vpop.f32.mrf.mxu1  ;;  %8910 = vmatmul.mubr.bf16.gmra.mxu1 %v6847_v24  ;;  %v6206_v24 = vadd.f32 %v12902_v56, %v14246_v21  ;;  %v5854_v40 = vadd.f32 %v14247_v7, %v5280_v42  ;;  %v6209_v46 = vadd.f32 %v12915_v27, %v5856_v4  ;;  %v14257_v4 = vld [vmem:[#allocation81_spill] sm:$0xff]  ;;  %v14259_v7 = vld [vmem:[#allocation74_spill] sm:$0xff] }
 0x3a2   : > { %v6823_v9 = vmax.f32 %v6791_v51, 0.0  ;;  %v6789_v33 = vadd.f32 %v12904_v38, %v6753_v18  ;;  %v6758_v54 = vadd.f32 %v8823_v26, %v6204_v41  ;;  %v8788_v26 = vpop.f32.mrf.mxu0  ;;  %v5290_v21 = vadd.f32 %v14257_v4, %v14256_v17 }
 0x3a3   : > { %v6665_v58 = vpop.f32.mrf.mxu1  ;;  %v6207_v56 = vadd.f32 %v12928_v48, %v5854_v40  ;;  %v14252_v48 = vld [vmem:[#allocation64_spill] sm:$0xff] }
 0x3a4   : > { %v6849_v32 = vpack.c.bf16 %v6823_v9, %v6822_v28  ;;  %v6821_v1 = vmax.f32 %v6789_v33, 0.0  ;;  %v6756_v22 = vadd.f32 %v6665_v58, %v6202_v53  ;;  %v6794_v52 = vadd.f32 %v12904_v38, %v6758_v54  ;;  %v14250_v9 = vld [vmem:[#allocation65_spill] sm:$0xff]  ;;  %v6162_v34 = vpop.f32.mrf.mxu0  ;;  %v14260_v40 = vld [vmem:[#allocation52_spill] sm:$0xff] }
 0x3a5   : > { %v8824_v29 = vpop.f32.mrf.mxu1  ;;  %v5286_v53 = vadd.f32 %v14249_v49, %v14248_v2  ;;  %v6212_v27 = vadd.f32 %v12937_v13, %v14250_v9 }
 0x3a6   : > { %v6759_v16 = vadd.f32 %v8824_v29, %v6205_v11  ;;  %v6848_v35 = vpack.c.bf16 %v6821_v1, %v6820_v57  ;;  %v6792_v45 = vadd.f32 %v12904_v38, %v6756_v22  ;;  %v6826_v15 = vmax.f32 %v6794_v52, 0.0  ;;  %v14251_v11 = vld [vmem:[#allocation106_spill] sm:$0xff] }
 0x3a7   : > { %v6668_v63 = vpop.f32.mrf.mxu1  ;;  %v5284_v58 = vadd.f32 %v14252_v48, %v14251_v11  ;;  %v14253_v57 = vld [vmem:[#allocation62_spill] sm:$0xff]  ;;  %v14264_v48 = vld [vmem:[#allocation79_spill] sm:$0xff] }
 0x3a8   : > { %v6795_v60 = vadd.f32 %v12904_v38, %v6759_v16  ;;  %v6757_v31 = vadd.f32 %v6668_v63, %v6203_v43  ;;  %8913 = vmatprep.mubr.bf16.mxu1 %v6848_v35  ;;  %v6824_v39 = vmax.f32 %v6792_v45, 0.0  ;;  %v14254_v1 = vld [vmem:[#allocation86_spill] sm:$0xff]  ;;  %v14255_v35 = vld [vmem:[#allocation83_spill] sm:$0xff] }
 0x3a9   : > { %v8827_v8 = vpop.f32.mrf.mxu1  ;;  %8914 = vmatmul.mubr.bf16.gmra.mxu1 %v6849_v32  ;;  %v5860_v32 = vadd.f32 %v14253_v57, %v5286_v53  ;;  %v6210_v22 = vadd.f32 %v12950_v36, %v14254_v1  ;;  %v5858_v25 = vadd.f32 %v14255_v35, %v5284_v58  ;;  %v14265_v58 = vld [vmem:[#allocation78_spill] sm:$0xff] }
 0x3aa   : > { %v6827_v14 = vmax.f32 %v6795_v60, 0.0  ;;  %v6793_v12 = vadd.f32 %v12904_v38, %v6757_v31  ;;  %v6762_v55 = vadd.f32 %v8827_v8, %v6208_v44  ;;  %v5294_v57 = vadd.f32 %v14265_v58, %v14264_v48 }
 0x3ab   : > { %v6681_v19 = vpop.f32.mrf.mxu1  ;;  %v6213_v10 = vadd.f32 %v12959_v0, %v5860_v32  ;;  %v6211_v36 = vadd.f32 %v12972_v5, %v5858_v25  ;;  %v5288_v5 = vadd.f32 %v14260_v40, %v14259_v7 }
 0x3ac   : > { %v6851_v50 = vpack.c.bf16 %v6827_v14, %v6826_v15  ;;  %v6825_v6 = vmax.f32 %v6793_v12, 0.0  ;;  %v6760_v62 = vadd.f32 %v6681_v19, %v6206_v24  ;;  %v6798_v61 = vadd.f32 %v12904_v38, %v6762_v55  ;;  %v8791_v24 = vpop.f32.mrf.mxu0  ;;  %v14258_v15 = vld [vmem:[#allocation72_spill] sm:$0xff] }
 0x3ad   : > { %v8828_v41 = vpop.f32.mrf.mxu1  ;;  %v6216_v0 = vadd.f32 %v8787_v3, %v14258_v15  ;;  %v5868_v25 = vadd.f32 %v12885_v30, %v5294_v57 }
 0x3ae   : > { %v6763_v51 = vadd.f32 %v8828_v41, %v6209_v46  ;;  %v6850_v18 = vpack.c.bf16 %v6825_v6, %v6824_v39  ;;  %v6796_v33 = vadd.f32 %v12904_v38, %v6760_v62  ;;  %v6830_v43 = vmax.f32 %v6798_v61, 0.0  ;;  %v14261_v46 = vld [vmem:[#allocation71_spill] sm:$0xff]  ;;  %v14262_v39 = vld [vmem:[#allocation92_spill] sm:$0xff]  ;;  %v6175_v2 = vpop.f32.mrf.mxu0 }
 0x3af   : > { %v6684_v28 = vpop.f32.mrf.mxu1  ;;  %v5864_v19 = vadd.f32 %v14261_v46, %v5290_v21  ;;  %v14263_v61 = vld [vmem:[#allocation88_spill] sm:$0xff] }
 0x3b0   : > { %v6799_v54 = vadd.f32 %v12904_v38, %v6763_v51  ;;  %v6761_v20 = vadd.f32 %v6684_v28, %v6207_v56  ;;  %8917 = vmatprep.mubr.bf16.mxu1 %v6850_v18  ;;  %v6828_v59 = vmax.f32 %v6796_v33, 0.0  ;;  %v5862_v51 = vadd.f32 %v14263_v61, %v5288_v5  ;;  %v8792_v32 = vpop.f32.mrf.mxu0 }
 0x3b1   : > { %v8831_v29 = vpop.f32.mrf.mxu1  ;;  %8918 = vmatmul.mubr.bf16.gmra.mxu1 %v6851_v50  ;;  %v6214_v50 = vadd.f32 %v6159_v23, %v14262_v39  ;;  %v6217_v18 = vadd.f32 %v8788_v26, %v5864_v19 }
 0x3b2   : > { %v6831_v52 = vmax.f32 %v6799_v54, 0.0  ;;  %v6797_v13 = vadd.f32 %v12904_v38, %v6761_v20  ;;  %v6766_v16 = vadd.f32 %v8831_v29, %v6212_v27  ;;  %v6215_v54 = vadd.f32 %v6162_v34, %v5862_v51 }
 0x3b3   : > { %v6697_v63 = vpop.f32.mrf.mxu1 }
 0x3b4   : > { %v6853_v44 = vpack.c.bf16 %v6831_v52, %v6830_v43  ;;  %v6829_v45 = vmax.f32 %v6797_v13, 0.0  ;;  %v6764_v60 = vadd.f32 %v6697_v63, %v6210_v22  ;;  %v6802_v37 = vadd.f32 %v12904_v38, %v6766_v16  ;;  %v14266_v22 = vld [vmem:[#allocation77_spill] sm:$0xff]  ;;  %v14267_v13 = vld [vmem:[#allocation23_spill] sm:$0xff]  ;;  %v14268_v16 = vld [vmem:[#allocation68_spill] sm:$0xff] }
 0x3b5   : > { %v8832_v31 = vpop.f32.mrf.mxu1  ;;  %v6220_v29 = vadd.f32 %v8791_v24, %v14266_v22  ;;  %v5292_v35 = vadd.f32 %v14268_v16, %v14267_v13 }
 0x3b6   : > { %v6767_v47 = vadd.f32 %v8832_v31, %v6213_v10  ;;  %v6852_v42 = vpack.c.bf16 %v6829_v45, %v6828_v59  ;;  %v6800_v14 = vadd.f32 %v12904_v38, %v6764_v60  ;;  %v6834_v62 = vmax.f32 %v6802_v37, 0.0  ;;  %v14269_v10 = vld [vmem:[#allocation97_spill] sm:$0xff]  ;;  %v14270_v31 = vld [vmem:[#allocation76_spill] sm:$0xff] }
 0x3b7   : > { %v6700_v8 = vpop.f32.mrf.mxu1  ;;  %v6218_v34 = vadd.f32 %v6175_v2, %v14269_v10  ;;  %v6221_v37 = vadd.f32 %v8792_v32, %v5868_v25 }
 0x3b8   : > { %v6803_v12 = vadd.f32 %v12904_v38, %v6767_v47  ;;  %v6765_v55 = vadd.f32 %v6700_v8, %v6211_v36  ;;  %8921 = vmatprep.mubr.bf16.mxu1 %v6852_v42  ;;  %v6832_v53 = vmax.f32 %v6800_v14, 0.0  ;;  %v5866_v36 = vadd.f32 %v14270_v31, %v5292_v35  ;;  %v6178_v47 = vpop.f32.mrf.mxu0 }
 0x3b9   : > { %v8835_v6 = vpop.f32.mrf.mxu1  ;;  %8922 = vmatmul.mubr.bf16.gmra.mxu1 %v6853_v44 }
 0x3ba   : > { %v6835_v41 = vmax.f32 %v6803_v12, 0.0  ;;  %v6801_v56 = vadd.f32 %v12904_v38, %v6765_v55  ;;  %v6770_v3 = vadd.f32 %v8835_v6, %v6216_v0  ;;  %v6219_v30 = vadd.f32 %v6178_v47, %v5866_v36 }
 0x3bb   : > { %v6713_v49 = vpop.f32.mrf.mxu1 }
 0x3bc   : > { %v6855_v28 = vpack.c.bf16 %v6835_v41, %v6834_v62  ;;  %v6833_v9 = vmax.f32 %v6801_v56, 0.0  ;;  %v6768_v27 = vadd.f32 %v6713_v49, %v6214_v50  ;;  %v6806_v23 = vadd.f32 %v12904_v38, %v6770_v3 }
 0x3bd   : > { %v8836_v33 = vpop.f32.mrf.mxu1 }
 0x3be   : > { %v6771_v20 = vadd.f32 %v8836_v33, %v6217_v18  ;;  %v6854_v11 = vpack.c.bf16 %v6833_v9, %v6832_v53  ;;  %v6804_v26 = vadd.f32 %v12904_v38, %v6768_v27  ;;  %v6838_v59 = vmax.f32 %v6806_v23, 0.0 }
 0x3bf   : > { %v6716_v1 = vpop.f32.mrf.mxu1 }
 0x3c0   : > { %v6807_v43 = vadd.f32 %v12904_v38, %v6771_v20  ;;  %v6769_v52 = vadd.f32 %v6716_v1, %v6215_v54  ;;  %8925 = vmatprep.mubr.bf16.mxu1 %v6854_v11  ;;  %v6836_v17 = vmax.f32 %v6804_v26, 0.0  ;;  %v13042_v20 = vld [vmem:[#allocation6 + $0x4] ss:$0 sm:$0xff] }
 0x3c1   : > { %v8839_v63 = vpop.f32.mrf.mxu1  ;;  %8926 = vmatmul.mubr.bf16.gmra.mxu1 %v6855_v28 }
 0x3c2   : > { %v6839_v44 = vmax.f32 %v6807_v43, 0.0  ;;  %v6805_v45 = vadd.f32 %v12904_v38, %v6769_v52  ;;  %v6774_v60 = vadd.f32 %v8839_v63, %v6220_v29 }
 0x3c3   : > { %v6729_v42 = vpop.f32.mrf.mxu1 }
 0x3c4   : > { %v6857_v4 = vpack.c.bf16 %v6839_v44, %v6838_v59  ;;  %v6837_v21 = vmax.f32 %v6805_v45, 0.0  ;;  %v6772_v24 = vadd.f32 %v6729_v42, %v6218_v34  ;;  %v6810_v15 = vadd.f32 %v12904_v38, %v6774_v60 }
 0x3c5   : > { %v8840_v8 = vpop.f32.mrf.mxu1 }
 0x3c6   : > { %v6775_v0 = vadd.f32 %v8840_v8, %v6221_v37  ;;  %v6856_v14 = vpack.c.bf16 %v6837_v21, %v6836_v17  ;;  %v6808_v55 = vadd.f32 %v12904_v38, %v6772_v24  ;;  %v6842_v5 = vmax.f32 %v6810_v15, 0.0 }
 0x3c7   : > { %v6732_v12 = vpop.f32.mrf.mxu1 }
 0x3c8   : > { %v6811_v7 = vadd.f32 %v12904_v38, %v6775_v0  ;;  %v6773_v40 = vadd.f32 %v6732_v12, %v6219_v30  ;;  %8929 = vmatprep.mubr.bf16.mxu1 %v6856_v14  ;;  %v6840_v39 = vmax.f32 %v6808_v55, 0.0 }
 0x3c9   : > { %8930 = vmatmul.mubr.bf16.gmra.mxu1 %v6857_v4  ;;  %v8859_v41 = vpop.f32.mrf.mxu0 }
 0x3ca   : > { %v6843_v46 = vmax.f32 %v6811_v7, 0.0  ;;  %v6809_v19 = vadd.f32 %v12904_v38, %v6773_v40 }
 0x3cb   : > { %v7070_v56 = vpop.f32.mrf.mxu0 }
 0x3cc   : > { %v6859_v50 = vpack.c.bf16 %v6843_v46, %v6842_v5  ;;  %v6841_v6 = vmax.f32 %v6809_v19, 0.0 }
 0x3cd   : > { %v8860_v3 = vpop.f32.mrf.mxu0 }
 0x3ce   : > { %v6858_v62 = vpack.c.bf16 %v6841_v6, %v6840_v39 }
 0x3cf   : > { %v7073_v61 = vpop.f32.mrf.mxu0 }
 0x3d0   : > { %8933 = vmatprep.mubr.bf16.mxu1 %v6858_v62 }
 0x3d1   : > { %8934 = vmatmul.mubr.bf16.gmra.mxu1 %v6859_v50  ;;  %v8863_v51 = vpop.f32.mrf.mxu0 }
 0x3d3   : > { %v7086_v18 = vpop.f32.mrf.mxu0 }
 0x3d5   : > { %v8864_v2 = vpop.f32.mrf.mxu0 }
 0x3d7   : > { %v7089_v49 = vpop.f32.mrf.mxu0 }
 0x3d9   : > { %v8867_v53 = vpop.f32.mrf.mxu0 }
 0x3db   : > { %v7102_v28 = vpop.f32.mrf.mxu0 }
 0x3dd   : > { %v8868_v9 = vpop.f32.mrf.mxu0 }
 0x3df   : > { %v7105_v27 = vpop.f32.mrf.mxu0 }
 0x3e1   : > { %v8871_v38 = vpop.f32.mrf.mxu0 }
 0x3e3   : > { %v13035_v33 = vpop.f32.mrf.mxu0 }
 0x3e5   : > { %v13037_v54 = vpop.f32.mrf.mxu0 }
 0x3e7   : > { %v13039_v23 = vpop.f32.mrf.mxu0 }
 0x3e9   : > { %v13044_v57 = vpop.f32.mrf.mxu0 }
 0x3eb   : > { %v13051_v52 = vpop.f32.mrf.mxu0 }
 0x3ed   : > { %v8876_v63 = vpop.f32.mrf.mxu0 }
 0x3ef   : > { %v7137_v37 = vpop.f32.mrf.mxu0 }
 0x3f5   : > { %v8879_v8 = vpop.f32.mrf.mxu0 }
 0x3f7   : > { %v7150_v7 = vpop.f32.mrf.mxu0 }
 0x3f9   : > { %v8880_v6 = vpop.f32.mrf.mxu0 }
 0x459   : > { %v8907_v11 = vpop.f32.mrf.mxu1 }
 0x45a   : > { %v7288_v48 = vadd.f32 %v8907_v11, %v8859_v41 }
 0x45b   : > { %v7279_v58 = vpop.f32.mrf.mxu1 }
 0x45c   : > { %v7412_v32 = vadd.f32 %v13042_v20, %v7288_v48  ;;  %v7280_v1 = vadd.f32 %v7279_v58, %v7070_v56 }
 0x45d   : > { %v8908_v22 = vpop.f32.mrf.mxu1 }
 0x45e   : > { %7444 = vst [vmem:[%s13047_s29 + $0x10] sm:$0xff] %v7412_v32  ;;  %v7410_v29 = vadd.f32 %v13042_v20, %v7280_v1  ;;  %v7291_v26 = vadd.f32 %v8908_v22, %v8860_v3 }
 0x45f   : > { %v7282_v43 = vpop.f32.mrf.mxu1 }
 0x460   : > { %7442 = vst [vmem:[%s13047_s29] sm:$0xff] %v7410_v29  ;;  %v7413_v13 = vadd.f32 %v13042_v20, %v7291_v26  ;;  %v7283_v16 = vadd.f32 %v7282_v43, %v7073_v61 }
 0x461   : > { %v8911_v35 = vpop.f32.mrf.mxu1 }
 0x462   : > { %7445 = vst [vmem:[%s13047_s29 + $0x18] sm:$0xff] %v7413_v13  ;;  %v7411_v25 = vadd.f32 %v13042_v20, %v7283_v16  ;;  %v7304_v10 = vadd.f32 %v8911_v35, %v8863_v51 }
 0x463   : > { %v7295_v34 = vpop.f32.mrf.mxu1 }
 0x464   : > { %7443 = vst [vmem:[%s13047_s29 + $0x8] sm:$0xff] %v7411_v25  ;;  %v7416_v59 = vadd.f32 %v13042_v20, %v7304_v10  ;;  %v7296_v44 = vadd.f32 %v7295_v34, %v7086_v18  ;;  %v7153_v18 = vpop.f32.mrf.mxu0 }
 0x465   : > { %v8912_v45 = vpop.f32.mrf.mxu1 }
 0x466   : > { %7448 = vst [vmem:[%s13047_s29 + $0x30] sm:$0xff] %v7416_v59  ;;  %v7414_v60 = vadd.f32 %v13042_v20, %v7296_v44  ;;  %v7307_v31 = vadd.f32 %v8912_v45, %v8864_v2 }
 0x467   : > { %v7298_v36 = vpop.f32.mrf.mxu1 }
 0x468   : > { %7446 = vst [vmem:[%s13047_s29 + $0x20] sm:$0xff] %v7414_v60  ;;  %v7417_v47 = vadd.f32 %v13042_v20, %v7307_v31  ;;  %v7299_v42 = vadd.f32 %v7298_v36, %v7089_v49 }
 0x469   : > { %v8915_v17 = vpop.f32.mrf.mxu1 }
 0x46a   : > { %7449 = vst [vmem:[%s13047_s29 + $0x38] sm:$0xff] %v7417_v47  ;;  %v7415_v4 = vadd.f32 %v13042_v20, %v7299_v42  ;;  %v7320_v21 = vadd.f32 %v8915_v17, %v8867_v53 }
 0x46b   : > { %v7311_v24 = vpop.f32.mrf.mxu1 }
 0x46c   : > { %7447 = vst [vmem:[%s13047_s29 + $0x28] sm:$0xff] %v7415_v4  ;;  %v7420_v30 = vadd.f32 %v13042_v20, %v7320_v21  ;;  %v7312_v15 = vadd.f32 %v7311_v24, %v7102_v28 }
 0x46d   : > { %v8916_v0 = vpop.f32.mrf.mxu1 }
 0x46e   : > { %7452 = vst [vmem:[%s13047_s29 + $0x50] sm:$0xff] %v7420_v30  ;;  %v7418_v14 = vadd.f32 %v13042_v20, %v7312_v15  ;;  %v7323_v12 = vadd.f32 %v8916_v0, %v8868_v9 }
 0x46f   : > { %v7314_v55 = vpop.f32.mrf.mxu1 }
 0x470   : > { %7450 = vst [vmem:[%s13047_s29 + $0x40] sm:$0xff] %v7418_v14  ;;  %v7421_v40 = vadd.f32 %v13042_v20, %v7323_v12  ;;  %v7315_v5 = vadd.f32 %v7314_v55, %v7105_v27 }
 0x471   : > { %v8919_v46 = vpop.f32.mrf.mxu1 }
 0x472   : > { %7453 = vst [vmem:[%s13047_s29 + $0x58] sm:$0xff] %v7421_v40  ;;  %v7419_v19 = vadd.f32 %v13042_v20, %v7315_v5  ;;  %v7336_v39 = vadd.f32 %v8919_v46, %v8871_v38  ;;  %v8883_v38 = vpop.f32.mrf.mxu0 }
 0x473   : > { %v7327_v50 = vpop.f32.mrf.mxu1 }
 0x474   : > { %7451 = vst [vmem:[%s13047_s29 + $0x48] sm:$0xff] %v7419_v19  ;;  %v7424_v62 = vadd.f32 %v13042_v20, %v7336_v39  ;;  %v7328_v41 = vadd.f32 %v7327_v50, %v13035_v33  ;;  %v7166_v32 = vpop.f32.mrf.mxu0 }
 0x475   : > { %v8920_v56 = vpop.f32.mrf.mxu1 }
 0x476   : > { %7456 = vst [vmem:[%s13047_s29 + $0x70] sm:$0xff] %v7424_v62  ;;  %v7422_v3 = vadd.f32 %v13042_v20, %v7328_v41  ;;  %v7339_v61 = vadd.f32 %v8920_v56, %v13037_v54 }
 0x477   : > { %v7330_v51 = vpop.f32.mrf.mxu1 }
 0x478   : > { %7454 = vst [vmem:[%s13047_s29 + $0x60] sm:$0xff] %v7422_v3  ;;  %v7425_v2 = vadd.f32 %v13042_v20, %v7339_v61  ;;  %v7331_v49 = vadd.f32 %v7330_v51, %v13039_v23 }
 0x479   : > { %v8923_v53 = vpop.f32.mrf.mxu1 }
 0x47a   : > { %7457 = vst [vmem:[%s13047_s29 + $0x78] sm:$0xff] %v7425_v2  ;;  %v7423_v28 = vadd.f32 %v13042_v20, %v7331_v49  ;;  %v7352_v9 = vadd.f32 %v8923_v53, %v13044_v57 }
 0x47b   : > { %v7343_v27 = vpop.f32.mrf.mxu1 }
 0x47c   : > { %7455 = vst [vmem:[%s13047_s29 + $0x68] sm:$0xff] %v7423_v28  ;;  %v7428_v33 = vadd.f32 %v13042_v20, %v7352_v9  ;;  %v7344_v54 = vadd.f32 %v7343_v27, %v13051_v52  ;;  %v8884_v52 = vpop.f32.mrf.mxu0 }
 0x47d   : > { %v8924_v11 = vpop.f32.mrf.mxu1 }
 0x47e   : > { %7460 = vst [vmem:[%s13047_s29 + $0x90] sm:$0xff] %v7428_v33  ;;  %v7426_v23 = vadd.f32 %v13042_v20, %v7344_v54  ;;  %v7355_v48 = vadd.f32 %v8924_v11, %v8876_v63  ;;  %v7169_v63 = vpop.f32.mrf.mxu0 }
 0x47f   : > { %v7346_v58 = vpop.f32.mrf.mxu1 }
 0x480   : > { %7458 = vst [vmem:[%s13047_s29 + $0x80] sm:$0xff] %v7426_v23  ;;  %v7429_v57 = vadd.f32 %v13042_v20, %v7355_v48  ;;  %v7347_v1 = vadd.f32 %v7346_v58, %v7137_v37  ;;  %v8887_v36 = vpop.f32.mrf.mxu0 }
 0x481   : > { %v8927_v22 = vpop.f32.mrf.mxu1 }
 0x482   : > { %7461 = vst [vmem:[%s13047_s29 + $0x98] sm:$0xff] %v7429_v57  ;;  %v7427_v29 = vadd.f32 %v13042_v20, %v7347_v1  ;;  %v7368_v26 = vadd.f32 %v8927_v22, %v8879_v8  ;;  %v7182_v24 = vpop.f32.mrf.mxu0 }
 0x483   : > { %v7359_v43 = vpop.f32.mrf.mxu1 }
 0x484   : > { %7459 = vst [vmem:[%s13047_s29 + $0x88] sm:$0xff] %v7427_v29  ;;  %v7432_v13 = vadd.f32 %v13042_v20, %v7368_v26  ;;  %v7360_v16 = vadd.f32 %v7359_v43, %v7150_v7  ;;  %v8888_v55 = vpop.f32.mrf.mxu0 }
 0x485   : > { %v8928_v35 = vpop.f32.mrf.mxu1 }
 0x486   : > { %7464 = vst [vmem:[%s13047_s29 + $0xb0] sm:$0xff] %v7432_v13  ;;  %v7430_v25 = vadd.f32 %v13042_v20, %v7360_v16  ;;  %v7371_v10 = vadd.f32 %v8928_v35, %v8880_v6  ;;  %v7185_v50 = vpop.f32.mrf.mxu0 }
 0x487   : > { %v7362_v34 = vpop.f32.mrf.mxu1 }
 0x488   : > { %7462 = vst [vmem:[%s13047_s29 + $0xa0] sm:$0xff] %v7430_v25  ;;  %v7433_v59 = vadd.f32 %v13042_v20, %v7371_v10  ;;  %v7363_v44 = vadd.f32 %v7362_v34, %v7153_v18 }
 0x489   : > { %v8931_v45 = vpop.f32.mrf.mxu1 }
 0x48a   : > { %7465 = vst [vmem:[%s13047_s29 + $0xb8] sm:$0xff] %v7433_v59  ;;  %v7431_v60 = vadd.f32 %v13042_v20, %v7363_v44  ;;  %v7384_v31 = vadd.f32 %v8931_v45, %v8883_v38 }
 0x48b   : > { %v7375_v37 = vpop.f32.mrf.mxu1 }
 0x48c   : > { %7463 = vst [vmem:[%s13047_s29 + $0xa8] sm:$0xff] %v7431_v60  ;;  %v7436_v47 = vadd.f32 %v13042_v20, %v7384_v31  ;;  %v7376_v42 = vadd.f32 %v7375_v37, %v7166_v32 }
 0x48d   : > { %v8932_v17 = vpop.f32.mrf.mxu1 }
 0x48e   : > { %7468 = vst [vmem:[%s13047_s29 + $0xd0] sm:$0xff] %v7436_v47  ;;  %v7434_v4 = vadd.f32 %v13042_v20, %v7376_v42  ;;  %v7387_v21 = vadd.f32 %v8932_v17, %v8884_v52 }
 0x48f   : > { %v7378_v8 = vpop.f32.mrf.mxu1 }
 0x490   : > { %7466 = vst [vmem:[%s13047_s29 + $0xc0] sm:$0xff] %v7434_v4  ;;  %v7437_v30 = vadd.f32 %v13042_v20, %v7387_v21  ;;  %v7379_v15 = vadd.f32 %v7378_v8, %v7169_v63 }
 0x491   : > { %v8935_v0 = vpop.f32.mrf.mxu1 }
 0x492   : > { %7469 = vst [vmem:[%s13047_s29 + $0xd8] sm:$0xff] %v7437_v30  ;;  %v7435_v14 = vadd.f32 %v13042_v20, %v7379_v15  ;;  %v7400_v12 = vadd.f32 %v8935_v0, %v8887_v36 }
 0x493   : > { %v7391_v7 = vpop.f32.mrf.mxu1 }
 0x494   : > { %7467 = vst [vmem:[%s13047_s29 + $0xc8] sm:$0xff] %v7435_v14  ;;  %v7440_v40 = vadd.f32 %v13042_v20, %v7400_v12  ;;  %v7392_v5 = vadd.f32 %v7391_v7, %v7182_v24 }
 0x495   : > { %v8936_v46 = vpop.f32.mrf.mxu1 }
 0x496   : > { %7472 = vst [vmem:[%s13047_s29 + $0xf0] sm:$0xff] %v7440_v40  ;;  %v7438_v19 = vadd.f32 %v13042_v20, %v7392_v5  ;;  %v7403_v39 = vadd.f32 %v8936_v46, %v8888_v55 }
 0x497   : > { %v7394_v6 = vpop.f32.mrf.mxu1 }
 0x498   : > { %7470 = vst [vmem:[%s13047_s29 + $0xe0] sm:$0xff] %v7438_v19  ;;  %v7441_v62 = vadd.f32 %v13042_v20, %v7403_v39  ;;  %v7395_v41 = vadd.f32 %v7394_v6, %v7185_v50 }
 0x49a   : > { %7473 = vst [vmem:[%s13047_s29 + $0xf8] sm:$0xff] %v7441_v62  ;;  %v7439_v56 = vadd.f32 %v13042_v20, %v7395_v41 }
 0x49c   : > { %7471 = vst [vmem:[%s13047_s29 + $0xe8] sm:$0xff] %v7439_v56 }
 0x49d   : > { %9464 = shalt.err (!%p9461_p11)
}
 0x49e   : > { %s9465_s10 = scalar_lea.hbm %s13121_s27, 4096  ;;  %s9469_s1 = scalar_lea.hbm %s13180_s6, 8192 }
 0x49f   : > { %p9466_p3 = scmp.ne.s32.totalorder %s13121_s27, %s9465_s10  ;;  %p9470_p10 = scmp.lt.s32.totalorder %s13121_s27, %s13180_s6 }
 0x4a0   : > { %p9471_p13 = scmp.lt.s32.totalorder %s9469_s1, %s9465_s10 }
 0x4a1   : > { %p9467_p4 = pnand %p9466_p3, %p9722_p12 }
 0x4a2   : > { %p9472_p6 = por %p9471_p13, %p9470_p10 }
 0x4a3   : > { %p9468_p1 = pneg %p9467_p4 }
 0x4a5   : > { %p9473_p2 = pnand %p9472_p6, %p9468_p1 }
 0x4a7   : > { %9476 = shalt.err (!%p9473_p2)
}
 0x4a8   : > { %s9556_s29 = smov 128   ;;  %s9557_s19 = smov 8  }
 0x4a9   : > { %8959 = dma.vmem_to_hbm [thread:$0]  (%p9722_p12), %s13123_s14, 4096, %s13121_s27, %s7475_s24, %s9556_s29, %s9556_s29, %s9557_s19  }
 0x4aa PF: > { %s7505_s7 = sand.u32 1, %s9523_s21   ;;  %p14271_p7 = scmp.ge.s32.totalorder %s9543_s26, 2 }
 0x4ab   : > { %s7506_s9 = scalar_lea.sflag [#allocation5], %s7505_s7 }
 0x4ac   : > { %p8982_p5 = pnand %p14271_p7, %p9730_p0 }
 0x4ae   : > { %p8983_p8 = pneg %p8982_p5 }
 0x4b0   : > { %9518 = dma.done.wait (%p8983_p8), %s7506_s9, 4096  }
 0x4b1   : > { %9520 = vsyncadd (%p8983_p8), %s7506_s9, 4294963200  ;;  %s25_s26 = sadd.s32 1, %s9543_s26   ;;  %s14272_s21 = smov %s9527_s22 }
 0x4b2   : > { %p22_p9 = scmp.ge.s32.totalorder %s25_s26, 4   ;;  %s14273_s22 = smov %s9531_s23 }
 0x4b3   : > { %s14274_s23 = smov %s9728_s17  ;;  %s14275_s24 = smov %s9539_s25 }
 0x4b4   : > { %s14276_s25 = smov %s14278_s13  ;;  %24 = sbr.rel (!%p22_p9) target bundleno = 13 (0xd), region = 109 }
 0x4b9   :  { %7511 = vsyncpa [#allocation4], 1 }
 0x4ba   :  { %7513 = vsyncpa [#allocation4 + $0x1], 1 }
 0x4bb   :  { %7514 = vsyncpa [#allocation7], 1 }
 0x4bc   :  { %7515 = vsyncpa [#allocation10], 1 }
 0x4bd   :  { %7516 = vsyncpa [#allocation13], 1 }
 0x4be   :  { %7517 = vsyncpa [#allocation5], 1 }
 0x4bf   :  { %7519 = vsyncpa [#allocation5 + $0x1], 1 }

</bundles_post_ra>
